<compile_context>
chip_gen: v5e
topology: v5e:2x2
jax: 0.10.0
libtpu: 0.0.40
codegen_flags: <defaults>
</compile_context>

<pallas_src>
import functools

import numpy as np
import jax
import jax.numpy as jnp
from jax.experimental import pallas as pl
from jax.experimental.pallas import tpu as pltpu

PAD = 0
LANE = 128
NEG_BIG = -1e30


def _decoder_kernel(tok0_ref, mask_ref, enc_ref, emb_ref,
                    wih_e_ref, wih_c_ref, whh_ref, bih_ref, bhh_ref,
                    uvw_ref, uvb_ref, cw_ref, cb_ref,
                    out_ref):
    """Full greedy decode (all T steps, all layers) in one kernel invocation."""
    B, T, Vp = out_ref.shape
    L, H, _ = whh_ref.shape

    enc = enc_ref[...]                      # (B, S, D)
    mask = mask_ref[...]                    # (B, S), 1.0 where src token == PAD
    emb_tbl = emb_ref[...]                  # (Vp, Dw)

    # Hoist all weight loads / broadcast constants out of the decode loop
    # (JAX does not CSE broadcasts inside loops).
    wih_e = [wih_e_ref[l] for l in range(L)]    # (Dw, 3H) each
    wih_c = [wih_c_ref[l] for l in range(L)]    # (D , 3H)
    whh = [whh_ref[l] for l in range(L)]        # (H , 3H)
    bih = [bih_ref[l] for l in range(L)]        # (1 , 3H)
    bhh = [bhh_ref[l] for l in range(L)]        # (1 , 3H)
    uvw = uvw_ref[...]                          # (D, Vp) == (U.weight + V.weight).T
    uvb = uvb_ref[...]                          # (1, Vp)
    cw = cw_ref[...]                            # (D, Vp)
    cb = cb_ref[...]                            # (1, Vp)

    inv_temper = jnp.float32(1.0 / np.sqrt(float(H)))
    iota = jax.lax.broadcasted_iota(jnp.int32, (B, Vp), 1)
    sentinel = jnp.int32(Vp)
    neg = jnp.float32(NEG_BIG)

    # step 0: decoder_hidden = enc_output.mean(1); dec_input = tgt_seq[:, 0]
    hidden = jnp.mean(enc, axis=1)              # (B, H)   stays in vregs
    onehot = tok0_ref[...]                      # (B, Vp)  stays in vregs

    for t in range(T):                          # static unroll over decode steps
        # Embedding lookup as one-hot @ table (keeps token handling vectorized).
        embedded = jnp.dot(onehot, emb_tbl,
                           preferred_element_type=jnp.float32)        # (B, Dw)
        context = embedded                       # overwritten in layer 0

        for l in range(L):                       # static layer unroll
            # ---- ScaledDotProductAttention(hidden, enc, enc, mask) on VPU ----
            scores = jnp.sum(hidden[:, None, :] * enc, axis=-1) * inv_temper
            scores = jnp.where(mask > 0.0, neg, scores)                # (B, S)
            m = jnp.max(scores, axis=-1, keepdims=True)
            e = jnp.exp(scores - m)
            attn = e / jnp.sum(e, axis=-1, keepdims=True)              # (B, S)
            context = jnp.sum(attn[:, :, None] * enc, axis=1)          # (B, D)

            # ---- single-step GRU cell (PyTorch gate order r, z, n) ----
            # concat-free input projection: emb block + context block.
            gi = (jnp.dot(embedded, wih_e[l], preferred_element_type=jnp.float32)
                  + jnp.dot(context, wih_c[l], preferred_element_type=jnp.float32)
                  + bih[l])                                            # (B, 3H)
            gh = jnp.dot(hidden, whh[l],
                         preferred_element_type=jnp.float32) + bhh[l]  # (B, 3H)
            r = jax.nn.sigmoid(gi[:, :H] + gh[:, :H])
            z = jax.nn.sigmoid(gi[:, H:2 * H] + gh[:, H:2 * H])
            n = jnp.tanh(gi[:, 2 * H:] + r * gh[:, 2 * H:])
            h_new = (1.0 - z) * n + z * hidden
            embedded = h_new
            hidden = h_new

        # output = U(hidden) + V(embedded) + C(context); U/V fused because
        # embedded == hidden after the layer loop (requires n_layers >= 1).
        logits = (jnp.dot(hidden, uvw, preferred_element_type=jnp.float32) + uvb
                  + jnp.dot(context, cw, preferred_element_type=jnp.float32) + cb)

        out_ref[:, t:t + 1, :] = logits[:, None, :]        # (B, T, Vp) layout

        # Greedy next token (argmax of log_softmax == argmax of logits), kept
        # as a one-hot row; first index wins ties; padded columns are -1e30.
        if t + 1 < T:
            vmax = jnp.max(logits, axis=-1, keepdims=True)
            idx = jnp.min(jnp.where(logits == vmax, iota, sentinel),
                          axis=-1, keepdims=True)
            onehot = (iota == idx).astype(jnp.float32)


def rnn_decoder_forward(tgt_seq, src_seq, enc_output, kparams, cfg):
    B, T = tgt_seq.shape
    _, S, _ = enc_output.shape
    V = cfg["n_tgt_vocab"]
    Vp = kparams["emb"].shape[0]
    assert cfg["n_layers"] >= 1, "U/V fusion requires n_layers >= 1"

    mask = (src_seq == PAD).astype(jnp.float32)
    if S == 1:   # matches `if encoder_outputs.size(1) == 1: mask = None`
        mask = jnp.zeros_like(mask)
    tok0 = jax.nn.one_hot(tgt_seq[:, 0], Vp, dtype=jnp.float32)

    vmem = functools.partial(pl.BlockSpec, memory_space=pltpu.MemorySpace.VMEM)
    out = pl.pallas_call(
        _decoder_kernel,
        out_shape=jax.ShapeDtypeStruct((B, T, Vp), jnp.float32),
        in_specs=[vmem() for _ in range(13)],
        out_specs=vmem(),
    )(tok0, mask, enc_output,
      kparams["emb"], kparams["wih_emb_t"], kparams["wih_ctx_t"],
      kparams["whh_t"], kparams["bih"], kparams["bhh"],
      kparams["uvw_t"], kparams["uvb"], kparams["cw_t"], kparams["cb"])

    return out[:, :, :V]   # drop vocab lane padding; already (B, T, V) layout


def init_params(key, cfg):
    """Raw PyTorch-layout parameters (used by the pure-JAX reference)."""
    V = cfg["n_tgt_vocab"]
    D = cfg["d_model"]
    Dw = cfg["d_word_vec"]
    L = cfg["n_layers"]
    H = D
    ks = jax.random.split(key, 11)

    emb = 0.1 * jax.random.normal(ks[0], (V, Dw), jnp.float32)
    emb = emb.at[PAD].set(0.0)   # padding_idx row is zero

    lim = 1.0 / np.sqrt(H)
    wih = jax.random.uniform(ks[1], (L, 3 * H, Dw + D), jnp.float32, -lim, lim)
    whh = jax.random.uniform(ks[2], (L, 3 * H, H), jnp.float32, -lim, lim)
    bih = jax.random.uniform(ks[3], (L, 3 * H), jnp.float32, -lim, lim)
    bhh = jax.random.uniform(ks[4], (L, 3 * H), jnp.float32, -lim, lim)

    limU = 1.0 / np.sqrt(D)
    uw = jax.random.uniform(ks[5], (V, D), jnp.float32, -limU, limU)
    ub = jax.random.uniform(ks[6], (V,), jnp.float32, -limU, limU)
    vw = jax.random.uniform(ks[7], (V, D), jnp.float32, -limU, limU)
    vb = jax.random.uniform(ks[8], (V,), jnp.float32, -limU, limU)
    cw = jax.random.uniform(ks[9], (V, D), jnp.float32, -limU, limU)
    cb = jax.random.uniform(ks[10], (V,), jnp.float32, -limU, limU)

    return dict(emb=emb, wih=wih, whh=whh, bih=bih, bhh=bhh,
                uw=uw, ub=ub, vw=vw, vb=vb, cw=cw, cb=cb)


def pack_params(p, cfg):
    """Wrapper-side re-layout: U+V fusion, vocab padding to a lane multiple,
    concat-free GRU input weights, pre-transposed matmul operands."""
    Dw = cfg["d_word_vec"]
    V = cfg["n_tgt_vocab"]
    Vp = ((V + LANE - 1) // LANE) * LANE
    pad = Vp - V

    wih_t = jnp.transpose(p["wih"], (0, 2, 1))                  # (L, Dw+D, 3H)
    uvw_t = jnp.pad((p["uw"] + p["vw"]).T, ((0, 0), (0, pad)))  # (D, Vp)
    # padded logit columns get -1e30 so they can never win the greedy argmax
    uvb = jnp.pad((p["ub"] + p["vb"])[None, :], ((0, 0), (0, pad)),
                  constant_values=NEG_BIG)                      # (1, Vp)
    cw_t = jnp.pad(p["cw"].T, ((0, 0), (0, pad)))               # (D, Vp)
    cb = jnp.pad(p["cb"][None, :], ((0, 0), (0, pad)))          # (1, Vp)

    return {
        "emb": jnp.pad(p["emb"], ((0, pad), (0, 0))),           # (Vp, Dw)
        "wih_emb_t": wih_t[:, :Dw, :],                          # (L, Dw, 3H)
        "wih_ctx_t": wih_t[:, Dw:, :],                          # (L, D , 3H)
        "whh_t": jnp.transpose(p["whh"], (0, 2, 1)),            # (L, H, 3H)
        "bih": p["bih"][:, None, :],                            # (L, 1, 3H)
        "bhh": p["bhh"][:, None, :],                            # (L, 1, 3H)
        "uvw_t": uvw_t, "uvb": uvb, "cw_t": cw_t, "cb": cb,
    }


def reference_forward(tgt_seq, src_seq, enc, p, cfg):
    """Pure-JAX reference mirroring RNNDecoder.forward (eval mode)."""
    B, T = tgt_seq.shape
    D = cfg["d_model"]
    H = D
    L = cfg["n_layers"]
    mask = (src_seq == PAD)

    hidden = enc.mean(axis=1)
    tok = tgt_seq[:, 0]
    outs = []
    for _ in range(T):
        embedded = p["emb"][tok]
        h = hidden
        context = embedded
        for l in range(L):
            scores = jnp.einsum("bd,bsd->bs", h, enc) / np.sqrt(float(D))
            scores = jnp.where(mask, -jnp.inf, scores)
            attn = jax.nn.softmax(scores, axis=-1)
            context = jnp.einsum("bs,bsd->bd", attn, enc)
            x = jnp.concatenate([embedded, context], axis=-1)
            gi = x @ p["wih"][l].T + p["bih"][l]
            gh = h @ p["whh"][l].T + p["bhh"][l]
            r = jax.nn.sigmoid(gi[:, :H] + gh[:, :H])
            z = jax.nn.sigmoid(gi[:, H:2 * H] + gh[:, H:2 * H])
            n = jnp.tanh(gi[:, 2 * H:] + r * gh[:, 2 * H:])
            h_new = (1.0 - z) * n + z * h
            embedded = h_new
            h = h_new
        logits = (h @ p["uw"].T + p["ub"]
                  + embedded @ p["vw"].T + p["vb"]
                  + context @ p["cw"].T + p["cb"])
        outs.append(logits)
        tok = jnp.argmax(logits, axis=-1)
        hidden = h
    return jnp.stack(outs, axis=1)


if __name__ == "__main__":
    cfg = dict(n_tgt_vocab=24, n_max_seq=16, n_layers=2,
               d_word_vec=32, d_model=32)
    B, T, S = 2, 5, 6

    key = jax.random.PRNGKey(0)
    kp, ke, kt, ks = jax.random.split(key, 4)
    raw = init_params(kp, cfg)
    kparams = pack_params(raw, cfg)

    enc_output = jax.random.normal(ke, (B, S, cfg["d_model"]), jnp.float32)
    tgt_seq = jax.random.randint(kt, (B, T), 1, cfg["n_tgt_vocab"], jnp.int32)
    src_seq = jax.random.randint(ks, (B, S), 1, cfg["n_tgt_vocab"], jnp.int32)
    src_seq = src_seq.at[:, -1].set(PAD)   # ensure some source padding

    out = rnn_decoder_forward(tgt_seq, src_seq, enc_output, kparams, cfg)
    out = jax.block_until_ready(out)
    assert out.shape == (B, T, cfg["n_tgt_vocab"])

    ref = reference_forward(tgt_seq, src_seq, enc_output, raw, cfg)
    np.testing.assert_allclose(np.asarray(out), np.asarray(ref),
                               rtol=2e-3, atol=2e-3)
    print("KERNEL_OK")
</pallas_src>

<mosaic_0001>
module attributes {stable_mosaic.version = 11 : i64} {
  func.func @_decoder_kernel(%arg0: memref<2x128xf32, #tpu.memory_space<vmem>>, %arg1: memref<2x6xf32, #tpu.memory_space<vmem>>, %arg2: memref<2x6x32xf32, #tpu.memory_space<vmem>>, %arg3: memref<128x32xf32, #tpu.memory_space<vmem>>, %arg4: memref<2x32x96xf32, #tpu.memory_space<vmem>>, %arg5: memref<2x32x96xf32, #tpu.memory_space<vmem>>, %arg6: memref<2x32x96xf32, #tpu.memory_space<vmem>>, %arg7: memref<2x1x96xf32, #tpu.memory_space<vmem>>, %arg8: memref<2x1x96xf32, #tpu.memory_space<vmem>>, %arg9: memref<32x128xf32, #tpu.memory_space<vmem>>, %arg10: memref<1x128xf32, #tpu.memory_space<vmem>>, %arg11: memref<32x128xf32, #tpu.memory_space<vmem>>, %arg12: memref<1x128xf32, #tpu.memory_space<vmem>>, %arg13: memref<2x5x128xf32, #tpu.memory_space<vmem>>) attributes {dimension_semantics = [], scalar_prefetch = 0 : i64, scratch_operands = 0 : i64, tpu.core_type = #tpu.core_type<tc>} {
    %c0 = arith.constant 0 : index
    %c0_0 = arith.constant 0 : index
    %c0_1 = arith.constant 0 : index
    %0 = vector.load %arg2[%c0, %c0_0, %c0_1] : memref<2x6x32xf32, #tpu.memory_space<vmem>>, vector<2x6x32xf32>
    %c0_2 = arith.constant 0 : index
    %c0_3 = arith.constant 0 : index
    %1 = vector.load %arg1[%c0_2, %c0_3] : memref<2x6xf32, #tpu.memory_space<vmem>>, vector<2x6xf32>
    %c0_4 = arith.constant 0 : index
    %c0_5 = arith.constant 0 : index
    %2 = vector.load %arg3[%c0_4, %c0_5] : memref<128x32xf32, #tpu.memory_space<vmem>>, vector<128x32xf32>
    %c0_6 = arith.constant 0 : index
    %c0_7 = arith.constant 0 : index
    %c0_8 = arith.constant 0 : index
    %3 = vector.load %arg4[%c0_6, %c0_7, %c0_8] : memref<2x32x96xf32, #tpu.memory_space<vmem>>, vector<1x32x96xf32>
    %4 = vector.shape_cast %3 : vector<1x32x96xf32> to vector<32x96xf32>
    %c1 = arith.constant 1 : index
    %c0_9 = arith.constant 0 : index
    %c0_10 = arith.constant 0 : index
    %5 = vector.load %arg4[%c1, %c0_9, %c0_10] : memref<2x32x96xf32, #tpu.memory_space<vmem>>, vector<1x32x96xf32>
    %6 = vector.shape_cast %5 : vector<1x32x96xf32> to vector<32x96xf32>
    %c0_11 = arith.constant 0 : index
    %c0_12 = arith.constant 0 : index
    %c0_13 = arith.constant 0 : index
    %7 = vector.load %arg5[%c0_11, %c0_12, %c0_13] : memref<2x32x96xf32, #tpu.memory_space<vmem>>, vector<1x32x96xf32>
    %8 = vector.shape_cast %7 : vector<1x32x96xf32> to vector<32x96xf32>
    %c1_14 = arith.constant 1 : index
    %c0_15 = arith.constant 0 : index
    %c0_16 = arith.constant 0 : index
    %9 = vector.load %arg5[%c1_14, %c0_15, %c0_16] : memref<2x32x96xf32, #tpu.memory_space<vmem>>, vector<1x32x96xf32>
    %10 = vector.shape_cast %9 : vector<1x32x96xf32> to vector<32x96xf32>
    %c0_17 = arith.constant 0 : index
    %c0_18 = arith.constant 0 : index
    %c0_19 = arith.constant 0 : index
    %11 = vector.load %arg6[%c0_17, %c0_18, %c0_19] : memref<2x32x96xf32, #tpu.memory_space<vmem>>, vector<1x32x96xf32>
    %12 = vector.shape_cast %11 : vector<1x32x96xf32> to vector<32x96xf32>
    %c1_20 = arith.constant 1 : index
    %c0_21 = arith.constant 0 : index
    %c0_22 = arith.constant 0 : index
    %13 = vector.load %arg6[%c1_20, %c0_21, %c0_22] : memref<2x32x96xf32, #tpu.memory_space<vmem>>, vector<1x32x96xf32>
    %14 = vector.shape_cast %13 : vector<1x32x96xf32> to vector<32x96xf32>
    %c0_23 = arith.constant 0 : index
    %c0_24 = arith.constant 0 : index
    %c0_25 = arith.constant 0 : index
    %15 = vector.load %arg7[%c0_23, %c0_24, %c0_25] : memref<2x1x96xf32, #tpu.memory_space<vmem>>, vector<1x1x96xf32>
    %16 = vector.shape_cast %15 : vector<1x1x96xf32> to vector<1x96xf32>
    %c1_26 = arith.constant 1 : index
    %c0_27 = arith.constant 0 : index
    %c0_28 = arith.constant 0 : index
    %17 = vector.load %arg7[%c1_26, %c0_27, %c0_28] : memref<2x1x96xf32, #tpu.memory_space<vmem>>, vector<1x1x96xf32>
    %18 = vector.shape_cast %17 : vector<1x1x96xf32> to vector<1x96xf32>
    %c0_29 = arith.constant 0 : index
    %c0_30 = arith.constant 0 : index
    %c0_31 = arith.constant 0 : index
    %19 = vector.load %arg8[%c0_29, %c0_30, %c0_31] : memref<2x1x96xf32, #tpu.memory_space<vmem>>, vector<1x1x96xf32>
    %20 = vector.shape_cast %19 : vector<1x1x96xf32> to vector<1x96xf32>
    %c1_32 = arith.constant 1 : index
    %c0_33 = arith.constant 0 : index
    %c0_34 = arith.constant 0 : index
    %21 = vector.load %arg8[%c1_32, %c0_33, %c0_34] : memref<2x1x96xf32, #tpu.memory_space<vmem>>, vector<1x1x96xf32>
    %22 = vector.shape_cast %21 : vector<1x1x96xf32> to vector<1x96xf32>
    %c0_35 = arith.constant 0 : index
    %c0_36 = arith.constant 0 : index
    %23 = vector.load %arg9[%c0_35, %c0_36] : memref<32x128xf32, #tpu.memory_space<vmem>>, vector<32x128xf32>
    %c0_37 = arith.constant 0 : index
    %c0_38 = arith.constant 0 : index
    %24 = vector.load %arg10[%c0_37, %c0_38] : memref<1x128xf32, #tpu.memory_space<vmem>>, vector<1x128xf32>
    %c0_39 = arith.constant 0 : index
    %c0_40 = arith.constant 0 : index
    %25 = vector.load %arg11[%c0_39, %c0_40] : memref<32x128xf32, #tpu.memory_space<vmem>>, vector<32x128xf32>
    %c0_41 = arith.constant 0 : index
    %c0_42 = arith.constant 0 : index
    %26 = vector.load %arg12[%c0_41, %c0_42] : memref<1x128xf32, #tpu.memory_space<vmem>>, vector<1x128xf32>
    %27 = tpu.iota {dimensions = array<i32: 1>} : vector<2x128xi32>
    %cst = arith.constant dense<0.000000e+00> : vector<2x32xf32>
    %28 = vector.multi_reduction <add>, %0, %cst [1] : vector<2x6x32xf32> to vector<2x32xf32>
    %cst_43 = arith.constant 6.000000e+00 : f32
    %29 = vector.broadcast %cst_43 : f32 to vector<2x32xf32>
    %30 = arith.divf %28, %29 : vector<2x32xf32>
    %c0_44 = arith.constant 0 : index
    %c0_45 = arith.constant 0 : index
    %31 = vector.load %arg0[%c0_44, %c0_45] : memref<2x128xf32, #tpu.memory_space<vmem>>, vector<2x128xf32>
    %cst_46 = arith.constant dense<0.000000e+00> : vector<2x32xf32>
    %32 = tpu.matmul %31, %2, %cst_46 {dimension_numbers = #tpu.dot_dimension_numbers<[1], [0], [0], [1], [0, 0, 1, 1], [], []>} : vector<2x128xf32>, vector<128x32xf32>, vector<2x32xf32> -> vector<2x32xf32>
    %33 = vector.shape_cast %30 : vector<2x32xf32> to vector<2x1x32xf32>
    %34 = vector.broadcast %33 : vector<2x1x32xf32> to vector<2x6x32xf32>
    %35 = arith.mulf %34, %0 : vector<2x6x32xf32>
    %cst_47 = arith.constant dense<0.000000e+00> : vector<2x6xf32>
    %36 = vector.multi_reduction <add>, %35, %cst_47 [2] : vector<2x6x32xf32> to vector<2x6xf32>
    %cst_48 = arith.constant 0.176776692 : f32
    %37 = vector.broadcast %cst_48 : f32 to vector<2x6xf32>
    %38 = arith.mulf %36, %37 : vector<2x6xf32>
    %cst_49 = arith.constant 0.000000e+00 : f32
    %39 = vector.broadcast %cst_49 : f32 to vector<2x6xf32>
    %40 = arith.cmpf ogt, %1, %39 : vector<2x6xf32>
    %cst_50 = arith.constant -1.000000e+30 : f32
    %41 = vector.broadcast %cst_50 : f32 to vector<2x6xf32>
    %42 = arith.select %40, %41, %38 : vector<2x6xi1>, vector<2x6xf32>
    %cst_51 = arith.constant dense<0xFF800000> : vector<2xf32>
    %43 = vector.multi_reduction <maximumf>, %42, %cst_51 [1] : vector<2x6xf32> to vector<2xf32>
    %44 = vector.shape_cast %43 : vector<2xf32> to vector<2x1xf32>
    %45 = vector.broadcast %44 : vector<2x1xf32> to vector<2x6xf32>
    %46 = arith.subf %42, %45 : vector<2x6xf32>
    %47 = math.exp %46 : vector<2x6xf32>
    %cst_52 = arith.constant dense<0.000000e+00> : vector<2xf32>
    %48 = vector.multi_reduction <add>, %47, %cst_52 [1] : vector<2x6xf32> to vector<2xf32>
    %49 = vector.shape_cast %48 : vector<2xf32> to vector<2x1xf32>
    %50 = vector.broadcast %49 : vector<2x1xf32> to vector<2x6xf32>
    %51 = arith.divf %47, %50 : vector<2x6xf32>
    %52 = vector.shape_cast %51 : vector<2x6xf32> to vector<2x6x1xf32>
    %53 = vector.broadcast %52 : vector<2x6x1xf32> to vector<2x6x32xf32>
    %54 = arith.mulf %53, %0 : vector<2x6x32xf32>
    %cst_53 = arith.constant dense<0.000000e+00> : vector<2x32xf32>
    %55 = vector.multi_reduction <add>, %54, %cst_53 [1] : vector<2x6x32xf32> to vector<2x32xf32>
    %cst_54 = arith.constant dense<0.000000e+00> : vector<2x96xf32>
    %56 = tpu.matmul %32, %4, %cst_54 {dimension_numbers = #tpu.dot_dimension_numbers<[1], [0], [0], [1], [0, 0, 1, 1], [], []>} : vector<2x32xf32>, vector<32x96xf32>, vector<2x96xf32> -> vector<2x96xf32>
    %cst_55 = arith.constant dense<0.000000e+00> : vector<2x96xf32>
    %57 = tpu.matmul %55, %8, %cst_55 {dimension_numbers = #tpu.dot_dimension_numbers<[1], [0], [0], [1], [0, 0, 1, 1], [], []>} : vector<2x32xf32>, vector<32x96xf32>, vector<2x96xf32> -> vector<2x96xf32>
    %58 = arith.addf %56, %57 : vector<2x96xf32>
    %59 = vector.broadcast %16 : vector<1x96xf32> to vector<2x96xf32>
    %60 = arith.addf %58, %59 : vector<2x96xf32>
    %cst_56 = arith.constant dense<0.000000e+00> : vector<2x96xf32>
    %61 = tpu.matmul %30, %12, %cst_56 {dimension_numbers = #tpu.dot_dimension_numbers<[1], [0], [0], [1], [0, 0, 1, 1], [], []>} : vector<2x32xf32>, vector<32x96xf32>, vector<2x96xf32> -> vector<2x96xf32>
    %62 = vector.broadcast %20 : vector<1x96xf32> to vector<2x96xf32>
    %63 = arith.addf %61, %62 : vector<2x96xf32>
    %64 = vector.extract_strided_slice %60 {offsets = [0, 0], sizes = [2, 32], strides = [1, 1]} : vector<2x96xf32> to vector<2x32xf32>
    %65 = vector.extract_strided_slice %63 {offsets = [0, 0], sizes = [2, 32], strides = [1, 1]} : vector<2x96xf32> to vector<2x32xf32>
    %66 = arith.addf %64, %65 : vector<2x32xf32>
    %67 = arith.negf %66 : vector<2x32xf32>
    %68 = math.exp %67 : vector<2x32xf32>
    %cst_57 = arith.constant 1.000000e+00 : f32
    %69 = vector.broadcast %cst_57 : f32 to vector<2x32xf32>
    %70 = arith.addf %69, %68 : vector<2x32xf32>
    %71 = arith.divf %69, %70 : vector<2x32xf32>
    %72 = vector.extract_strided_slice %60 {offsets = [0, 32], sizes = [2, 32], strides = [1, 1]} : vector<2x96xf32> to vector<2x32xf32>
    %73 = vector.extract_strided_slice %63 {offsets = [0, 32], sizes = [2, 32], strides = [1, 1]} : vector<2x96xf32> to vector<2x32xf32>
    %74 = arith.addf %72, %73 : vector<2x32xf32>
    %75 = arith.negf %74 : vector<2x32xf32>
    %76 = math.exp %75 : vector<2x32xf32>
    %cst_58 = arith.constant 1.000000e+00 : f32
    %77 = vector.broadcast %cst_58 : f32 to vector<2x32xf32>
    %78 = arith.addf %77, %76 : vector<2x32xf32>
    %79 = arith.divf %77, %78 : vector<2x32xf32>
    %80 = vector.extract_strided_slice %60 {offsets = [0, 64], sizes = [2, 32], strides = [1, 1]} : vector<2x96xf32> to vector<2x32xf32>
    %81 = vector.extract_strided_slice %63 {offsets = [0, 64], sizes = [2, 32], strides = [1, 1]} : vector<2x96xf32> to vector<2x32xf32>
    %82 = arith.mulf %71, %81 : vector<2x32xf32>
    %83 = arith.addf %80, %82 : vector<2x32xf32>
    %84 = math.tanh %83 : vector<2x32xf32>
    %cst_59 = arith.constant 1.000000e+00 : f32
    %85 = vector.broadcast %cst_59 : f32 to vector<2x32xf32>
    %86 = arith.subf %85, %79 : vector<2x32xf32>
    %87 = arith.mulf %86, %84 : vector<2x32xf32>
    %88 = arith.mulf %79, %30 : vector<2x32xf32>
    %89 = arith.addf %87, %88 : vector<2x32xf32>
    %90 = vector.shape_cast %89 : vector<2x32xf32> to vector<2x1x32xf32>
    %91 = vector.broadcast %90 : vector<2x1x32xf32> to vector<2x6x32xf32>
    %92 = arith.mulf %91, %0 : vector<2x6x32xf32>
    %cst_60 = arith.constant dense<0.000000e+00> : vector<2x6xf32>
    %93 = vector.multi_reduction <add>, %92, %cst_60 [2] : vector<2x6x32xf32> to vector<2x6xf32>
    %cst_61 = arith.constant 0.176776692 : f32
    %94 = vector.broadcast %cst_61 : f32 to vector<2x6xf32>
    %95 = arith.mulf %93, %94 : vector<2x6xf32>
    %cst_62 = arith.constant 0.000000e+00 : f32
    %96 = vector.broadcast %cst_62 : f32 to vector<2x6xf32>
    %97 = arith.cmpf ogt, %1, %96 : vector<2x6xf32>
    %cst_63 = arith.constant -1.000000e+30 : f32
    %98 = vector.broadcast %cst_63 : f32 to vector<2x6xf32>
    %99 = arith.select %97, %98, %95 : vector<2x6xi1>, vector<2x6xf32>
    %cst_64 = arith.constant dense<0xFF800000> : vector<2xf32>
    %100 = vector.multi_reduction <maximumf>, %99, %cst_64 [1] : vector<2x6xf32> to vector<2xf32>
    %101 = vector.shape_cast %100 : vector<2xf32> to vector<2x1xf32>
    %102 = vector.broadcast %101 : vector<2x1xf32> to vector<2x6xf32>
    %103 = arith.subf %99, %102 : vector<2x6xf32>
    %104 = math.exp %103 : vector<2x6xf32>
    %cst_65 = arith.constant dense<0.000000e+00> : vector<2xf32>
    %105 = vector.multi_reduction <add>, %104, %cst_65 [1] : vector<2x6xf32> to vector<2xf32>
    %106 = vector.shape_cast %105 : vector<2xf32> to vector<2x1xf32>
    %107 = vector.broadcast %106 : vector<2x1xf32> to vector<2x6xf32>
    %108 = arith.divf %104, %107 : vector<2x6xf32>
    %109 = vector.shape_cast %108 : vector<2x6xf32> to vector<2x6x1xf32>
    %110 = vector.broadcast %109 : vector<2x6x1xf32> to vector<2x6x32xf32>
    %111 = arith.mulf %110, %0 : vector<2x6x32xf32>
    %cst_66 = arith.constant dense<0.000000e+00> : vector<2x32xf32>
    %112 = vector.multi_reduction <add>, %111, %cst_66 [1] : vector<2x6x32xf32> to vector<2x32xf32>
    %cst_67 = arith.constant dense<0.000000e+00> : vector<2x96xf32>
    %113 = tpu.matmul %89, %6, %cst_67 {dimension_numbers = #tpu.dot_dimension_numbers<[1], [0], [0], [1], [0, 0, 1, 1], [], []>} : vector<2x32xf32>, vector<32x96xf32>, vector<2x96xf32> -> vector<2x96xf32>
    %cst_68 = arith.constant dense<0.000000e+00> : vector<2x96xf32>
    %114 = tpu.matmul %112, %10, %cst_68 {dimension_numbers = #tpu.dot_dimension_numbers<[1], [0], [0], [1], [0, 0, 1, 1], [], []>} : vector<2x32xf32>, vector<32x96xf32>, vector<2x96xf32> -> vector<2x96xf32>
    %115 = arith.addf %113, %114 : vector<2x96xf32>
    %116 = vector.broadcast %18 : vector<1x96xf32> to vector<2x96xf32>
    %117 = arith.addf %115, %116 : vector<2x96xf32>
    %cst_69 = arith.constant dense<0.000000e+00> : vector<2x96xf32>
    %118 = tpu.matmul %89, %14, %cst_69 {dimension_numbers = #tpu.dot_dimension_numbers<[1], [0], [0], [1], [0, 0, 1, 1], [], []>} : vector<2x32xf32>, vector<32x96xf32>, vector<2x96xf32> -> vector<2x96xf32>
    %119 = vector.broadcast %22 : vector<1x96xf32> to vector<2x96xf32>
    %120 = arith.addf %118, %119 : vector<2x96xf32>
    %121 = vector.extract_strided_slice %117 {offsets = [0, 0], sizes = [2, 32], strides = [1, 1]} : vector<2x96xf32> to vector<2x32xf32>
    %122 = vector.extract_strided_slice %120 {offsets = [0, 0], sizes = [2, 32], strides = [1, 1]} : vector<2x96xf32> to vector<2x32xf32>
    %123 = arith.addf %121, %122 : vector<2x32xf32>
    %124 = arith.negf %123 : vector<2x32xf32>
    %125 = math.exp %124 : vector<2x32xf32>
    %cst_70 = arith.constant 1.000000e+00 : f32
    %126 = vector.broadcast %cst_70 : f32 to vector<2x32xf32>
    %127 = arith.addf %126, %125 : vector<2x32xf32>
    %128 = arith.divf %126, %127 : vector<2x32xf32>
    %129 = vector.extract_strided_slice %117 {offsets = [0, 32], sizes = [2, 32], strides = [1, 1]} : vector<2x96xf32> to vector<2x32xf32>
    %130 = vector.extract_strided_slice %120 {offsets = [0, 32], sizes = [2, 32], strides = [1, 1]} : vector<2x96xf32> to vector<2x32xf32>
    %131 = arith.addf %129, %130 : vector<2x32xf32>
    %132 = arith.negf %131 : vector<2x32xf32>
    %133 = math.exp %132 : vector<2x32xf32>
    %cst_71 = arith.constant 1.000000e+00 : f32
    %134 = vector.broadcast %cst_71 : f32 to vector<2x32xf32>
    %135 = arith.addf %134, %133 : vector<2x32xf32>
    %136 = arith.divf %134, %135 : vector<2x32xf32>
    %137 = vector.extract_strided_slice %117 {offsets = [0, 64], sizes = [2, 32], strides = [1, 1]} : vector<2x96xf32> to vector<2x32xf32>
    %138 = vector.extract_strided_slice %120 {offsets = [0, 64], sizes = [2, 32], strides = [1, 1]} : vector<2x96xf32> to vector<2x32xf32>
    %139 = arith.mulf %128, %138 : vector<2x32xf32>
    %140 = arith.addf %137, %139 : vector<2x32xf32>
    %141 = math.tanh %140 : vector<2x32xf32>
    %cst_72 = arith.constant 1.000000e+00 : f32
    %142 = vector.broadcast %cst_72 : f32 to vector<2x32xf32>
    %143 = arith.subf %142, %136 : vector<2x32xf32>
    %144 = arith.mulf %143, %141 : vector<2x32xf32>
    %145 = arith.mulf %136, %89 : vector<2x32xf32>
    %146 = arith.addf %144, %145 : vector<2x32xf32>
    %cst_73 = arith.constant dense<0.000000e+00> : vector<2x128xf32>
    %147 = tpu.matmul %146, %23, %cst_73 {dimension_numbers = #tpu.dot_dimension_numbers<[1], [0], [0], [1], [0, 0, 1, 1], [], []>} : vector<2x32xf32>, vector<32x128xf32>, vector<2x128xf32> -> vector<2x128xf32>
    %148 = vector.broadcast %24 : vector<1x128xf32> to vector<2x128xf32>
    %149 = arith.addf %147, %148 : vector<2x128xf32>
    %cst_74 = arith.constant dense<0.000000e+00> : vector<2x128xf32>
    %150 = tpu.matmul %112, %25, %cst_74 {dimension_numbers = #tpu.dot_dimension_numbers<[1], [0], [0], [1], [0, 0, 1, 1], [], []>} : vector<2x32xf32>, vector<32x128xf32>, vector<2x128xf32> -> vector<2x128xf32>
    %151 = arith.addf %149, %150 : vector<2x128xf32>
    %152 = vector.broadcast %26 : vector<1x128xf32> to vector<2x128xf32>
    %153 = arith.addf %151, %152 : vector<2x128xf32>
    %154 = vector.shape_cast %153 : vector<2x128xf32> to vector<2x1x128xf32>
    %c0_75 = arith.constant 0 : index
    %c0_76 = arith.constant 0 : index
    %c0_77 = arith.constant 0 : index
    %155 = vector.load %arg13[%c0_75, %c0_76, %c0_77] : memref<2x5x128xf32, #tpu.memory_space<vmem>>, vector<2x1x128xf32>
    tpu.vector_store %arg13[%c0_75, %c0_76, %c0_77], %154 {strides = array<i32>} : memref<2x5x128xf32, #tpu.memory_space<vmem>>, vector<2x1x128xf32>,
    %cst_78 = arith.constant dense<0xFF800000> : vector<2xf32>
    %156 = vector.multi_reduction <maximumf>, %153, %cst_78 [1] : vector<2x128xf32> to vector<2xf32>
    %157 = vector.shape_cast %156 : vector<2xf32> to vector<2x1xf32>
    %158 = vector.broadcast %157 : vector<2x1xf32> to vector<2x128xf32>
    %159 = arith.cmpf oeq, %153, %158 : vector<2x128xf32>
    %c128_i32 = arith.constant 128 : i32
    %160 = vector.broadcast %c128_i32 : i32 to vector<2x128xi32>
    %161 = arith.select %159, %27, %160 : vector<2x128xi1>, vector<2x128xi32>
    %cst_79 = arith.constant dense<2147483647> : vector<2xi32>
    %162 = vector.multi_reduction <minsi>, %161, %cst_79 [1] : vector<2x128xi32> to vector<2xi32>
    %163 = vector.shape_cast %162 : vector<2xi32> to vector<2x1xi32>
    %164 = vector.broadcast %163 : vector<2x1xi32> to vector<2x128xi32>
    %165 = arith.cmpi eq, %27, %164 : vector<2x128xi32>
    %166 = arith.extui %165 : vector<2x128xi1> to vector<2x128xi32>
    %167 = arith.sitofp %166 : vector<2x128xi32> to vector<2x128xf32>
    %cst_80 = arith.constant dense<0.000000e+00> : vector<2x32xf32>
    %168 = tpu.matmul %167, %2, %cst_80 {dimension_numbers = #tpu.dot_dimension_numbers<[1], [0], [0], [1], [0, 0, 1, 1], [], []>} : vector<2x128xf32>, vector<128x32xf32>, vector<2x32xf32> -> vector<2x32xf32>
    %169 = vector.shape_cast %146 : vector<2x32xf32> to vector<2x1x32xf32>
    %170 = vector.broadcast %169 : vector<2x1x32xf32> to vector<2x6x32xf32>
    %171 = arith.mulf %170, %0 : vector<2x6x32xf32>
    %cst_81 = arith.constant dense<0.000000e+00> : vector<2x6xf32>
    %172 = vector.multi_reduction <add>, %171, %cst_81 [2] : vector<2x6x32xf32> to vector<2x6xf32>
    %cst_82 = arith.constant 0.176776692 : f32
    %173 = vector.broadcast %cst_82 : f32 to vector<2x6xf32>
    %174 = arith.mulf %172, %173 : vector<2x6xf32>
    %cst_83 = arith.constant 0.000000e+00 : f32
    %175 = vector.broadcast %cst_83 : f32 to vector<2x6xf32>
    %176 = arith.cmpf ogt, %1, %175 : vector<2x6xf32>
    %cst_84 = arith.constant -1.000000e+30 : f32
    %177 = vector.broadcast %cst_84 : f32 to vector<2x6xf32>
    %178 = arith.select %176, %177, %174 : vector<2x6xi1>, vector<2x6xf32>
    %cst_85 = arith.constant dense<0xFF800000> : vector<2xf32>
    %179 = vector.multi_reduction <maximumf>, %178, %cst_85 [1] : vector<2x6xf32> to vector<2xf32>
    %180 = vector.shape_cast %179 : vector<2xf32> to vector<2x1xf32>
    %181 = vector.broadcast %180 : vector<2x1xf32> to vector<2x6xf32>
    %182 = arith.subf %178, %181 : vector<2x6xf32>
    %183 = math.exp %182 : vector<2x6xf32>
    %cst_86 = arith.constant dense<0.000000e+00> : vector<2xf32>
    %184 = vector.multi_reduction <add>, %183, %cst_86 [1] : vector<2x6xf32> to vector<2xf32>
    %185 = vector.shape_cast %184 : vector<2xf32> to vector<2x1xf32>
    %186 = vector.broadcast %185 : vector<2x1xf32> to vector<2x6xf32>
    %187 = arith.divf %183, %186 : vector<2x6xf32>
    %188 = vector.shape_cast %187 : vector<2x6xf32> to vector<2x6x1xf32>
    %189 = vector.broadcast %188 : vector<2x6x1xf32> to vector<2x6x32xf32>
    %190 = arith.mulf %189, %0 : vector<2x6x32xf32>
    %cst_87 = arith.constant dense<0.000000e+00> : vector<2x32xf32>
    %191 = vector.multi_reduction <add>, %190, %cst_87 [1] : vector<2x6x32xf32> to vector<2x32xf32>
    %cst_88 = arith.constant dense<0.000000e+00> : vector<2x96xf32>
    %192 = tpu.matmul %168, %4, %cst_88 {dimension_numbers = #tpu.dot_dimension_numbers<[1], [0], [0], [1], [0, 0, 1, 1], [], []>} : vector<2x32xf32>, vector<32x96xf32>, vector<2x96xf32> -> vector<2x96xf32>
    %cst_89 = arith.constant dense<0.000000e+00> : vector<2x96xf32>
    %193 = tpu.matmul %191, %8, %cst_89 {dimension_numbers = #tpu.dot_dimension_numbers<[1], [0], [0], [1], [0, 0, 1, 1], [], []>} : vector<2x32xf32>, vector<32x96xf32>, vector<2x96xf32> -> vector<2x96xf32>
    %194 = arith.addf %192, %193 : vector<2x96xf32>
    %195 = vector.broadcast %16 : vector<1x96xf32> to vector<2x96xf32>
    %196 = arith.addf %194, %195 : vector<2x96xf32>
    %cst_90 = arith.constant dense<0.000000e+00> : vector<2x96xf32>
    %197 = tpu.matmul %146, %12, %cst_90 {dimension_numbers = #tpu.dot_dimension_numbers<[1], [0], [0], [1], [0, 0, 1, 1], [], []>} : vector<2x32xf32>, vector<32x96xf32>, vector<2x96xf32> -> vector<2x96xf32>
    %198 = vector.broadcast %20 : vector<1x96xf32> to vector<2x96xf32>
    %199 = arith.addf %197, %198 : vector<2x96xf32>
    %200 = vector.extract_strided_slice %196 {offsets = [0, 0], sizes = [2, 32], strides = [1, 1]} : vector<2x96xf32> to vector<2x32xf32>
    %201 = vector.extract_strided_slice %199 {offsets = [0, 0], sizes = [2, 32], strides = [1, 1]} : vector<2x96xf32> to vector<2x32xf32>
    %202 = arith.addf %200, %201 : vector<2x32xf32>
    %203 = arith.negf %202 : vector<2x32xf32>
    %204 = math.exp %203 : vector<2x32xf32>
    %cst_91 = arith.constant 1.000000e+00 : f32
    %205 = vector.broadcast %cst_91 : f32 to vector<2x32xf32>
    %206 = arith.addf %205, %204 : vector<2x32xf32>
    %207 = arith.divf %205, %206 : vector<2x32xf32>
    %208 = vector.extract_strided_slice %196 {offsets = [0, 32], sizes = [2, 32], strides = [1, 1]} : vector<2x96xf32> to vector<2x32xf32>
    %209 = vector.extract_strided_slice %199 {offsets = [0, 32], sizes = [2, 32], strides = [1, 1]} : vector<2x96xf32> to vector<2x32xf32>
    %210 = arith.addf %208, %209 : vector<2x32xf32>
    %211 = arith.negf %210 : vector<2x32xf32>
    %212 = math.exp %211 : vector<2x32xf32>
    %cst_92 = arith.constant 1.000000e+00 : f32
    %213 = vector.broadcast %cst_92 : f32 to vector<2x32xf32>
    %214 = arith.addf %213, %212 : vector<2x32xf32>
    %215 = arith.divf %213, %214 : vector<2x32xf32>
    %216 = vector.extract_strided_slice %196 {offsets = [0, 64], sizes = [2, 32], strides = [1, 1]} : vector<2x96xf32> to vector<2x32xf32>
    %217 = vector.extract_strided_slice %199 {offsets = [0, 64], sizes = [2, 32], strides = [1, 1]} : vector<2x96xf32> to vector<2x32xf32>
    %218 = arith.mulf %207, %217 : vector<2x32xf32>
    %219 = arith.addf %216, %218 : vector<2x32xf32>
    %220 = math.tanh %219 : vector<2x32xf32>
    %cst_93 = arith.constant 1.000000e+00 : f32
    %221 = vector.broadcast %cst_93 : f32 to vector<2x32xf32>
    %222 = arith.subf %221, %215 : vector<2x32xf32>
    %223 = arith.mulf %222, %220 : vector<2x32xf32>
    %224 = arith.mulf %215, %146 : vector<2x32xf32>
    %225 = arith.addf %223, %224 : vector<2x32xf32>
    %226 = vector.shape_cast %225 : vector<2x32xf32> to vector<2x1x32xf32>
    %227 = vector.broadcast %226 : vector<2x1x32xf32> to vector<2x6x32xf32>
    %228 = arith.mulf %227, %0 : vector<2x6x32xf32>
    %cst_94 = arith.constant dense<0.000000e+00> : vector<2x6xf32>
    %229 = vector.multi_reduction <add>, %228, %cst_94 [2] : vector<2x6x32xf32> to vector<2x6xf32>
    %cst_95 = arith.constant 0.176776692 : f32
    %230 = vector.broadcast %cst_95 : f32 to vector<2x6xf32>
    %231 = arith.mulf %229, %230 : vector<2x6xf32>
    %cst_96 = arith.constant 0.000000e+00 : f32
    %232 = vector.broadcast %cst_96 : f32 to vector<2x6xf32>
    %233 = arith.cmpf ogt, %1, %232 : vector<2x6xf32>
    %cst_97 = arith.constant -1.000000e+30 : f32
    %234 = vector.broadcast %cst_97 : f32 to vector<2x6xf32>
    %235 = arith.select %233, %234, %231 : vector<2x6xi1>, vector<2x6xf32>
    %cst_98 = arith.constant dense<0xFF800000> : vector<2xf32>
    %236 = vector.multi_reduction <maximumf>, %235, %cst_98 [1] : vector<2x6xf32> to vector<2xf32>
    %237 = vector.shape_cast %236 : vector<2xf32> to vector<2x1xf32>
    %238 = vector.broadcast %237 : vector<2x1xf32> to vector<2x6xf32>
    %239 = arith.subf %235, %238 : vector<2x6xf32>
    %240 = math.exp %239 : vector<2x6xf32>
    %cst_99 = arith.constant dense<0.000000e+00> : vector<2xf32>
    %241 = vector.multi_reduction <add>, %240, %cst_99 [1] : vector<2x6xf32> to vector<2xf32>
    %242 = vector.shape_cast %241 : vector<2xf32> to vector<2x1xf32>
    %243 = vector.broadcast %242 : vector<2x1xf32> to vector<2x6xf32>
    %244 = arith.divf %240, %243 : vector<2x6xf32>
    %245 = vector.shape_cast %244 : vector<2x6xf32> to vector<2x6x1xf32>
    %246 = vector.broadcast %245 : vector<2x6x1xf32> to vector<2x6x32xf32>
    %247 = arith.mulf %246, %0 : vector<2x6x32xf32>
    %cst_100 = arith.constant dense<0.000000e+00> : vector<2x32xf32>
    %248 = vector.multi_reduction <add>, %247, %cst_100 [1] : vector<2x6x32xf32> to vector<2x32xf32>
    %cst_101 = arith.constant dense<0.000000e+00> : vector<2x96xf32>
    %249 = tpu.matmul %225, %6, %cst_101 {dimension_numbers = #tpu.dot_dimension_numbers<[1], [0], [0], [1], [0, 0, 1, 1], [], []>} : vector<2x32xf32>, vector<32x96xf32>, vector<2x96xf32> -> vector<2x96xf32>
    %cst_102 = arith.constant dense<0.000000e+00> : vector<2x96xf32>
    %250 = tpu.matmul %248, %10, %cst_102 {dimension_numbers = #tpu.dot_dimension_numbers<[1], [0], [0], [1], [0, 0, 1, 1], [], []>} : vector<2x32xf32>, vector<32x96xf32>, vector<2x96xf32> -> vector<2x96xf32>
    %251 = arith.addf %249, %250 : vector<2x96xf32>
    %252 = vector.broadcast %18 : vector<1x96xf32> to vector<2x96xf32>
    %253 = arith.addf %251, %252 : vector<2x96xf32>
    %cst_103 = arith.constant dense<0.000000e+00> : vector<2x96xf32>
    %254 = tpu.matmul %225, %14, %cst_103 {dimension_numbers = #tpu.dot_dimension_numbers<[1], [0], [0], [1], [0, 0, 1, 1], [], []>} : vector<2x32xf32>, vector<32x96xf32>, vector<2x96xf32> -> vector<2x96xf32>
    %255 = vector.broadcast %22 : vector<1x96xf32> to vector<2x96xf32>
    %256 = arith.addf %254, %255 : vector<2x96xf32>
    %257 = vector.extract_strided_slice %253 {offsets = [0, 0], sizes = [2, 32], strides = [1, 1]} : vector<2x96xf32> to vector<2x32xf32>
    %258 = vector.extract_strided_slice %256 {offsets = [0, 0], sizes = [2, 32], strides = [1, 1]} : vector<2x96xf32> to vector<2x32xf32>
    %259 = arith.addf %257, %258 : vector<2x32xf32>
    %260 = arith.negf %259 : vector<2x32xf32>
    %261 = math.exp %260 : vector<2x32xf32>
    %cst_104 = arith.constant 1.000000e+00 : f32
    %262 = vector.broadcast %cst_104 : f32 to vector<2x32xf32>
    %263 = arith.addf %262, %261 : vector<2x32xf32>
    %264 = arith.divf %262, %263 : vector<2x32xf32>
    %265 = vector.extract_strided_slice %253 {offsets = [0, 32], sizes = [2, 32], strides = [1, 1]} : vector<2x96xf32> to vector<2x32xf32>
    %266 = vector.extract_strided_slice %256 {offsets = [0, 32], sizes = [2, 32], strides = [1, 1]} : vector<2x96xf32> to vector<2x32xf32>
    %267 = arith.addf %265, %266 : vector<2x32xf32>
    %268 = arith.negf %267 : vector<2x32xf32>
    %269 = math.exp %268 : vector<2x32xf32>
    %cst_105 = arith.constant 1.000000e+00 : f32
    %270 = vector.broadcast %cst_105 : f32 to vector<2x32xf32>
    %271 = arith.addf %270, %269 : vector<2x32xf32>
    %272 = arith.divf %270, %271 : vector<2x32xf32>
    %273 = vector.extract_strided_slice %253 {offsets = [0, 64], sizes = [2, 32], strides = [1, 1]} : vector<2x96xf32> to vector<2x32xf32>
    %274 = vector.extract_strided_slice %256 {offsets = [0, 64], sizes = [2, 32], strides = [1, 1]} : vector<2x96xf32> to vector<2x32xf32>
    %275 = arith.mulf %264, %274 : vector<2x32xf32>
    %276 = arith.addf %273, %275 : vector<2x32xf32>
    %277 = math.tanh %276 : vector<2x32xf32>
    %cst_106 = arith.constant 1.000000e+00 : f32
    %278 = vector.broadcast %cst_106 : f32 to vector<2x32xf32>
    %279 = arith.subf %278, %272 : vector<2x32xf32>
    %280 = arith.mulf %279, %277 : vector<2x32xf32>
    %281 = arith.mulf %272, %225 : vector<2x32xf32>
    %282 = arith.addf %280, %281 : vector<2x32xf32>
    %cst_107 = arith.constant dense<0.000000e+00> : vector<2x128xf32>
    %283 = tpu.matmul %282, %23, %cst_107 {dimension_numbers = #tpu.dot_dimension_numbers<[1], [0], [0], [1], [0, 0, 1, 1], [], []>} : vector<2x32xf32>, vector<32x128xf32>, vector<2x128xf32> -> vector<2x128xf32>
    %284 = vector.broadcast %24 : vector<1x128xf32> to vector<2x128xf32>
    %285 = arith.addf %283, %284 : vector<2x128xf32>
    %cst_108 = arith.constant dense<0.000000e+00> : vector<2x128xf32>
    %286 = tpu.matmul %248, %25, %cst_108 {dimension_numbers = #tpu.dot_dimension_numbers<[1], [0], [0], [1], [0, 0, 1, 1], [], []>} : vector<2x32xf32>, vector<32x128xf32>, vector<2x128xf32> -> vector<2x128xf32>
    %287 = arith.addf %285, %286 : vector<2x128xf32>
    %288 = vector.broadcast %26 : vector<1x128xf32> to vector<2x128xf32>
    %289 = arith.addf %287, %288 : vector<2x128xf32>
    %290 = vector.shape_cast %289 : vector<2x128xf32> to vector<2x1x128xf32>
    %c0_109 = arith.constant 0 : index
    %c1_110 = arith.constant 1 : index
    %c0_111 = arith.constant 0 : index
    %291 = vector.load %arg13[%c0_109, %c1_110, %c0_111] : memref<2x5x128xf32, #tpu.memory_space<vmem>>, vector<2x1x128xf32>
    tpu.vector_store %arg13[%c0_109, %c1_110, %c0_111], %290 {strides = array<i32>} : memref<2x5x128xf32, #tpu.memory_space<vmem>>, vector<2x1x128xf32>,
    %cst_112 = arith.constant dense<0xFF800000> : vector<2xf32>
    %292 = vector.multi_reduction <maximumf>, %289, %cst_112 [1] : vector<2x128xf32> to vector<2xf32>
    %293 = vector.shape_cast %292 : vector<2xf32> to vector<2x1xf32>
    %294 = vector.broadcast %293 : vector<2x1xf32> to vector<2x128xf32>
    %295 = arith.cmpf oeq, %289, %294 : vector<2x128xf32>
    %c128_i32_113 = arith.constant 128 : i32
    %296 = vector.broadcast %c128_i32_113 : i32 to vector<2x128xi32>
    %297 = arith.select %295, %27, %296 : vector<2x128xi1>, vector<2x128xi32>
    %cst_114 = arith.constant dense<2147483647> : vector<2xi32>
    %298 = vector.multi_reduction <minsi>, %297, %cst_114 [1] : vector<2x128xi32> to vector<2xi32>
    %299 = vector.shape_cast %298 : vector<2xi32> to vector<2x1xi32>
    %300 = vector.broadcast %299 : vector<2x1xi32> to vector<2x128xi32>
    %301 = arith.cmpi eq, %27, %300 : vector<2x128xi32>
    %302 = arith.extui %301 : vector<2x128xi1> to vector<2x128xi32>
    %303 = arith.sitofp %302 : vector<2x128xi32> to vector<2x128xf32>
    %cst_115 = arith.constant dense<0.000000e+00> : vector<2x32xf32>
    %304 = tpu.matmul %303, %2, %cst_115 {dimension_numbers = #tpu.dot_dimension_numbers<[1], [0], [0], [1], [0, 0, 1, 1], [], []>} : vector<2x128xf32>, vector<128x32xf32>, vector<2x32xf32> -> vector<2x32xf32>
    %305 = vector.shape_cast %282 : vector<2x32xf32> to vector<2x1x32xf32>
    %306 = vector.broadcast %305 : vector<2x1x32xf32> to vector<2x6x32xf32>
    %307 = arith.mulf %306, %0 : vector<2x6x32xf32>
    %cst_116 = arith.constant dense<0.000000e+00> : vector<2x6xf32>
    %308 = vector.multi_reduction <add>, %307, %cst_116 [2] : vector<2x6x32xf32> to vector<2x6xf32>
    %cst_117 = arith.constant 0.176776692 : f32
    %309 = vector.broadcast %cst_117 : f32 to vector<2x6xf32>
    %310 = arith.mulf %308, %309 : vector<2x6xf32>
    %cst_118 = arith.constant 0.000000e+00 : f32
    %311 = vector.broadcast %cst_118 : f32 to vector<2x6xf32>
    %312 = arith.cmpf ogt, %1, %311 : vector<2x6xf32>
    %cst_119 = arith.constant -1.000000e+30 : f32
    %313 = vector.broadcast %cst_119 : f32 to vector<2x6xf32>
    %314 = arith.select %312, %313, %310 : vector<2x6xi1>, vector<2x6xf32>
    %cst_120 = arith.constant dense<0xFF800000> : vector<2xf32>
    %315 = vector.multi_reduction <maximumf>, %314, %cst_120 [1] : vector<2x6xf32> to vector<2xf32>
    %316 = vector.shape_cast %315 : vector<2xf32> to vector<2x1xf32>
    %317 = vector.broadcast %316 : vector<2x1xf32> to vector<2x6xf32>
    %318 = arith.subf %314, %317 : vector<2x6xf32>
    %319 = math.exp %318 : vector<2x6xf32>
    %cst_121 = arith.constant dense<0.000000e+00> : vector<2xf32>
    %320 = vector.multi_reduction <add>, %319, %cst_121 [1] : vector<2x6xf32> to vector<2xf32>
    %321 = vector.shape_cast %320 : vector<2xf32> to vector<2x1xf32>
    %322 = vector.broadcast %321 : vector<2x1xf32> to vector<2x6xf32>
    %323 = arith.divf %319, %322 : vector<2x6xf32>
    %324 = vector.shape_cast %323 : vector<2x6xf32> to vector<2x6x1xf32>
    %325 = vector.broadcast %324 : vector<2x6x1xf32> to vector<2x6x32xf32>
    %326 = arith.mulf %325, %0 : vector<2x6x32xf32>
    %cst_122 = arith.constant dense<0.000000e+00> : vector<2x32xf32>
    %327 = vector.multi_reduction <add>, %326, %cst_122 [1] : vector<2x6x32xf32> to vector<2x32xf32>
    %cst_123 = arith.constant dense<0.000000e+00> : vector<2x96xf32>
    %328 = tpu.matmul %304, %4, %cst_123 {dimension_numbers = #tpu.dot_dimension_numbers<[1], [0], [0], [1], [0, 0, 1, 1], [], []>} : vector<2x32xf32>, vector<32x96xf32>, vector<2x96xf32> -> vector<2x96xf32>
    %cst_124 = arith.constant dense<0.000000e+00> : vector<2x96xf32>
    %329 = tpu.matmul %327, %8, %cst_124 {dimension_numbers = #tpu.dot_dimension_numbers<[1], [0], [0], [1], [0, 0, 1, 1], [], []>} : vector<2x32xf32>, vector<32x96xf32>, vector<2x96xf32> -> vector<2x96xf32>
    %330 = arith.addf %328, %329 : vector<2x96xf32>
    %331 = vector.broadcast %16 : vector<1x96xf32> to vector<2x96xf32>
    %332 = arith.addf %330, %331 : vector<2x96xf32>
    %cst_125 = arith.constant dense<0.000000e+00> : vector<2x96xf32>
    %333 = tpu.matmul %282, %12, %cst_125 {dimension_numbers = #tpu.dot_dimension_numbers<[1], [0], [0], [1], [0, 0, 1, 1], [], []>} : vector<2x32xf32>, vector<32x96xf32>, vector<2x96xf32> -> vector<2x96xf32>
    %334 = vector.broadcast %20 : vector<1x96xf32> to vector<2x96xf32>
    %335 = arith.addf %333, %334 : vector<2x96xf32>
    %336 = vector.extract_strided_slice %332 {offsets = [0, 0], sizes = [2, 32], strides = [1, 1]} : vector<2x96xf32> to vector<2x32xf32>
    %337 = vector.extract_strided_slice %335 {offsets = [0, 0], sizes = [2, 32], strides = [1, 1]} : vector<2x96xf32> to vector<2x32xf32>
    %338 = arith.addf %336, %337 : vector<2x32xf32>
    %339 = arith.negf %338 : vector<2x32xf32>
    %340 = math.exp %339 : vector<2x32xf32>
    %cst_126 = arith.constant 1.000000e+00 : f32
    %341 = vector.broadcast %cst_126 : f32 to vector<2x32xf32>
    %342 = arith.addf %341, %340 : vector<2x32xf32>
    %343 = arith.divf %341, %342 : vector<2x32xf32>
    %344 = vector.extract_strided_slice %332 {offsets = [0, 32], sizes = [2, 32], strides = [1, 1]} : vector<2x96xf32> to vector<2x32xf32>
    %345 = vector.extract_strided_slice %335 {offsets = [0, 32], sizes = [2, 32], strides = [1, 1]} : vector<2x96xf32> to vector<2x32xf32>
    %346 = arith.addf %344, %345 : vector<2x32xf32>
    %347 = arith.negf %346 : vector<2x32xf32>
    %348 = math.exp %347 : vector<2x32xf32>
    %cst_127 = arith.constant 1.000000e+00 : f32
    %349 = vector.broadcast %cst_127 : f32 to vector<2x32xf32>
    %350 = arith.addf %349, %348 : vector<2x32xf32>
    %351 = arith.divf %349, %350 : vector<2x32xf32>
    %352 = vector.extract_strided_slice %332 {offsets = [0, 64], sizes = [2, 32], strides = [1, 1]} : vector<2x96xf32> to vector<2x32xf32>
    %353 = vector.extract_strided_slice %335 {offsets = [0, 64], sizes = [2, 32], strides = [1, 1]} : vector<2x96xf32> to vector<2x32xf32>
    %354 = arith.mulf %343, %353 : vector<2x32xf32>
    %355 = arith.addf %352, %354 : vector<2x32xf32>
    %356 = math.tanh %355 : vector<2x32xf32>
    %cst_128 = arith.constant 1.000000e+00 : f32
    %357 = vector.broadcast %cst_128 : f32 to vector<2x32xf32>
    %358 = arith.subf %357, %351 : vector<2x32xf32>
    %359 = arith.mulf %358, %356 : vector<2x32xf32>
    %360 = arith.mulf %351, %282 : vector<2x32xf32>
    %361 = arith.addf %359, %360 : vector<2x32xf32>
    %362 = vector.shape_cast %361 : vector<2x32xf32> to vector<2x1x32xf32>
    %363 = vector.broadcast %362 : vector<2x1x32xf32> to vector<2x6x32xf32>
    %364 = arith.mulf %363, %0 : vector<2x6x32xf32>
    %cst_129 = arith.constant dense<0.000000e+00> : vector<2x6xf32>
    %365 = vector.multi_reduction <add>, %364, %cst_129 [2] : vector<2x6x32xf32> to vector<2x6xf32>
    %cst_130 = arith.constant 0.176776692 : f32
    %366 = vector.broadcast %cst_130 : f32 to vector<2x6xf32>
    %367 = arith.mulf %365, %366 : vector<2x6xf32>
    %cst_131 = arith.constant 0.000000e+00 : f32
    %368 = vector.broadcast %cst_131 : f32 to vector<2x6xf32>
    %369 = arith.cmpf ogt, %1, %368 : vector<2x6xf32>
    %cst_132 = arith.constant -1.000000e+30 : f32
    %370 = vector.broadcast %cst_132 : f32 to vector<2x6xf32>
    %371 = arith.select %369, %370, %367 : vector<2x6xi1>, vector<2x6xf32>
    %cst_133 = arith.constant dense<0xFF800000> : vector<2xf32>
    %372 = vector.multi_reduction <maximumf>, %371, %cst_133 [1] : vector<2x6xf32> to vector<2xf32>
    %373 = vector.shape_cast %372 : vector<2xf32> to vector<2x1xf32>
    %374 = vector.broadcast %373 : vector<2x1xf32> to vector<2x6xf32>
    %375 = arith.subf %371, %374 : vector<2x6xf32>
    %376 = math.exp %375 : vector<2x6xf32>
    %cst_134 = arith.constant dense<0.000000e+00> : vector<2xf32>
    %377 = vector.multi_reduction <add>, %376, %cst_134 [1] : vector<2x6xf32> to vector<2xf32>
    %378 = vector.shape_cast %377 : vector<2xf32> to vector<2x1xf32>
    %379 = vector.broadcast %378 : vector<2x1xf32> to vector<2x6xf32>
    %380 = arith.divf %376, %379 : vector<2x6xf32>
    %381 = vector.shape_cast %380 : vector<2x6xf32> to vector<2x6x1xf32>
    %382 = vector.broadcast %381 : vector<2x6x1xf32> to vector<2x6x32xf32>
    %383 = arith.mulf %382, %0 : vector<2x6x32xf32>
    %cst_135 = arith.constant dense<0.000000e+00> : vector<2x32xf32>
    %384 = vector.multi_reduction <add>, %383, %cst_135 [1] : vector<2x6x32xf32> to vector<2x32xf32>
    %cst_136 = arith.constant dense<0.000000e+00> : vector<2x96xf32>
    %385 = tpu.matmul %361, %6, %cst_136 {dimension_numbers = #tpu.dot_dimension_numbers<[1], [0], [0], [1], [0, 0, 1, 1], [], []>} : vector<2x32xf32>, vector<32x96xf32>, vector<2x96xf32> -> vector<2x96xf32>
    %cst_137 = arith.constant dense<0.000000e+00> : vector<2x96xf32>
    %386 = tpu.matmul %384, %10, %cst_137 {dimension_numbers = #tpu.dot_dimension_numbers<[1], [0], [0], [1], [0, 0, 1, 1], [], []>} : vector<2x32xf32>, vector<32x96xf32>, vector<2x96xf32> -> vector<2x96xf32>
    %387 = arith.addf %385, %386 : vector<2x96xf32>
    %388 = vector.broadcast %18 : vector<1x96xf32> to vector<2x96xf32>
    %389 = arith.addf %387, %388 : vector<2x96xf32>
    %cst_138 = arith.constant dense<0.000000e+00> : vector<2x96xf32>
    %390 = tpu.matmul %361, %14, %cst_138 {dimension_numbers = #tpu.dot_dimension_numbers<[1], [0], [0], [1], [0, 0, 1, 1], [], []>} : vector<2x32xf32>, vector<32x96xf32>, vector<2x96xf32> -> vector<2x96xf32>
    %391 = vector.broadcast %22 : vector<1x96xf32> to vector<2x96xf32>
    %392 = arith.addf %390, %391 : vector<2x96xf32>
    %393 = vector.extract_strided_slice %389 {offsets = [0, 0], sizes = [2, 32], strides = [1, 1]} : vector<2x96xf32> to vector<2x32xf32>
    %394 = vector.extract_strided_slice %392 {offsets = [0, 0], sizes = [2, 32], strides = [1, 1]} : vector<2x96xf32> to vector<2x32xf32>
    %395 = arith.addf %393, %394 : vector<2x32xf32>
    %396 = arith.negf %395 : vector<2x32xf32>
    %397 = math.exp %396 : vector<2x32xf32>
    %cst_139 = arith.constant 1.000000e+00 : f32
    %398 = vector.broadcast %cst_139 : f32 to vector<2x32xf32>
    %399 = arith.addf %398, %397 : vector<2x32xf32>
    %400 = arith.divf %398, %399 : vector<2x32xf32>
    %401 = vector.extract_strided_slice %389 {offsets = [0, 32], sizes = [2, 32], strides = [1, 1]} : vector<2x96xf32> to vector<2x32xf32>
    %402 = vector.extract_strided_slice %392 {offsets = [0, 32], sizes = [2, 32], strides = [1, 1]} : vector<2x96xf32> to vector<2x32xf32>
    %403 = arith.addf %401, %402 : vector<2x32xf32>
    %404 = arith.negf %403 : vector<2x32xf32>
    %405 = math.exp %404 : vector<2x32xf32>
    %cst_140 = arith.constant 1.000000e+00 : f32
    %406 = vector.broadcast %cst_140 : f32 to vector<2x32xf32>
    %407 = arith.addf %406, %405 : vector<2x32xf32>
    %408 = arith.divf %406, %407 : vector<2x32xf32>
    %409 = vector.extract_strided_slice %389 {offsets = [0, 64], sizes = [2, 32], strides = [1, 1]} : vector<2x96xf32> to vector<2x32xf32>
    %410 = vector.extract_strided_slice %392 {offsets = [0, 64], sizes = [2, 32], strides = [1, 1]} : vector<2x96xf32> to vector<2x32xf32>
    %411 = arith.mulf %400, %410 : vector<2x32xf32>
    %412 = arith.addf %409, %411 : vector<2x32xf32>
    %413 = math.tanh %412 : vector<2x32xf32>
    %cst_141 = arith.constant 1.000000e+00 : f32
    %414 = vector.broadcast %cst_141 : f32 to vector<2x32xf32>
    %415 = arith.subf %414, %408 : vector<2x32xf32>
    %416 = arith.mulf %415, %413 : vector<2x32xf32>
    %417 = arith.mulf %408, %361 : vector<2x32xf32>
    %418 = arith.addf %416, %417 : vector<2x32xf32>
    %cst_142 = arith.constant dense<0.000000e+00> : vector<2x128xf32>
    %419 = tpu.matmul %418, %23, %cst_142 {dimension_numbers = #tpu.dot_dimension_numbers<[1], [0], [0], [1], [0, 0, 1, 1], [], []>} : vector<2x32xf32>, vector<32x128xf32>, vector<2x128xf32> -> vector<2x128xf32>
    %420 = vector.broadcast %24 : vector<1x128xf32> to vector<2x128xf32>
    %421 = arith.addf %419, %420 : vector<2x128xf32>
    %cst_143 = arith.constant dense<0.000000e+00> : vector<2x128xf32>
    %422 = tpu.matmul %384, %25, %cst_143 {dimension_numbers = #tpu.dot_dimension_numbers<[1], [0], [0], [1], [0, 0, 1, 1], [], []>} : vector<2x32xf32>, vector<32x128xf32>, vector<2x128xf32> -> vector<2x128xf32>
    %423 = arith.addf %421, %422 : vector<2x128xf32>
    %424 = vector.broadcast %26 : vector<1x128xf32> to vector<2x128xf32>
    %425 = arith.addf %423, %424 : vector<2x128xf32>
    %426 = vector.shape_cast %425 : vector<2x128xf32> to vector<2x1x128xf32>
    %c0_144 = arith.constant 0 : index
    %c2 = arith.constant 2 : index
    %c0_145 = arith.constant 0 : index
    %427 = vector.load %arg13[%c0_144, %c2, %c0_145] : memref<2x5x128xf32, #tpu.memory_space<vmem>>, vector<2x1x128xf32>
    tpu.vector_store %arg13[%c0_144, %c2, %c0_145], %426 {strides = array<i32>} : memref<2x5x128xf32, #tpu.memory_space<vmem>>, vector<2x1x128xf32>,
    %cst_146 = arith.constant dense<0xFF800000> : vector<2xf32>
    %428 = vector.multi_reduction <maximumf>, %425, %cst_146 [1] : vector<2x128xf32> to vector<2xf32>
    %429 = vector.shape_cast %428 : vector<2xf32> to vector<2x1xf32>
    %430 = vector.broadcast %429 : vector<2x1xf32> to vector<2x128xf32>
    %431 = arith.cmpf oeq, %425, %430 : vector<2x128xf32>
    %c128_i32_147 = arith.constant 128 : i32
    %432 = vector.broadcast %c128_i32_147 : i32 to vector<2x128xi32>
    %433 = arith.select %431, %27, %432 : vector<2x128xi1>, vector<2x128xi32>
    %cst_148 = arith.constant dense<2147483647> : vector<2xi32>
    %434 = vector.multi_reduction <minsi>, %433, %cst_148 [1] : vector<2x128xi32> to vector<2xi32>
    %435 = vector.shape_cast %434 : vector<2xi32> to vector<2x1xi32>
    %436 = vector.broadcast %435 : vector<2x1xi32> to vector<2x128xi32>
    %437 = arith.cmpi eq, %27, %436 : vector<2x128xi32>
    %438 = arith.extui %437 : vector<2x128xi1> to vector<2x128xi32>
    %439 = arith.sitofp %438 : vector<2x128xi32> to vector<2x128xf32>
    %cst_149 = arith.constant dense<0.000000e+00> : vector<2x32xf32>
    %440 = tpu.matmul %439, %2, %cst_149 {dimension_numbers = #tpu.dot_dimension_numbers<[1], [0], [0], [1], [0, 0, 1, 1], [], []>} : vector<2x128xf32>, vector<128x32xf32>, vector<2x32xf32> -> vector<2x32xf32>
    %441 = vector.shape_cast %418 : vector<2x32xf32> to vector<2x1x32xf32>
    %442 = vector.broadcast %441 : vector<2x1x32xf32> to vector<2x6x32xf32>
    %443 = arith.mulf %442, %0 : vector<2x6x32xf32>
    %cst_150 = arith.constant dense<0.000000e+00> : vector<2x6xf32>
    %444 = vector.multi_reduction <add>, %443, %cst_150 [2] : vector<2x6x32xf32> to vector<2x6xf32>
    %cst_151 = arith.constant 0.176776692 : f32
    %445 = vector.broadcast %cst_151 : f32 to vector<2x6xf32>
    %446 = arith.mulf %444, %445 : vector<2x6xf32>
    %cst_152 = arith.constant 0.000000e+00 : f32
    %447 = vector.broadcast %cst_152 : f32 to vector<2x6xf32>
    %448 = arith.cmpf ogt, %1, %447 : vector<2x6xf32>
    %cst_153 = arith.constant -1.000000e+30 : f32
    %449 = vector.broadcast %cst_153 : f32 to vector<2x6xf32>
    %450 = arith.select %448, %449, %446 : vector<2x6xi1>, vector<2x6xf32>
    %cst_154 = arith.constant dense<0xFF800000> : vector<2xf32>
    %451 = vector.multi_reduction <maximumf>, %450, %cst_154 [1] : vector<2x6xf32> to vector<2xf32>
    %452 = vector.shape_cast %451 : vector<2xf32> to vector<2x1xf32>
    %453 = vector.broadcast %452 : vector<2x1xf32> to vector<2x6xf32>
    %454 = arith.subf %450, %453 : vector<2x6xf32>
    %455 = math.exp %454 : vector<2x6xf32>
    %cst_155 = arith.constant dense<0.000000e+00> : vector<2xf32>
    %456 = vector.multi_reduction <add>, %455, %cst_155 [1] : vector<2x6xf32> to vector<2xf32>
    %457 = vector.shape_cast %456 : vector<2xf32> to vector<2x1xf32>
    %458 = vector.broadcast %457 : vector<2x1xf32> to vector<2x6xf32>
    %459 = arith.divf %455, %458 : vector<2x6xf32>
    %460 = vector.shape_cast %459 : vector<2x6xf32> to vector<2x6x1xf32>
    %461 = vector.broadcast %460 : vector<2x6x1xf32> to vector<2x6x32xf32>
    %462 = arith.mulf %461, %0 : vector<2x6x32xf32>
    %cst_156 = arith.constant dense<0.000000e+00> : vector<2x32xf32>
    %463 = vector.multi_reduction <add>, %462, %cst_156 [1] : vector<2x6x32xf32> to vector<2x32xf32>
    %cst_157 = arith.constant dense<0.000000e+00> : vector<2x96xf32>
    %464 = tpu.matmul %440, %4, %cst_157 {dimension_numbers = #tpu.dot_dimension_numbers<[1], [0], [0], [1], [0, 0, 1, 1], [], []>} : vector<2x32xf32>, vector<32x96xf32>, vector<2x96xf32> -> vector<2x96xf32>
    %cst_158 = arith.constant dense<0.000000e+00> : vector<2x96xf32>
    %465 = tpu.matmul %463, %8, %cst_158 {dimension_numbers = #tpu.dot_dimension_numbers<[1], [0], [0], [1], [0, 0, 1, 1], [], []>} : vector<2x32xf32>, vector<32x96xf32>, vector<2x96xf32> -> vector<2x96xf32>
    %466 = arith.addf %464, %465 : vector<2x96xf32>
    %467 = vector.broadcast %16 : vector<1x96xf32> to vector<2x96xf32>
    %468 = arith.addf %466, %467 : vector<2x96xf32>
    %cst_159 = arith.constant dense<0.000000e+00> : vector<2x96xf32>
    %469 = tpu.matmul %418, %12, %cst_159 {dimension_numbers = #tpu.dot_dimension_numbers<[1], [0], [0], [1], [0, 0, 1, 1], [], []>} : vector<2x32xf32>, vector<32x96xf32>, vector<2x96xf32> -> vector<2x96xf32>
    %470 = vector.broadcast %20 : vector<1x96xf32> to vector<2x96xf32>
    %471 = arith.addf %469, %470 : vector<2x96xf32>
    %472 = vector.extract_strided_slice %468 {offsets = [0, 0], sizes = [2, 32], strides = [1, 1]} : vector<2x96xf32> to vector<2x32xf32>
    %473 = vector.extract_strided_slice %471 {offsets = [0, 0], sizes = [2, 32], strides = [1, 1]} : vector<2x96xf32> to vector<2x32xf32>
    %474 = arith.addf %472, %473 : vector<2x32xf32>
    %475 = arith.negf %474 : vector<2x32xf32>
    %476 = math.exp %475 : vector<2x32xf32>
    %cst_160 = arith.constant 1.000000e+00 : f32
    %477 = vector.broadcast %cst_160 : f32 to vector<2x32xf32>
    %478 = arith.addf %477, %476 : vector<2x32xf32>
    %479 = arith.divf %477, %478 : vector<2x32xf32>
    %480 = vector.extract_strided_slice %468 {offsets = [0, 32], sizes = [2, 32], strides = [1, 1]} : vector<2x96xf32> to vector<2x32xf32>
    %481 = vector.extract_strided_slice %471 {offsets = [0, 32], sizes = [2, 32], strides = [1, 1]} : vector<2x96xf32> to vector<2x32xf32>
    %482 = arith.addf %480, %481 : vector<2x32xf32>
    %483 = arith.negf %482 : vector<2x32xf32>
    %484 = math.exp %483 : vector<2x32xf32>
    %cst_161 = arith.constant 1.000000e+00 : f32
    %485 = vector.broadcast %cst_161 : f32 to vector<2x32xf32>
    %486 = arith.addf %485, %484 : vector<2x32xf32>
    %487 = arith.divf %485, %486 : vector<2x32xf32>
    %488 = vector.extract_strided_slice %468 {offsets = [0, 64], sizes = [2, 32], strides = [1, 1]} : vector<2x96xf32> to vector<2x32xf32>
    %489 = vector.extract_strided_slice %471 {offsets = [0, 64], sizes = [2, 32], strides = [1, 1]} : vector<2x96xf32> to vector<2x32xf32>
    %490 = arith.mulf %479, %489 : vector<2x32xf32>
    %491 = arith.addf %488, %490 : vector<2x32xf32>
    %492 = math.tanh %491 : vector<2x32xf32>
    %cst_162 = arith.constant 1.000000e+00 : f32
    %493 = vector.broadcast %cst_162 : f32 to vector<2x32xf32>
    %494 = arith.subf %493, %487 : vector<2x32xf32>
    %495 = arith.mulf %494, %492 : vector<2x32xf32>
    %496 = arith.mulf %487, %418 : vector<2x32xf32>
    %497 = arith.addf %495, %496 : vector<2x32xf32>
    %498 = vector.shape_cast %497 : vector<2x32xf32> to vector<2x1x32xf32>
    %499 = vector.broadcast %498 : vector<2x1x32xf32> to vector<2x6x32xf32>
    %500 = arith.mulf %499, %0 : vector<2x6x32xf32>
    %cst_163 = arith.constant dense<0.000000e+00> : vector<2x6xf32>
    %501 = vector.multi_reduction <add>, %500, %cst_163 [2] : vector<2x6x32xf32> to vector<2x6xf32>
    %cst_164 = arith.constant 0.176776692 : f32
    %502 = vector.broadcast %cst_164 : f32 to vector<2x6xf32>
    %503 = arith.mulf %501, %502 : vector<2x6xf32>
    %cst_165 = arith.constant 0.000000e+00 : f32
    %504 = vector.broadcast %cst_165 : f32 to vector<2x6xf32>
    %505 = arith.cmpf ogt, %1, %504 : vector<2x6xf32>
    %cst_166 = arith.constant -1.000000e+30 : f32
    %506 = vector.broadcast %cst_166 : f32 to vector<2x6xf32>
    %507 = arith.select %505, %506, %503 : vector<2x6xi1>, vector<2x6xf32>
    %cst_167 = arith.constant dense<0xFF800000> : vector<2xf32>
    %508 = vector.multi_reduction <maximumf>, %507, %cst_167 [1] : vector<2x6xf32> to vector<2xf32>
    %509 = vector.shape_cast %508 : vector<2xf32> to vector<2x1xf32>
    %510 = vector.broadcast %509 : vector<2x1xf32> to vector<2x6xf32>
    %511 = arith.subf %507, %510 : vector<2x6xf32>
    %512 = math.exp %511 : vector<2x6xf32>
    %cst_168 = arith.constant dense<0.000000e+00> : vector<2xf32>
    %513 = vector.multi_reduction <add>, %512, %cst_168 [1] : vector<2x6xf32> to vector<2xf32>
    %514 = vector.shape_cast %513 : vector<2xf32> to vector<2x1xf32>
    %515 = vector.broadcast %514 : vector<2x1xf32> to vector<2x6xf32>
    %516 = arith.divf %512, %515 : vector<2x6xf32>
    %517 = vector.shape_cast %516 : vector<2x6xf32> to vector<2x6x1xf32>
    %518 = vector.broadcast %517 : vector<2x6x1xf32> to vector<2x6x32xf32>
    %519 = arith.mulf %518, %0 : vector<2x6x32xf32>
    %cst_169 = arith.constant dense<0.000000e+00> : vector<2x32xf32>
    %520 = vector.multi_reduction <add>, %519, %cst_169 [1] : vector<2x6x32xf32> to vector<2x32xf32>
    %cst_170 = arith.constant dense<0.000000e+00> : vector<2x96xf32>
    %521 = tpu.matmul %497, %6, %cst_170 {dimension_numbers = #tpu.dot_dimension_numbers<[1], [0], [0], [1], [0, 0, 1, 1], [], []>} : vector<2x32xf32>, vector<32x96xf32>, vector<2x96xf32> -> vector<2x96xf32>
    %cst_171 = arith.constant dense<0.000000e+00> : vector<2x96xf32>
    %522 = tpu.matmul %520, %10, %cst_171 {dimension_numbers = #tpu.dot_dimension_numbers<[1], [0], [0], [1], [0, 0, 1, 1], [], []>} : vector<2x32xf32>, vector<32x96xf32>, vector<2x96xf32> -> vector<2x96xf32>
    %523 = arith.addf %521, %522 : vector<2x96xf32>
    %524 = vector.broadcast %18 : vector<1x96xf32> to vector<2x96xf32>
    %525 = arith.addf %523, %524 : vector<2x96xf32>
    %cst_172 = arith.constant dense<0.000000e+00> : vector<2x96xf32>
    %526 = tpu.matmul %497, %14, %cst_172 {dimension_numbers = #tpu.dot_dimension_numbers<[1], [0], [0], [1], [0, 0, 1, 1], [], []>} : vector<2x32xf32>, vector<32x96xf32>, vector<2x96xf32> -> vector<2x96xf32>
    %527 = vector.broadcast %22 : vector<1x96xf32> to vector<2x96xf32>
    %528 = arith.addf %526, %527 : vector<2x96xf32>
    %529 = vector.extract_strided_slice %525 {offsets = [0, 0], sizes = [2, 32], strides = [1, 1]} : vector<2x96xf32> to vector<2x32xf32>
    %530 = vector.extract_strided_slice %528 {offsets = [0, 0], sizes = [2, 32], strides = [1, 1]} : vector<2x96xf32> to vector<2x32xf32>
    %531 = arith.addf %529, %530 : vector<2x32xf32>
    %532 = arith.negf %531 : vector<2x32xf32>
    %533 = math.exp %532 : vector<2x32xf32>
    %cst_173 = arith.constant 1.000000e+00 : f32
    %534 = vector.broadcast %cst_173 : f32 to vector<2x32xf32>
    %535 = arith.addf %534, %533 : vector<2x32xf32>
    %536 = arith.divf %534, %535 : vector<2x32xf32>
    %537 = vector.extract_strided_slice %525 {offsets = [0, 32], sizes = [2, 32], strides = [1, 1]} : vector<2x96xf32> to vector<2x32xf32>
    %538 = vector.extract_strided_slice %528 {offsets = [0, 32], sizes = [2, 32], strides = [1, 1]} : vector<2x96xf32> to vector<2x32xf32>
    %539 = arith.addf %537, %538 : vector<2x32xf32>
    %540 = arith.negf %539 : vector<2x32xf32>
    %541 = math.exp %540 : vector<2x32xf32>
    %cst_174 = arith.constant 1.000000e+00 : f32
    %542 = vector.broadcast %cst_174 : f32 to vector<2x32xf32>
    %543 = arith.addf %542, %541 : vector<2x32xf32>
    %544 = arith.divf %542, %543 : vector<2x32xf32>
    %545 = vector.extract_strided_slice %525 {offsets = [0, 64], sizes = [2, 32], strides = [1, 1]} : vector<2x96xf32> to vector<2x32xf32>
    %546 = vector.extract_strided_slice %528 {offsets = [0, 64], sizes = [2, 32], strides = [1, 1]} : vector<2x96xf32> to vector<2x32xf32>
    %547 = arith.mulf %536, %546 : vector<2x32xf32>
    %548 = arith.addf %545, %547 : vector<2x32xf32>
    %549 = math.tanh %548 : vector<2x32xf32>
    %cst_175 = arith.constant 1.000000e+00 : f32
    %550 = vector.broadcast %cst_175 : f32 to vector<2x32xf32>
    %551 = arith.subf %550, %544 : vector<2x32xf32>
    %552 = arith.mulf %551, %549 : vector<2x32xf32>
    %553 = arith.mulf %544, %497 : vector<2x32xf32>
    %554 = arith.addf %552, %553 : vector<2x32xf32>
    %cst_176 = arith.constant dense<0.000000e+00> : vector<2x128xf32>
    %555 = tpu.matmul %554, %23, %cst_176 {dimension_numbers = #tpu.dot_dimension_numbers<[1], [0], [0], [1], [0, 0, 1, 1], [], []>} : vector<2x32xf32>, vector<32x128xf32>, vector<2x128xf32> -> vector<2x128xf32>
    %556 = vector.broadcast %24 : vector<1x128xf32> to vector<2x128xf32>
    %557 = arith.addf %555, %556 : vector<2x128xf32>
    %cst_177 = arith.constant dense<0.000000e+00> : vector<2x128xf32>
    %558 = tpu.matmul %520, %25, %cst_177 {dimension_numbers = #tpu.dot_dimension_numbers<[1], [0], [0], [1], [0, 0, 1, 1], [], []>} : vector<2x32xf32>, vector<32x128xf32>, vector<2x128xf32> -> vector<2x128xf32>
    %559 = arith.addf %557, %558 : vector<2x128xf32>
    %560 = vector.broadcast %26 : vector<1x128xf32> to vector<2x128xf32>
    %561 = arith.addf %559, %560 : vector<2x128xf32>
    %562 = vector.shape_cast %561 : vector<2x128xf32> to vector<2x1x128xf32>
    %c0_178 = arith.constant 0 : index
    %c3 = arith.constant 3 : index
    %c0_179 = arith.constant 0 : index
    %563 = vector.load %arg13[%c0_178, %c3, %c0_179] : memref<2x5x128xf32, #tpu.memory_space<vmem>>, vector<2x1x128xf32>
    tpu.vector_store %arg13[%c0_178, %c3, %c0_179], %562 {strides = array<i32>} : memref<2x5x128xf32, #tpu.memory_space<vmem>>, vector<2x1x128xf32>,
    %cst_180 = arith.constant dense<0xFF800000> : vector<2xf32>
    %564 = vector.multi_reduction <maximumf>, %561, %cst_180 [1] : vector<2x128xf32> to vector<2xf32>
    %565 = vector.shape_cast %564 : vector<2xf32> to vector<2x1xf32>
    %566 = vector.broadcast %565 : vector<2x1xf32> to vector<2x128xf32>
    %567 = arith.cmpf oeq, %561, %566 : vector<2x128xf32>
    %c128_i32_181 = arith.constant 128 : i32
    %568 = vector.broadcast %c128_i32_181 : i32 to vector<2x128xi32>
    %569 = arith.select %567, %27, %568 : vector<2x128xi1>, vector<2x128xi32>
    %cst_182 = arith.constant dense<2147483647> : vector<2xi32>
    %570 = vector.multi_reduction <minsi>, %569, %cst_182 [1] : vector<2x128xi32> to vector<2xi32>
    %571 = vector.shape_cast %570 : vector<2xi32> to vector<2x1xi32>
    %572 = vector.broadcast %571 : vector<2x1xi32> to vector<2x128xi32>
    %573 = arith.cmpi eq, %27, %572 : vector<2x128xi32>
    %574 = arith.extui %573 : vector<2x128xi1> to vector<2x128xi32>
    %575 = arith.sitofp %574 : vector<2x128xi32> to vector<2x128xf32>
    %cst_183 = arith.constant dense<0.000000e+00> : vector<2x32xf32>
    %576 = tpu.matmul %575, %2, %cst_183 {dimension_numbers = #tpu.dot_dimension_numbers<[1], [0], [0], [1], [0, 0, 1, 1], [], []>} : vector<2x128xf32>, vector<128x32xf32>, vector<2x32xf32> -> vector<2x32xf32>
    %577 = vector.shape_cast %554 : vector<2x32xf32> to vector<2x1x32xf32>
    %578 = vector.broadcast %577 : vector<2x1x32xf32> to vector<2x6x32xf32>
    %579 = arith.mulf %578, %0 : vector<2x6x32xf32>
    %cst_184 = arith.constant dense<0.000000e+00> : vector<2x6xf32>
    %580 = vector.multi_reduction <add>, %579, %cst_184 [2] : vector<2x6x32xf32> to vector<2x6xf32>
    %cst_185 = arith.constant 0.176776692 : f32
    %581 = vector.broadcast %cst_185 : f32 to vector<2x6xf32>
    %582 = arith.mulf %580, %581 : vector<2x6xf32>
    %cst_186 = arith.constant 0.000000e+00 : f32
    %583 = vector.broadcast %cst_186 : f32 to vector<2x6xf32>
    %584 = arith.cmpf ogt, %1, %583 : vector<2x6xf32>
    %cst_187 = arith.constant -1.000000e+30 : f32
    %585 = vector.broadcast %cst_187 : f32 to vector<2x6xf32>
    %586 = arith.select %584, %585, %582 : vector<2x6xi1>, vector<2x6xf32>
    %cst_188 = arith.constant dense<0xFF800000> : vector<2xf32>
    %587 = vector.multi_reduction <maximumf>, %586, %cst_188 [1] : vector<2x6xf32> to vector<2xf32>
    %588 = vector.shape_cast %587 : vector<2xf32> to vector<2x1xf32>
    %589 = vector.broadcast %588 : vector<2x1xf32> to vector<2x6xf32>
    %590 = arith.subf %586, %589 : vector<2x6xf32>
    %591 = math.exp %590 : vector<2x6xf32>
    %cst_189 = arith.constant dense<0.000000e+00> : vector<2xf32>
    %592 = vector.multi_reduction <add>, %591, %cst_189 [1] : vector<2x6xf32> to vector<2xf32>
    %593 = vector.shape_cast %592 : vector<2xf32> to vector<2x1xf32>
    %594 = vector.broadcast %593 : vector<2x1xf32> to vector<2x6xf32>
    %595 = arith.divf %591, %594 : vector<2x6xf32>
    %596 = vector.shape_cast %595 : vector<2x6xf32> to vector<2x6x1xf32>
    %597 = vector.broadcast %596 : vector<2x6x1xf32> to vector<2x6x32xf32>
    %598 = arith.mulf %597, %0 : vector<2x6x32xf32>
    %cst_190 = arith.constant dense<0.000000e+00> : vector<2x32xf32>
    %599 = vector.multi_reduction <add>, %598, %cst_190 [1] : vector<2x6x32xf32> to vector<2x32xf32>
    %cst_191 = arith.constant dense<0.000000e+00> : vector<2x96xf32>
    %600 = tpu.matmul %576, %4, %cst_191 {dimension_numbers = #tpu.dot_dimension_numbers<[1], [0], [0], [1], [0, 0, 1, 1], [], []>} : vector<2x32xf32>, vector<32x96xf32>, vector<2x96xf32> -> vector<2x96xf32>
    %cst_192 = arith.constant dense<0.000000e+00> : vector<2x96xf32>
    %601 = tpu.matmul %599, %8, %cst_192 {dimension_numbers = #tpu.dot_dimension_numbers<[1], [0], [0], [1], [0, 0, 1, 1], [], []>} : vector<2x32xf32>, vector<32x96xf32>, vector<2x96xf32> -> vector<2x96xf32>
    %602 = arith.addf %600, %601 : vector<2x96xf32>
    %603 = vector.broadcast %16 : vector<1x96xf32> to vector<2x96xf32>
    %604 = arith.addf %602, %603 : vector<2x96xf32>
    %cst_193 = arith.constant dense<0.000000e+00> : vector<2x96xf32>
    %605 = tpu.matmul %554, %12, %cst_193 {dimension_numbers = #tpu.dot_dimension_numbers<[1], [0], [0], [1], [0, 0, 1, 1], [], []>} : vector<2x32xf32>, vector<32x96xf32>, vector<2x96xf32> -> vector<2x96xf32>
    %606 = vector.broadcast %20 : vector<1x96xf32> to vector<2x96xf32>
    %607 = arith.addf %605, %606 : vector<2x96xf32>
    %608 = vector.extract_strided_slice %604 {offsets = [0, 0], sizes = [2, 32], strides = [1, 1]} : vector<2x96xf32> to vector<2x32xf32>
    %609 = vector.extract_strided_slice %607 {offsets = [0, 0], sizes = [2, 32], strides = [1, 1]} : vector<2x96xf32> to vector<2x32xf32>
    %610 = arith.addf %608, %609 : vector<2x32xf32>
    %611 = arith.negf %610 : vector<2x32xf32>
    %612 = math.exp %611 : vector<2x32xf32>
    %cst_194 = arith.constant 1.000000e+00 : f32
    %613 = vector.broadcast %cst_194 : f32 to vector<2x32xf32>
    %614 = arith.addf %613, %612 : vector<2x32xf32>
    %615 = arith.divf %613, %614 : vector<2x32xf32>
    %616 = vector.extract_strided_slice %604 {offsets = [0, 32], sizes = [2, 32], strides = [1, 1]} : vector<2x96xf32> to vector<2x32xf32>
    %617 = vector.extract_strided_slice %607 {offsets = [0, 32], sizes = [2, 32], strides = [1, 1]} : vector<2x96xf32> to vector<2x32xf32>
    %618 = arith.addf %616, %617 : vector<2x32xf32>
    %619 = arith.negf %618 : vector<2x32xf32>
    %620 = math.exp %619 : vector<2x32xf32>
    %cst_195 = arith.constant 1.000000e+00 : f32
    %621 = vector.broadcast %cst_195 : f32 to vector<2x32xf32>
    %622 = arith.addf %621, %620 : vector<2x32xf32>
    %623 = arith.divf %621, %622 : vector<2x32xf32>
    %624 = vector.extract_strided_slice %604 {offsets = [0, 64], sizes = [2, 32], strides = [1, 1]} : vector<2x96xf32> to vector<2x32xf32>
    %625 = vector.extract_strided_slice %607 {offsets = [0, 64], sizes = [2, 32], strides = [1, 1]} : vector<2x96xf32> to vector<2x32xf32>
    %626 = arith.mulf %615, %625 : vector<2x32xf32>
    %627 = arith.addf %624, %626 : vector<2x32xf32>
    %628 = math.tanh %627 : vector<2x32xf32>
    %cst_196 = arith.constant 1.000000e+00 : f32
    %629 = vector.broadcast %cst_196 : f32 to vector<2x32xf32>
    %630 = arith.subf %629, %623 : vector<2x32xf32>
    %631 = arith.mulf %630, %628 : vector<2x32xf32>
    %632 = arith.mulf %623, %554 : vector<2x32xf32>
    %633 = arith.addf %631, %632 : vector<2x32xf32>
    %634 = vector.shape_cast %633 : vector<2x32xf32> to vector<2x1x32xf32>
    %635 = vector.broadcast %634 : vector<2x1x32xf32> to vector<2x6x32xf32>
    %636 = arith.mulf %635, %0 : vector<2x6x32xf32>
    %cst_197 = arith.constant dense<0.000000e+00> : vector<2x6xf32>
    %637 = vector.multi_reduction <add>, %636, %cst_197 [2] : vector<2x6x32xf32> to vector<2x6xf32>
    %cst_198 = arith.constant 0.176776692 : f32
    %638 = vector.broadcast %cst_198 : f32 to vector<2x6xf32>
    %639 = arith.mulf %637, %638 : vector<2x6xf32>
    %cst_199 = arith.constant 0.000000e+00 : f32
    %640 = vector.broadcast %cst_199 : f32 to vector<2x6xf32>
    %641 = arith.cmpf ogt, %1, %640 : vector<2x6xf32>
    %cst_200 = arith.constant -1.000000e+30 : f32
    %642 = vector.broadcast %cst_200 : f32 to vector<2x6xf32>
    %643 = arith.select %641, %642, %639 : vector<2x6xi1>, vector<2x6xf32>
    %cst_201 = arith.constant dense<0xFF800000> : vector<2xf32>
    %644 = vector.multi_reduction <maximumf>, %643, %cst_201 [1] : vector<2x6xf32> to vector<2xf32>
    %645 = vector.shape_cast %644 : vector<2xf32> to vector<2x1xf32>
    %646 = vector.broadcast %645 : vector<2x1xf32> to vector<2x6xf32>
    %647 = arith.subf %643, %646 : vector<2x6xf32>
    %648 = math.exp %647 : vector<2x6xf32>
    %cst_202 = arith.constant dense<0.000000e+00> : vector<2xf32>
    %649 = vector.multi_reduction <add>, %648, %cst_202 [1] : vector<2x6xf32> to vector<2xf32>
    %650 = vector.shape_cast %649 : vector<2xf32> to vector<2x1xf32>
    %651 = vector.broadcast %650 : vector<2x1xf32> to vector<2x6xf32>
    %652 = arith.divf %648, %651 : vector<2x6xf32>
    %653 = vector.shape_cast %652 : vector<2x6xf32> to vector<2x6x1xf32>
    %654 = vector.broadcast %653 : vector<2x6x1xf32> to vector<2x6x32xf32>
    %655 = arith.mulf %654, %0 : vector<2x6x32xf32>
    %cst_203 = arith.constant dense<0.000000e+00> : vector<2x32xf32>
    %656 = vector.multi_reduction <add>, %655, %cst_203 [1] : vector<2x6x32xf32> to vector<2x32xf32>
    %cst_204 = arith.constant dense<0.000000e+00> : vector<2x96xf32>
    %657 = tpu.matmul %633, %6, %cst_204 {dimension_numbers = #tpu.dot_dimension_numbers<[1], [0], [0], [1], [0, 0, 1, 1], [], []>} : vector<2x32xf32>, vector<32x96xf32>, vector<2x96xf32> -> vector<2x96xf32>
    %cst_205 = arith.constant dense<0.000000e+00> : vector<2x96xf32>
    %658 = tpu.matmul %656, %10, %cst_205 {dimension_numbers = #tpu.dot_dimension_numbers<[1], [0], [0], [1], [0, 0, 1, 1], [], []>} : vector<2x32xf32>, vector<32x96xf32>, vector<2x96xf32> -> vector<2x96xf32>
    %659 = arith.addf %657, %658 : vector<2x96xf32>
    %660 = vector.broadcast %18 : vector<1x96xf32> to vector<2x96xf32>
    %661 = arith.addf %659, %660 : vector<2x96xf32>
    %cst_206 = arith.constant dense<0.000000e+00> : vector<2x96xf32>
    %662 = tpu.matmul %633, %14, %cst_206 {dimension_numbers = #tpu.dot_dimension_numbers<[1], [0], [0], [1], [0, 0, 1, 1], [], []>} : vector<2x32xf32>, vector<32x96xf32>, vector<2x96xf32> -> vector<2x96xf32>
    %663 = vector.broadcast %22 : vector<1x96xf32> to vector<2x96xf32>
    %664 = arith.addf %662, %663 : vector<2x96xf32>
    %665 = vector.extract_strided_slice %661 {offsets = [0, 0], sizes = [2, 32], strides = [1, 1]} : vector<2x96xf32> to vector<2x32xf32>
    %666 = vector.extract_strided_slice %664 {offsets = [0, 0], sizes = [2, 32], strides = [1, 1]} : vector<2x96xf32> to vector<2x32xf32>
    %667 = arith.addf %665, %666 : vector<2x32xf32>
    %668 = arith.negf %667 : vector<2x32xf32>
    %669 = math.exp %668 : vector<2x32xf32>
    %cst_207 = arith.constant 1.000000e+00 : f32
    %670 = vector.broadcast %cst_207 : f32 to vector<2x32xf32>
    %671 = arith.addf %670, %669 : vector<2x32xf32>
    %672 = arith.divf %670, %671 : vector<2x32xf32>
    %673 = vector.extract_strided_slice %661 {offsets = [0, 32], sizes = [2, 32], strides = [1, 1]} : vector<2x96xf32> to vector<2x32xf32>
    %674 = vector.extract_strided_slice %664 {offsets = [0, 32], sizes = [2, 32], strides = [1, 1]} : vector<2x96xf32> to vector<2x32xf32>
    %675 = arith.addf %673, %674 : vector<2x32xf32>
    %676 = arith.negf %675 : vector<2x32xf32>
    %677 = math.exp %676 : vector<2x32xf32>
    %cst_208 = arith.constant 1.000000e+00 : f32
    %678 = vector.broadcast %cst_208 : f32 to vector<2x32xf32>
    %679 = arith.addf %678, %677 : vector<2x32xf32>
    %680 = arith.divf %678, %679 : vector<2x32xf32>
    %681 = vector.extract_strided_slice %661 {offsets = [0, 64], sizes = [2, 32], strides = [1, 1]} : vector<2x96xf32> to vector<2x32xf32>
    %682 = vector.extract_strided_slice %664 {offsets = [0, 64], sizes = [2, 32], strides = [1, 1]} : vector<2x96xf32> to vector<2x32xf32>
    %683 = arith.mulf %672, %682 : vector<2x32xf32>
    %684 = arith.addf %681, %683 : vector<2x32xf32>
    %685 = math.tanh %684 : vector<2x32xf32>
    %cst_209 = arith.constant 1.000000e+00 : f32
    %686 = vector.broadcast %cst_209 : f32 to vector<2x32xf32>
    %687 = arith.subf %686, %680 : vector<2x32xf32>
    %688 = arith.mulf %687, %685 : vector<2x32xf32>
    %689 = arith.mulf %680, %633 : vector<2x32xf32>
    %690 = arith.addf %688, %689 : vector<2x32xf32>
    %cst_210 = arith.constant dense<0.000000e+00> : vector<2x128xf32>
    %691 = tpu.matmul %690, %23, %cst_210 {dimension_numbers = #tpu.dot_dimension_numbers<[1], [0], [0], [1], [0, 0, 1, 1], [], []>} : vector<2x32xf32>, vector<32x128xf32>, vector<2x128xf32> -> vector<2x128xf32>
    %692 = vector.broadcast %24 : vector<1x128xf32> to vector<2x128xf32>
    %693 = arith.addf %691, %692 : vector<2x128xf32>
    %cst_211 = arith.constant dense<0.000000e+00> : vector<2x128xf32>
    %694 = tpu.matmul %656, %25, %cst_211 {dimension_numbers = #tpu.dot_dimension_numbers<[1], [0], [0], [1], [0, 0, 1, 1], [], []>} : vector<2x32xf32>, vector<32x128xf32>, vector<2x128xf32> -> vector<2x128xf32>
    %695 = arith.addf %693, %694 : vector<2x128xf32>
    %696 = vector.broadcast %26 : vector<1x128xf32> to vector<2x128xf32>
    %697 = arith.addf %695, %696 : vector<2x128xf32>
    %698 = vector.shape_cast %697 : vector<2x128xf32> to vector<2x1x128xf32>
    %c0_212 = arith.constant 0 : index
    %c4 = arith.constant 4 : index
    %c0_213 = arith.constant 0 : index
    %699 = vector.load %arg13[%c0_212, %c4, %c0_213] : memref<2x5x128xf32, #tpu.memory_space<vmem>>, vector<2x1x128xf32>
    tpu.vector_store %arg13[%c0_212, %c4, %c0_213], %698 {strides = array<i32>} : memref<2x5x128xf32, #tpu.memory_space<vmem>>, vector<2x1x128xf32>,
    return
  }
}

</mosaic_0001>

<bundles_post_ra>
// kernel: tpu_custom_call.1
= control target key start
LH: loop header
LB: loop body
LE: loop exit
PB: predicated region body
PF: predicated region fallthrough
CT: control target
= control target key end

     0   :  { %18 = vsyncpa [#allocation3], 0  ;;  %s4355_s0 = inlined_call_operand.hbm [shape: f32[2,128], index: 0, kind: input, shape index: {}]   ;;  %s4356_s1 = inlined_call_operand.hbm [shape: f32[2,6], index: 1, kind: input, shape index: {}]   ;;  %s4357_s2 = inlined_call_operand.vmem [shape: f32[2,6,32], index: 2, kind: input, shape index: {}]   ;;  %s4358_s3 = inlined_call_operand.vmem [shape: f32[128,32], index: 3, kind: input, shape index: {}]   ;;  %s4359_s4 = inlined_call_operand.vmem [shape: f32[2,32,96], index: 4, kind: input, shape index: {}]   ;;  %s4360_s5 = inlined_call_operand.vmem [shape: f32[2,32,96], index: 5, kind: input, shape index: {}]   ;;  %s4361_s6 = inlined_call_operand.vmem [shape: f32[2,32,96], index: 6, kind: input, shape index: {}]   ;;  %s4362_s7 = inlined_call_operand.hbm [shape: f32[2,1,96], index: 7, kind: input, shape index: {}]   ;;  %s4363_s8 = inlined_call_operand.hbm [shape: f32[2,1,96], index: 8, kind: input, shape index: {}]   ;;  %s4364_s9 = inlined_call_operand.hbm [shape: f32[32,128], index: 9, kind: input, shape index: {}]   ;;  %s4365_s10 = inlined_call_operand.vmem [shape: f32[1,128], index: 10, kind: input, shape index: {}]   ;;  %s4366_s11 = inlined_call_operand.hbm [shape: f32[32,128], index: 11, kind: input, shape index: {}]   ;;  %s4367_s12 = inlined_call_operand.vmem [shape: f32[1,128], index: 12, kind: input, shape index: {}]   ;;  %s4368_s13 = inlined_call_operand.vmem [shape: f32[2,5,128], index: 13, kind: output, shape index: {}]  }
   0x1   :  { %19 = vsyncpa [#allocation5], 0 }
   0x2   :  { %20 = vsyncpa [#allocation8], 0  ;;  %s38_s27 = sshll.u32 %s4356_s1, 4  ;;  %s39_s27 = int_to_ptr.hbm [resolvable:$true] %s38_s27 }
   0x3   :  { %21 = vsyncpa [#allocation11], 0  ;;  %s3061_s28 = smov [#allocation4]   ;;  %s71_s15 = sshll.u32 %s4363_s8, 4  ;;  %s72_s15 = int_to_ptr.hbm [resolvable:$true] %s71_s15 }
   0x4   :  { %s40_s29 = sshll.u32 %s3061_s28, 4  ;;  %s3062_s16 = smov [#allocation7]   ;;  %s41_s29 = int_to_ptr.vmem [resolvable:$true] %s40_s29 }
   0x5   :  { %43 = dma.hbm_to_vmem [thread:$0]  %s39_s27, 32, %s41_s29, [#allocation5]  }
   0x6   :  { %s73_s17 = sshll.u32 %s3062_s16, 4  ;;  %s27_s20 = sshll.u32 %s4355_s0, 4  ;;  %s74_s17 = int_to_ptr.vmem [resolvable:$true] %s73_s17  ;;  %s28_s20 = int_to_ptr.hbm [resolvable:$true] %s27_s20 }
   0x7   :  { %s3063_s1 = smov 16   ;;  %s3064_s21 = smov 1  }
   0x8   :  { %79 = dma.hbm_to_vmem [thread:$0]  %s72_s15, 32, %s74_s17, [#allocation8], %s3063_s1, %s3063_s1, %s3064_s21  }
   0x9   :  { %s58_s24 = sshll.u32 %s4362_s7, 4  ;;  %s3065_s25 = smov [#allocation2]   ;;  %s59_s24 = int_to_ptr.hbm [resolvable:$true] %s58_s24 }
   0xa   :  { %s29_s26 = sshll.u32 %s3065_s25, 4  ;;  %s3066_s8 = smov [#allocation6]   ;;  %s30_s26 = int_to_ptr.vmem [resolvable:$true] %s29_s26 }
   0xb   :  { %32 = dma.hbm_to_vmem [thread:$0]  %s28_s20, 32, %s30_s26, [#allocation3]  }
   0xc   :  { %s60_s27 = sshll.u32 %s3066_s8, 4  ;;  %s84_s0 = sshll.u32 %s4364_s9, 4  ;;  %s61_s27 = int_to_ptr.vmem [resolvable:$true] %s60_s27  ;;  %s85_s0 = int_to_ptr.hbm [resolvable:$true] %s84_s0 }
   0xd   :  { %66 = dma.hbm_to_vmem [thread:$0]  %s59_s24, 32, %s61_s27, [#allocation5], %s3063_s1, %s3063_s1, %s3064_s21  }
   0xe   :  { %s3067_s30 = smov [#allocation9]   ;;  %s99_s7 = sshll.u32 %s4366_s11, 4  ;;  %s100_s7 = int_to_ptr.hbm [resolvable:$true] %s99_s7 }
   0xf   :  { %s86_s14 = sshll.u32 %s3067_s30, 4  ;;  %s3068_s17 = smov 128   ;;  %s87_s14 = int_to_ptr.vmem [resolvable:$true] %s86_s14 }
  0x10   :  { %s3069_s18 = smov 8   ;;  %s3070_s19 = smov [#allocation10]  }
  0x11   :  { %92 = dma.hbm_to_vmem [thread:$0]  %s85_s0, 512, %s87_s14, [#allocation8], %s3068_s17, %s3068_s17, %s3069_s18  }
  0x12   :  { %s101_s20 = sshll.u32 %s3070_s19, 4  ;;  %s102_s20 = int_to_ptr.vmem [resolvable:$true] %s101_s20 }
  0x13   :  { %107 = dma.hbm_to_vmem [thread:$0]  %s100_s7, 512, %s102_s20, [#allocation11], %s3068_s17, %s3068_s17, %s3069_s18  }
  0x14   :  { %3053 = dma.done.wait [#allocation3], 32  }
  0x15   :  { %3054 = vsyncadd [#allocation3], 4294967264 }
  0x16   :  { %3055 = dma.done.wait [#allocation5], 64  }
  0x17   :  { %3056 = vsyncadd [#allocation5], 4294967232 }
  0x18   :  { %3057 = dma.done.wait [#allocation8], 544  }
  0x19   :  { %3058 = vsyncadd [#allocation8], 4294966752 }
  0x1a   :  { %3059 = dma.done.wait [#allocation11], 512  }
  0x1b   :  { %3060 = vsyncadd [#allocation11], 4294966784  ;;  %v3071_v0 = vmov 6.0   ;;  %vm198_vm0 = vcmask 259072   ;;  %v3167_v2 = vld [vmem:[%s4357_s2] sm:$0x3f]  ;;  %v196_v30 = vlaneseq }
  0x1c   :  { %2733 = vrcp.f32 %v3071_v0  ;;  %v3172_v3 = vld [vmem:[%s4357_s2 + $0x8] sm:$0x3f]  ;;  %v199_v4 = vsel %vm198_vm0, %v3167_v2, 0.0  ;;  %v3190_v34 = vld [vmem:[#allocation4] sm:$0x3]  ;;  %vm258_vm2 = vcmask 1041409  }
  0x1d   :  { %v206_v6 = vsel %vm198_vm0, %v3172_v3, 0.0  ;;  %v200_v7 = vrot.slane %v199_v4, 4  ;;  %v3188_v31 = vand.u32 127, %v196_v30  ;;  %vm253_vm3 = vcmp.gt.f32.partialorder %v3190_v34, 0.0  ;;  %v3202_v41 = vld [vmem:[%s4358_s3 + $0x78] sm:$0xff]  ;;  %v3207_v42 = vld [vmem:[%s4358_s3 + $0x70] sm:$0xff] }
  0x1e   :  { %v207_v8 = vrot.slane %v206_v6, 4  ;;  %vm262_vm4 = vcmask 41984   ;;  %223 = vmatpush.msra.mxu0 %v3202_v41  ;;  %v3213_v43 = vld [vmem:[%s4358_s3 + $0x68] sm:$0xff]  ;;  %v3219_v44 = vld [vmem:[%s4358_s3 + $0x60] sm:$0xff]  ;;  %v3225_v45 = vld [vmem:[%s4358_s3 + $0x58] sm:$0xff]  ;;  %v289_v63 = vshrl.u32 %v196_v30, 7 }
  0x1f   :  { %v201_v10 = vadd.f32 %v200_v7, %v199_v4  ;;  %v3231_v46 = vld [vmem:[%s4358_s3 + $0x50] sm:$0xff]  ;;  %v3237_v47 = vld [vmem:[%s4358_s3 + $0x48] sm:$0xff]  ;;  %v3243_v48 = vld [vmem:[%s4358_s3 + $0x40] sm:$0xff]  ;;  %vm320_vm5 = vcmask 261120   ;;  %s3072_s19 = smov 32   ;;  %s3073_s14 = smov 64  }
  0x20   :  { %v208_v11 = vadd.f32 %v207_v8, %v206_v6  ;;  %224 = vmatpush.msra.mxu0 %v3207_v42  ;;  %v3249_v49 = vld [vmem:[%s4358_s3 + $0x38] sm:$0xff]  ;;  %v3255_v50 = vld [vmem:[%s4358_s3 + $0x30] sm:$0xff]  ;;  %v3261_v51 = vld [vmem:[%s4358_s3 + $0x28] sm:$0xff]  ;;  %2724 = vset.pattern.permute.xlu2 %v289_v63  ;;  %s3074_s15 = smov 96  }
  0x21   :  { %v202_v13 = vrot.slane %v201_v10, 2  ;;  %v3267_v54 = vld [vmem:[%s4358_s3 + $0x20] sm:$0xff]  ;;  %v3273_v56 = vld [vmem:[%s4358_s3 + $0x18] sm:$0xff]  ;;  %v3279_v57 = vld [vmem:[%s4358_s3 + $0x10] sm:$0xff]  ;;  %2725 = vset.pattern.permute.xlu1 %v289_v63  ;;  %2726 = vset.pattern.permute.xlu0 %v289_v63 }
  0x22   :  { %v2734_v1 = vpop.eup %2733  ;;  %v209_v14 = vrot.slane %v208_v11, 2  ;;  %225 = vmatpush.msra.mxu0 %v3213_v43  ;;  %v3287_v60 = vld [vmem:[%s4358_s3 + $0x8] sm:$0xff]  ;;  %v3293_v61 = vld [vmem:[%s4358_s3] sm:$0xff]  ;;  %v3299_v0 = vld [vmem:[%s4361_s6 + $0x18] sm:$0xff] }
  0x23   :  { %v214_v5 = vmul.f32 6.0, %v2734_v1  ;;  %v203_v16 = vadd.f32 %v202_v13, %v201_v10  ;;  %vm218_vm1 = vweird.f32 %v2734_v1  ;;  %v222_v62 = vld [vmem:[#allocation2] sm:$0x3]  ;;  %390 = vmatpush.msra.mxu3 %v3299_v0 }
  0x24   :  { %v210_v17 = vadd.f32 %v209_v14, %v208_v11  ;;  %226 = vmatpush.msra.mxu0 %v3219_v44  ;;  %v3316_v6 = vld [vmem:[%s4361_s6] sm:$0xff] }
  0x25   :  { %v215_v9 = vsub.f32 1.0, %v214_v5  ;;  %v204_v18 = vrot.slane %v203_v16, 1  ;;  %v3310_v5 = vld [vmem:[%s4361_s6 + $0x8] sm:$0xff] }
  0x26   :  { %v211_v19 = vrot.slane %v210_v17, 1  ;;  %227 = vmatpush.msra.mxu0 %v3225_v45 }
  0x27   :  { %v216_v12 = vmul.f32 %v2734_v1, %v215_v9  ;;  %v205_v21 = vadd.f32 %v204_v18, %v203_v16 }
  0x28   :  { %v212_v22 = vadd.f32 %v211_v19, %v210_v17  ;;  %228 = vmatpush.msra.mxu0 %v3231_v46 }
  0x29   :  { %v217_v15 = vadd.f32 %v2734_v1, %v216_v12 }
  0x2a   :  { %229 = vmatpush.msra.mxu0 %v3237_v47 }
  0x2b   :  { %v219_v20 = vsel %vm218_vm1, %v2734_v1, %v217_v15  ;;  %v3304_v1 = vld [vmem:[%s4361_s6 + $0x10] sm:$0xff] }
  0x2c   :  { %v3178_v23 = vmul.f32 %v219_v20, %v205_v21  ;;  %v3182_v25 = vmul.f32 %v219_v20, %v212_v22  ;;  %230 = vmatpush.msra.mxu0 %v3243_v48  ;;  %391 = vmatpush.msra.mxu3 %v3304_v1  ;;  %v3328_v21 = vld [vmem:[%s4359_s4 + $0x18] sm:$0xff]  ;;  %v3334_v22 = vld [vmem:[%s4359_s4 + $0x10] sm:$0xff] }
  0x2d   :  { %358 = vmatpush.msra.mxu2 %v3328_v21 }
  0x2e   :  { %v243_v24 = vmul.f32 %v3178_v23, %v3167_v2  ;;  %v244_v27 = vmul.f32 %v3182_v25, %v3172_v3  ;;  %231 = vmatpush.msra.mxu0 %v3249_v49  ;;  %392 = vmatpush.msra.mxu3 %v3310_v5  ;;  %v375_v7 = vsel %vm258_vm2, %v3182_v25, %v3178_v23  ;;  %v3340_v23 = vld [vmem:[%s4359_s4 + $0x8] sm:$0xff]  ;;  %v3351_v25 = vld [vmem:[%s4359_s4] sm:$0xff] }
  0x2f   :  { %359 = vmatpush.msra.mxu2 %v3334_v22 }
  0x30   :  { %v245_v26 = vsel %vm198_vm0, %v243_v24, 0.0  ;;  %v248_v28 = vsel %vm198_vm0, %v244_v27, 0.0  ;;  %232 = vmatpush.msra.mxu0 %v3255_v50  ;;  %393 = vmatpush.msra.mxu3 %v3316_v6  ;;  %v3346_v24 = vld [vmem:[%s4360_s5 + $0x18] sm:$0xff]  ;;  %v3359_v27 = vld [vmem:[%s4360_s5 + $0x10] sm:$0xff] }
  0x31   :  { %246 = vadd.xlane.f32.xlu0 %v245_v26  ;;  %2653 = vmatmul.msk.f32.vlgmr.msra.gmra.mxu3 %vm320_vm5, %v375_v7 }
  0x32   :  { %233 = vmatpush.msra.mxu0 %v3261_v51  ;;  %360 = vmatpush.msra.mxu2 %v3340_v23 }
  0x33   :  { %335 = vmatpush.msra.mxu1 %v3346_v24 }
  0x34   :  { %234 = vmatpush.msra.mxu0 %v3267_v54  ;;  %361 = vmatpush.msra.mxu2 %v3351_v25 }
  0x35   :  { %336 = vmatpush.msra.mxu1 %v3359_v27 }
  0x36   :  { %235 = vmatpush.msra.mxu0 %v3273_v56 }
  0x38   :  { %236 = vmatpush.msra.mxu0 %v3279_v57 }
  0x39   :  { %249 = vadd.xlane.f32.xlu0 %v248_v28  ;;  %v3365_v28 = vld [vmem:[%s4360_s5 + $0x8] sm:$0xff] }
  0x3a   :  { %237 = vmatpush.msra.mxu0 %v3287_v60  ;;  %337 = vmatpush.msra.mxu1 %v3365_v28 }
  0x3c   :  { %238 = vmatpush.msra.mxu0 %v3293_v61 }
  0x3d   :  { %239 = vmatmul.f32.vlgmr.msra.gmra.mxu0 %v222_v62 }
  0xa4   :  { %v247_v29 = vpop.xlane.xlu0 %246 }
  0xa5   :  { %v251_v32 = vmul.f32 0.17677669, %v247_v29  ;;  %v3370_v29 = vld [vmem:[%s4360_s5] sm:$0xff] }
  0xa6   :  { %338 = vmatpush.msra.mxu1 %v3370_v29 }
  0xa7   :  { %v256_v36 = vperm.slane %v251_v32, %v3188_v31 }
  0xac   :  { %v250_v33 = vpop.xlane.xlu0 %249 }
  0xad   :  { %v252_v35 = vmul.f32 0.17677669, %v250_v33 }
  0xaf   :  { %v257_v37 = vperm.slane %v252_v35, %v3188_v31 }
  0xb1   :  { %v259_v38 = vsel %vm258_vm2, %v257_v37, %v256_v36 }
  0xb2   :  { %v261_v39 = vsel %vm253_vm3, -1e+30, %v259_v38 }
  0xb3   :  { %v263_v40 = vsel %vm262_vm4, %v261_v39, -inf }
  0xb4   :  { %264 = vmax.xlane.f32.xlu1 %v263_v40 }
  0xba   :  { %v240_v26 = vpop.f32.mrf.mxu0 }
  0xbb   :  { %2652 = vmatmul.msk.f32.vlgmr.msra.gmra.mxu2 %vm320_vm5, %v240_v26 }
 0x127   :  { %v265_v52 = vpop.xlane.xlu1 %264 }
 0x128   :  { %v266_v53 = vsub.f32 %v261_v39, %v265_v52 }
 0x12a   :  { %v267_v55 = vmul.f32 1.442695, %v266_v53 }
 0x12c   :  { %2735 = vpow2.f32 %v267_v55 }
 0x132   :  { %v2736_v58 = vpop.eup %2735 }
 0x133   :  { %v269_v59 = vsel %vm262_vm4, %v2736_v58, 0.0 }
 0x134   :  { %270 = vadd.xlane.f32.xlu1 %v269_v59 }
 0x1a7   :  { %v271_v4 = vpop.xlane.xlu1 %270 }
 0x1a8   :  { %2737 = vrcp.f32 %v271_v4  ;;  %v283_v11 = vand.u32 2147483648, %v271_v4  ;;  %v281_v13 = vand.u32 2147483647, %v271_v4  ;;  %vm277_vm7 = vweird.f32 %v271_v4 }
 0x1aa   :  { %v284_v15 = vor.u32 1.1754944e-38, %v283_v11  ;;  %vm282_vm9 = vcmp.eq.f32.partialorder %v281_v13, 8.507059e+37  ;;  %v3386_v13 = vld [vmem:[#allocation6] ss:$0 sm:$0xff] }
 0x1ae   :  { %v2738_v8 = vpop.eup %2737 }
 0x1af   :  { %v273_v9 = vmul.f32 %v2738_v8, %v271_v4  ;;  %vm278_vm6 = vweird.f32 %v2738_v8 }
 0x1b0   :  { %vm279_vm8 = vmor %vm277_vm7, %vm278_vm6 }
 0x1b1   :  { %v274_v10 = vsub.f32 1.0, %v273_v9 }
 0x1b3   :  { %v275_v12 = vmul.f32 %v2738_v8, %v274_v10  ;;  %v395_v10 = vpop.f32.mrf.mxu3 }
 0x1b5   :  { %v276_v14 = vadd.f32 %v2738_v8, %v275_v12  ;;  %v363_v12 = vpop.f32.mrf.mxu2 }
 0x1b7   :  { %v280_v16 = vsel %vm279_vm8, %v2738_v8, %v276_v14  ;;  %v3378_v8 = vld [vmem:[#allocation7] ss:$0 sm:$0xff] }
 0x1b8   :  { %v285_v17 = vsel %vm282_vm9, %v284_v15, %v280_v16  ;;  %v396_v11 = vadd.f32 %v3378_v8, %v395_v10 }
 0x1b9   :  { %v286_v18 = vmul.f32 %v2736_v58, %v285_v17 }
 0x1ba   :  { %419 = vrot.lane.b32.xlu0 %v396_v11, %s3073_s14 }
 0x1bb   :  { %v287_v19 = vperm.slane %v286_v18, 0  ;;  %v294_v20 = vperm.slane %v286_v18, 1 }
 0x1bd   :  { %292 = vperm.xlu2 %2724, %v287_v19  }
 0x1c2   :  { %450 = vrot.lane.b32.xlu0 %v3172_v3, %s3072_s19 }
 0x1c5   :  { %299 = vperm.xlu2 %2724, %v294_v20  }
 0x1cd   :  { %435 = vrot.lane.b32.xlu2 %v375_v7, %s3072_s19 }
 0x217   :  { %v293_v30 = vpop.permute.xlu2 %292 }
 0x218   :  { %v301_v32 = vmul.f32 %v293_v30, %v3167_v2 }
 0x21a   :  { %v303_v33 = vsel %vm198_vm0, %v301_v32, 0.0 }
 0x21b   :  { %v304_v35 = vrot.slane %v303_v33, 4 }
 0x21d   :  { %v305_v36 = vadd.f32 %v304_v35, %v303_v33 }
 0x21f   :  { %v300_v37 = vpop.permute.xlu2 %299  ;;  %v306_v39 = vrot.slane %v305_v36, 2 }
 0x220   :  { %v302_v38 = vmul.f32 %v300_v37, %v3172_v3 }
 0x221   :  { %v307_v53 = vadd.f32 %v306_v39, %v305_v36 }
 0x222   :  { %v310_v40 = vsel %vm198_vm0, %v302_v38, 0.0 }
 0x223   :  { %v311_v52 = vrot.slane %v310_v40, 4  ;;  %v308_v59 = vrot.slane %v307_v53, 1 }
 0x225   :  { %v312_v55 = vadd.f32 %v311_v52, %v310_v40  ;;  %v309_v4 = vadd.f32 %v308_v59, %v307_v53 }
 0x227   :  { %v313_v58 = vrot.slane %v312_v55, 2 }
 0x229   :  { %v314_v62 = vadd.f32 %v313_v58, %v312_v55 }
 0x22b   :  { %v315_v63 = vrot.slane %v314_v62, 1 }
 0x22c   :  { %v420_v39 = vpop.permute.xlu0 %419 }
 0x22d   :  { %v316_v7 = vadd.f32 %v315_v63, %v314_v62  ;;  %v436_v62 = vpop.permute.xlu2 %435 }
 0x22f   :  { %v319_v9 = vsel %vm258_vm2, %v316_v7, %v309_v4 }
 0x230   :  { %2651 = vmatmul.msk.f32.vlgmr.msra.gmra.mxu1 %vm320_vm5, %v319_v9 }
 0x2ad   :  { %v340_v14 = vpop.f32.mrf.mxu1 }
 0x2ae   :  { %v364_v15 = vadd.f32 %v363_v12, %v340_v14  ;;  %v3396_v12 = vpop.permute.xlu0 %450 }
 0x2b0   :  { %v369_v16 = vadd.f32 %v3386_v13, %v364_v15 }
 0x2b2   :  { %v398_v17 = vadd.f32 %v396_v11, %v369_v16 }
 0x2b4   :  { %v2654_v18 = vmul.f32 -1.442695, %v398_v17 }
 0x2b6   :  { %2739 = vpow2.f32 %v2654_v18 }
 0x2bc   :  { %v2740_v19 = vpop.eup %2739 }
 0x2bd   :  { %v402_v20 = vadd.f32 1.0, %v2740_v19 }
 0x2bf   :  { %2741 = vrcp.f32 %v402_v20  ;;  %v414_v33 = vand.u32 2147483648, %v402_v20  ;;  %v412_v36 = vand.u32 2147483647, %v402_v20  ;;  %vm408_vm11 = vweird.f32 %v402_v20 }
 0x2c1   :  { %v415_v38 = vor.u32 1.1754944e-38, %v414_v33  ;;  %vm413_vm13 = vcmp.eq.f32.partialorder %v412_v36, 8.507059e+37 }
 0x2c5   :  { %v2742_v26 = vpop.eup %2741 }
 0x2c6   :  { %v404_v30 = vmul.f32 %v2742_v26, %v402_v20  ;;  %vm409_vm10 = vweird.f32 %v2742_v26 }
 0x2c7   :  { %vm410_vm12 = vmor %vm408_vm11, %vm409_vm10  ;;  %vm706_vm11 = vcmask 1041408  }
 0x2c8   :  { %v405_v32 = vsub.f32 1.0, %v404_v30 }
 0x2ca   :  { %v406_v35 = vmul.f32 %v2742_v26, %v405_v32 }
 0x2cc   :  { %v407_v37 = vadd.f32 %v2742_v26, %v406_v35 }
 0x2ce   :  { %v411_v40 = vsel %vm410_vm12, %v2742_v26, %v407_v37 }
 0x2cf   :  { %v416_v52 = vsel %vm413_vm13, %v415_v38, %v411_v40 }
 0x2d0   :  { %v422_v53 = vmul.f32 %v420_v39, %v416_v52  ;;  %v429_v63 = vsub.f32 1.0, %v416_v52  ;;  %v438_v7 = vmul.f32 %v436_v62, %v416_v52 }
 0x2d2   :  { %424 = vrot.lane.b32.xlu1 %v422_v53, %s3073_s14 }
 0x344   :  { %v425_v55 = vpop.permute.xlu1 %424 }
 0x345   :  { %v427_v58 = vadd.f32 %v425_v55, %v369_v16 }
 0x347   :  { %2743 = vtanh.f32 %v427_v58 }
 0x34d   :  { %v2744_v59 = vpop.eup %2743 }
 0x34e   :  { %431 = vrot.lane.b32.xlu2 %v2744_v59, %s3074_s15 }
 0x356   :  { %448 = vrot.lane.b32.xlu2 %v3167_v2, %s3072_s19 }
 0x3a8   :  { %v432_v4 = vpop.permute.xlu2 %431 }
 0x3a9   :  { %v434_v9 = vmul.f32 %v432_v4, %v429_v63  ;;  %v3422_v63 = vld [vmem:[%s4359_s4 + $0x38] sm:$0xff] }
 0x3aa   :  { %v3427_v4 = vld [vmem:[%s4361_s6 + $0x38] sm:$0xff]  ;;  %574 = vmatpush.msrb.mxu2 %v3422_v63 }
 0x3ab   :  { %v3393_v10 = vadd.f32 %v438_v7, %v434_v9  ;;  %601 = vmatpush.msrb.mxu3 %v3427_v4  ;;  %v3434_v7 = vld [vmem:[%s4359_s4 + $0x30] sm:$0xff]  ;;  %1089 = vmatpush.msrb.mxu0 %v3427_v4 }
 0x3ac   :  { %v3439_v9 = vld [vmem:[%s4361_s6 + $0x30] sm:$0xff]  ;;  %575 = vmatpush.msrb.mxu2 %v3434_v7 }
 0x3ad   :  { %v441_v11 = vrot.slane %v3393_v10, 1  ;;  %v442_v14 = vperm.slane %v3393_v10, 0  ;;  %602 = vmatpush.msrb.mxu3 %v3439_v9  ;;  %1090 = vmatpush.msrb.mxu0 %v3439_v9 }
 0x3af   :  { %v443_v15 = vperm.slane %v441_v11, 0  ;;  %v3444_v11 = vld [vmem:[%s4359_s4 + $0x28] sm:$0xff] }
 0x3b0   :  { %v3399_v16 = vpop.permute.xlu2 %448  ;;  %576 = vmatpush.msrb.mxu2 %v3444_v11 }
 0x3b1   :  { %v454_v17 = vmul.f32 %v3399_v16, %v442_v14  ;;  %v455_v18 = vmul.f32 %v3396_v12, %v443_v15  ;;  %v3452_v14 = vld [vmem:[%s4361_s6 + $0x28] sm:$0xff]  ;;  %v3457_v15 = vld [vmem:[%s4359_s4 + $0x20] sm:$0xff] }
 0x3b2   :  { %603 = vmatpush.msrb.mxu3 %v3452_v14  ;;  %1091 = vmatpush.msrb.mxu0 %v3452_v14 }
 0x3b3   :  { %458 = vrot.lane.b32.xlu2 %v454_v17, %s3074_s15  ;;  %460 = vrot.lane.b32.xlu1 %v455_v18, %s3074_s15  ;;  %v3462_v17 = vld [vmem:[%s4361_s6 + $0x20] sm:$0xff] }
 0x3b4   :  { %577 = vmatpush.msrb.mxu2 %v3457_v15  ;;  %604 = vmatpush.msrb.mxu3 %v3462_v17 }
 0x3b5   :  { %1092 = vmatpush.msrb.mxu0 %v3462_v17 }
 0x3b6   :  { %730 = vmatpush.msra.mxu3 %v3202_v41 }
 0x3b7   :  { %1211 = vmatpush.msra.mxu0 %v3202_v41 }
 0x3b8   :  { %731 = vmatpush.msra.mxu3 %v3207_v42 }
 0x3b9   :  { %1212 = vmatpush.msra.mxu0 %v3207_v42 }
 0x3ba   :  { %732 = vmatpush.msra.mxu3 %v3213_v43 }
 0x3bb   :  { %1213 = vmatpush.msra.mxu0 %v3213_v43 }
 0x3bc   :  { %733 = vmatpush.msra.mxu3 %v3219_v44 }
 0x3bd   :  { %1214 = vmatpush.msra.mxu0 %v3219_v44 }
 0x3be   :  { %734 = vmatpush.msra.mxu3 %v3225_v45 }
 0x3bf   :  { %1215 = vmatpush.msra.mxu0 %v3225_v45 }
 0x3c0   :  { %735 = vmatpush.msra.mxu3 %v3231_v46 }
 0x3c1   :  { %1216 = vmatpush.msra.mxu0 %v3231_v46 }
 0x3c2   :  { %736 = vmatpush.msra.mxu3 %v3237_v47 }
 0x3c3   :  { %1217 = vmatpush.msra.mxu0 %v3237_v47 }
 0x3c4   :  { %737 = vmatpush.msra.mxu3 %v3243_v48 }
 0x3c5   :  { %1218 = vmatpush.msra.mxu0 %v3243_v48 }
 0x3c6   :  { %738 = vmatpush.msra.mxu3 %v3249_v49 }
 0x3c7   :  { %1219 = vmatpush.msra.mxu0 %v3249_v49 }
 0x3c8   :  { %739 = vmatpush.msra.mxu3 %v3255_v50 }
 0x3c9   :  { %1220 = vmatpush.msra.mxu0 %v3255_v50 }
 0x3ca   :  { %740 = vmatpush.msra.mxu3 %v3261_v51 }
 0x3cb   :  { %1221 = vmatpush.msra.mxu0 %v3261_v51 }
 0x3cc   :  { %741 = vmatpush.msra.mxu3 %v3267_v54 }
 0x3cd   :  { %1222 = vmatpush.msra.mxu0 %v3267_v54 }
 0x3ce   :  { %742 = vmatpush.msra.mxu3 %v3273_v56 }
 0x3cf   :  { %1223 = vmatpush.msra.mxu0 %v3273_v56 }
 0x3d0   :  { %743 = vmatpush.msra.mxu3 %v3279_v57 }
 0x3d1   :  { %1224 = vmatpush.msra.mxu0 %v3279_v57 }
 0x3d2   :  { %744 = vmatpush.msra.mxu3 %v3287_v60 }
 0x3d3   :  { %1225 = vmatpush.msra.mxu0 %v3287_v60  ;;  %v3513_v60 = vld [vmem:[%s4360_s5 + $0x38] sm:$0xff] }
 0x3d4   :  { %745 = vmatpush.msra.mxu3 %v3293_v61  ;;  %550 = vmatpush.msrb.mxu1 %v3513_v60 }
 0x3d5   :  { %1226 = vmatpush.msra.mxu0 %v3293_v61  ;;  %v3515_v61 = vld [vmem:[#allocation10 + $0x18] sm:$0xff] }
 0x3d6   :  { %688 = vmatpush.msra.mxu2 %v3515_v61 }
 0x40d   :  { %v459_v19 = vpop.permute.xlu2 %458 }
 0x40e   :  { %v464_v20 = vsel %vm198_vm0, %v459_v19, 0.0  ;;  %v3522_v19 = vld [vmem:[%s4360_s5 + $0x30] sm:$0xff] }
 0x40f   :  { %465 = vadd.xlane.f32.xlu0 %v464_v20  ;;  %v3524_v20 = vld [vmem:[#allocation10 + $0x10] sm:$0xff]  ;;  %551 = vmatpush.msrb.mxu1 %v3522_v19 }
 0x410   :  { %689 = vmatpush.msra.mxu2 %v3524_v20 }
 0x425   :  { %v461_v26 = vpop.permute.xlu1 %460 }
 0x426   :  { %v467_v30 = vsel %vm198_vm0, %v461_v26, 0.0  ;;  %v3531_v26 = vld [vmem:[%s4360_s5 + $0x28] sm:$0xff] }
 0x427   :  { %468 = vadd.xlane.f32.xlu2 %v467_v30  ;;  %v3533_v30 = vld [vmem:[#allocation10 + $0x8] sm:$0xff]  ;;  %552 = vmatpush.msrb.mxu1 %v3531_v26 }
 0x428   :  { %690 = vmatpush.msra.mxu2 %v3533_v30 }
 0x482   :  { %v466_v32 = vpop.xlane.xlu0 %465 }
 0x483   :  { %v470_v33 = vmul.f32 0.17677669, %v466_v32  ;;  %v3540_v32 = vld [vmem:[%s4360_s5 + $0x20] sm:$0xff] }
 0x484   :  { %553 = vmatpush.msrb.mxu1 %v3540_v32 }
 0x485   :  { %v474_v37 = vperm.slane %v470_v33, %v3188_v31  ;;  %v3542_v33 = vld [vmem:[#allocation10] sm:$0xff] }
 0x486   :  { %691 = vmatpush.msra.mxu2 %v3542_v33 }
 0x49a   :  { %v469_v35 = vpop.xlane.xlu2 %468 }
 0x49b   :  { %v471_v36 = vmul.f32 0.17677669, %v469_v35 }
 0x49d   :  { %v475_v38 = vperm.slane %v471_v36, %v3188_v31 }
 0x49f   :  { %v476_v39 = vsel %vm258_vm2, %v475_v38, %v474_v37 }
 0x4a0   :  { %v478_v40 = vsel %vm253_vm3, -1e+30, %v476_v39 }
 0x4a1   :  { %v479_v52 = vsel %vm262_vm4, %v478_v40, -inf }
 0x4a2   :  { %480 = vmax.xlane.f32.xlu1 %v479_v52 }
 0x515   :  { %v481_v53 = vpop.xlane.xlu1 %480 }
 0x516   :  { %v482_v55 = vsub.f32 %v478_v40, %v481_v53 }
 0x518   :  { %v483_v58 = vmul.f32 1.442695, %v482_v55 }
 0x51a   :  { %2745 = vpow2.f32 %v483_v58 }
 0x520   :  { %v3413_v59 = vpop.eup %2745 }
 0x521   :  { %v485_v62 = vsel %vm262_vm4, %v3413_v59, 0.0 }
 0x522   :  { %486 = vadd.xlane.f32.xlu0 %v485_v62 }
 0x536   :  { %558 = vrot.lane.b32.xlu0 %v3393_v10, %s3074_s15 }
 0x595   :  { %v487_v41 = vpop.xlane.xlu0 %486 }
 0x596   :  { %2747 = vrcp.f32 %v487_v41  ;;  %v499_v45 = vand.u32 2147483648, %v487_v41  ;;  %v497_v47 = vand.u32 2147483647, %v487_v41  ;;  %vm493_vm15 = vweird.f32 %v487_v41 }
 0x598   :  { %v500_v49 = vor.u32 1.1754944e-38, %v499_v45  ;;  %vm498_vm6 = vcmp.eq.f32.partialorder %v497_v47, 8.507059e+37 }
 0x59c   :  { %v2748_v42 = vpop.eup %2747 }
 0x59d   :  { %v489_v43 = vmul.f32 %v2748_v42, %v487_v41  ;;  %vm494_vm14 = vweird.f32 %v2748_v42 }
 0x59e   :  { %vm495_vm1 = vmor %vm493_vm15, %vm494_vm14 }
 0x59f   :  { %v490_v44 = vsub.f32 1.0, %v489_v43 }
 0x5a1   :  { %v491_v46 = vmul.f32 %v2748_v42, %v490_v44 }
 0x5a3   :  { %v492_v48 = vadd.f32 %v2748_v42, %v491_v46 }
 0x5a5   :  { %v496_v50 = vsel %vm495_vm1, %v2748_v42, %v492_v48 }
 0x5a6   :  { %v501_v51 = vsel %vm498_vm6, %v500_v49, %v496_v50 }
 0x5a7   :  { %v502_v54 = vmul.f32 %v3413_v59, %v501_v51 }
 0x5a8   :  { %v559_v56 = vpop.permute.xlu0 %558 }
 0x5a9   :  { %2656 = vmatmul.msk.f32.vlgmr.msrb.gmra.mxu2 %vm320_vm5, %v559_v56  ;;  %2657 = vmatmul.msk.f32.vlgmr.msrb.gmra.mxu3 %vm320_vm5, %v559_v56  ;;  %v510_v18 = vperm.slane %v502_v54, 1  ;;  %v503_v57 = vperm.slane %v502_v54, 0 }
 0x5aa   :  { %895 = vmatpush.msrb.mxu3 %v3299_v0  ;;  %874 = vmatpush.msrb.mxu2 %v3328_v21 }
 0x5ab   :  { %515 = vperm.xlu1 %2725, %v510_v18   ;;  %508 = vperm.xlu2 %2724, %v503_v57  }
 0x5ac   :  { %896 = vmatpush.msrb.mxu3 %v3304_v1  ;;  %875 = vmatpush.msrb.mxu2 %v3334_v22 }
 0x5ae   :  { %897 = vmatpush.msrb.mxu3 %v3310_v5  ;;  %876 = vmatpush.msrb.mxu2 %v3340_v23  ;;  %v3554_v23 = vld [vmem:[#allocation7 + $0x1] ss:$0 sm:$0xff] }
 0x5b0   :  { %898 = vmatpush.msrb.mxu3 %v3316_v6  ;;  %877 = vmatpush.msrb.mxu2 %v3351_v25 }
 0x605   :  { %v509_v35 = vpop.permute.xlu2 %508 }
 0x606   :  { %v517_v36 = vmul.f32 %v509_v35, %v3167_v2 }
 0x608   :  { %v519_v37 = vsel %vm198_vm0, %v517_v36, 0.0 }
 0x609   :  { %v520_v38 = vrot.slane %v519_v37, 4 }
 0x60b   :  { %v521_v39 = vadd.f32 %v520_v38, %v519_v37 }
 0x60d   :  { %v522_v53 = vrot.slane %v521_v39, 2 }
 0x60f   :  { %v523_v21 = vadd.f32 %v522_v53, %v521_v39 }
 0x611   :  { %v524_v62 = vrot.slane %v523_v21, 1 }
 0x613   :  { %v525_v42 = vadd.f32 %v524_v62, %v523_v21  ;;  %v3570_v62 = vld [vmem:[#allocation9 + $0x18] sm:$0xff] }
 0x614   :  { %668 = vmatpush.msra.mxu1 %v3570_v62 }
 0x61d   :  { %v516_v40 = vpop.permute.xlu1 %515 }
 0x61e   :  { %v518_v52 = vmul.f32 %v516_v40, %v3172_v3  ;;  %v3565_v3 = vld [vmem:[#allocation6 + $0x1] ss:$0 sm:$0xff] }
 0x620   :  { %v526_v55 = vsel %vm198_vm0, %v518_v52, 0.0 }
 0x621   :  { %v527_v58 = vrot.slane %v526_v55, 4 }
 0x623   :  { %v528_v59 = vadd.f32 %v527_v58, %v526_v55 }
 0x625   :  { %v529_v2 = vrot.slane %v528_v59, 2 }
 0x627   :  { %v530_v22 = vadd.f32 %v529_v2, %v528_v59 }
 0x629   :  { %v531_v41 = vrot.slane %v530_v22, 1 }
 0x62b   :  { %v532_v43 = vadd.f32 %v531_v41, %v530_v22  ;;  %v3572_v22 = vld [vmem:[#allocation9 + $0x10] sm:$0xff]  ;;  %v3575_v41 = vld [vmem:[#allocation9 + $0x8] sm:$0xff] }
 0x62c   :  { %v606_v25 = vpop.f32.mrf.mxu3  ;;  %v579_v46 = vpop.f32.mrf.mxu2  ;;  %669 = vmatpush.msra.mxu1 %v3572_v22 }
 0x62d   :  { %v607_v44 = vadd.f32 %v3554_v23, %v606_v25  ;;  %v535_v45 = vsel %vm258_vm2, %v532_v43, %v525_v42  ;;  %v3578_v42 = vld [vmem:[#allocation9] sm:$0xff] }
 0x62e   :  { %2655 = vmatmul.msk.f32.vlgmr.msrb.gmra.mxu1 %vm320_vm5, %v535_v45  ;;  %2660 = vmatmul.msk.f32.vlgmr.msra.gmra.mxu2 %vm320_vm5, %v535_v45 }
 0x62f   :  { %630 = vrot.lane.b32.xlu2 %v607_v44, %s3073_s14  ;;  %1068 = vmatpush.msra.mxu2 %v3422_v63 }
 0x630   :  { %670 = vmatpush.msra.mxu1 %v3575_v41 }
 0x631   :  { %1069 = vmatpush.msra.mxu2 %v3434_v7 }
 0x632   :  { %671 = vmatpush.msra.mxu1 %v3578_v42 }
 0x633   :  { %1070 = vmatpush.msra.mxu2 %v3444_v11 }
 0x634   :  { %851 = vmatpush.msrb.mxu1 %v3346_v24 }
 0x635   :  { %1071 = vmatpush.msra.mxu2 %v3457_v15 }
 0x636   :  { %852 = vmatpush.msrb.mxu1 %v3359_v27 }
 0x638   :  { %853 = vmatpush.msrb.mxu1 %v3365_v28 }
 0x63a   :  { %854 = vmatpush.msrb.mxu1 %v3370_v29 }
 0x689   :  { %v631_v53 = vpop.permute.xlu2 %630 }
 0x6ab   :  { %v555_v47 = vpop.f32.mrf.mxu1 }
 0x6ac   :  { %v580_v48 = vadd.f32 %v579_v46, %v555_v47 }
 0x6ae   :  { %v585_v49 = vadd.f32 %v3565_v3, %v580_v48 }
 0x6b0   :  { %v609_v50 = vadd.f32 %v607_v44, %v585_v49 }
 0x6b2   :  { %v2658_v51 = vmul.f32 -1.442695, %v609_v50  ;;  %v3609_v50 = vld [vmem:[%s4365_s10] ss:$0 sm:$0xff] }
 0x6b4   :  { %2749 = vpow2.f32 %v2658_v51 }
 0x6ba   :  { %v2750_v54 = vpop.eup %2749 }
 0x6bb   :  { %v613_v56 = vadd.f32 1.0, %v2750_v54 }
 0x6bd   :  { %2751 = vrcp.f32 %v613_v56  ;;  %v625_v36 = vand.u32 2147483648, %v613_v56  ;;  %v623_v38 = vand.u32 2147483647, %v613_v56  ;;  %vm619_vm8 = vweird.f32 %v613_v56 }
 0x6bf   :  { %v626_v40 = vor.u32 1.1754944e-38, %v625_v36  ;;  %vm624_vm10 = vcmp.eq.f32.partialorder %v623_v38, 8.507059e+37 }
 0x6c3   :  { %v2752_v18 = vpop.eup %2751 }
 0x6c4   :  { %v615_v57 = vmul.f32 %v2752_v18, %v613_v56  ;;  %vm620_vm7 = vweird.f32 %v2752_v18  ;;  %v3615_v56 = vld [vmem:[%s4367_s12] ss:$0 sm:$0xff] }
 0x6c5   :  { %vm621_vm9 = vmor %vm619_vm8, %vm620_vm7 }
 0x6c6   :  { %v616_v35 = vsub.f32 1.0, %v615_v57 }
 0x6c8   :  { %v617_v37 = vmul.f32 %v2752_v18, %v616_v35 }
 0x6ca   :  { %v618_v39 = vadd.f32 %v2752_v18, %v617_v37 }
 0x6cc   :  { %v622_v52 = vsel %vm621_vm9, %v2752_v18, %v618_v39  ;;  %v693_v18 = vpop.f32.mrf.mxu2 }
 0x6cd   :  { %v627_v55 = vsel %vm624_vm10, %v626_v40, %v622_v52 }
 0x6ce   :  { %v633_v58 = vmul.f32 %v631_v53, %v627_v55  ;;  %v640_v43 = vsub.f32 1.0, %v627_v55  ;;  %v646_v44 = vmul.f32 %v627_v55, %v3393_v10 }
 0x6d0   :  { %635 = vrot.lane.b32.xlu0 %v633_v58, %s3073_s14 }
 0x742   :  { %v636_v21 = vpop.permute.xlu0 %635 }
 0x743   :  { %v638_v59 = vadd.f32 %v636_v21, %v585_v49 }
 0x745   :  { %2753 = vtanh.f32 %v638_v59 }
 0x74b   :  { %v2754_v2 = vpop.eup %2753 }
 0x74c   :  { %642 = vrot.lane.b32.xlu1 %v2754_v2, %s3074_s15 }
 0x7be   :  { %v643_v25 = vpop.permute.xlu1 %642 }
 0x7bf   :  { %v645_v45 = vmul.f32 %v643_v25, %v640_v43 }
 0x7c1   :  { %v3587_v46 = vadd.f32 %v646_v44, %v645_v45 }
 0x7c3   :  { %652 = vrot.lane.b32.xlu2 %v3587_v46, %s3074_s15  ;;  %v751_v47 = vperm.slane %v3587_v46, 0  ;;  %v750_v24 = vrot.slane %v3587_v46, 1 }
 0x7c5   :  { %v755_v27 = vmul.f32 %v751_v47, %v3399_v16  ;;  %v752_v48 = vperm.slane %v750_v24, 0 }
 0x7c7   :  { %759 = vrot.lane.b32.xlu1 %v755_v27, %s3074_s15  ;;  %v756_v28 = vmul.f32 %v752_v48, %v3396_v12 }
 0x7cb   :  { %761 = vrot.lane.b32.xlu2 %v756_v28, %s3074_s15 }
 0x81d   :  { %v3597_v29 = vpop.permute.xlu2 %652 }
 0x81e   :  { %2659 = vmatmul.msk.f32.vlgmr.msra.gmra.mxu1 %vm320_vm5, %v3597_v29 }
 0x81f   :  { %1044 = vmatpush.msra.mxu1 %v3513_v60 }
 0x821   :  { %1045 = vmatpush.msra.mxu1 %v3522_v19 }
 0x823   :  { %1046 = vmatpush.msra.mxu1 %v3531_v26 }
 0x825   :  { %1047 = vmatpush.msra.mxu1 %v3540_v32  ;;  %v762_v38 = vpop.permute.xlu2 %761 }
 0x826   :  { %v768_v39 = vsel %vm198_vm0, %v762_v38, 0.0 }
 0x839   :  { %v760_v10 = vpop.permute.xlu1 %759 }
 0x83a   :  { %v765_v49 = vsel %vm198_vm0, %v760_v10, 0.0 }
 0x83b   :  { %766 = vadd.xlane.f32.xlu2 %v765_v49 }
 0x89b   :  { %v673_v51 = vpop.f32.mrf.mxu1 }
 0x89c   :  { %v674_v54 = vadd.f32 %v3609_v50, %v673_v51 }
 0x89e   :  { %v696_v57 = vadd.f32 %v693_v18, %v674_v54 }
 0x8a0   :  { %v700_v35 = vadd.f32 %v3615_v56, %v696_v57 }
 0x8a2   :  { %v702_v36 = vrot.slane %v700_v35, 1  ;;  %704 = vst [vmem:[%s4368_s13] sm:$0x1] %v700_v35  ;;  %v707_v37 = vsel %vm706_vm11, %v700_v35, -inf }
 0x8a3   :  { %708 = vmax.xlane.f32.xlu0 %v707_v37 }
 0x8a4   :  { %705 = vst [vmem:[%s4368_s13 + $0x8] sm:$0x1] %v702_v36 }
 0x8ab   :  { %769 = vadd.xlane.f32.xlu0 %v768_v39 }
 0x8ae   :  { %v767_v55 = vpop.xlane.xlu2 %766 }
 0x8af   :  { %v771_v59 = vmul.f32 0.17677669, %v767_v55 }
 0x8b1   :  { %v775_v25 = vperm.slane %v771_v59, %v3188_v31 }
 0x916   :  { %v709_v40 = vpop.xlane.xlu0 %708 }
 0x917   :  { %vm710_vm12 = vcmp.eq.f32.partialorder %v700_v35, %v709_v40  ;;  %v4369_v40 = vmov 1.0  }
 0x918   :  { %v711_v52 = vsel %vm710_vm12, %v3188_v31, 128 }
 0x919   :  { %v712_v53 = vsel %vm706_vm11, %v711_v52, 2147483647 }
 0x91a   :  { %v714_v58 = vshra.s32 %v712_v53, 16  ;;  %v713_v27 = vand.u32 65535, %v712_v53 }
 0x91c   :  { %v716_v21 = vcvt.s32.f32 %v714_v58  ;;  %v715_v28 = vcvt.s32.f32 %v713_v27 }
 0x91e   :  { %717 = vmin.xlane.f32.xlu1 %v716_v21  ;;  %v770_v2 = vpop.xlane.xlu0 %769 }
 0x91f   :  { %v772_v43 = vmul.f32 0.17677669, %v770_v2 }
 0x921   :  { %v776_v44 = vperm.slane %v772_v43, %v3188_v31 }
 0x923   :  { %v777_v45 = vsel %vm258_vm2, %v776_v44, %v775_v25 }
 0x924   :  { %v779_v47 = vsel %vm253_vm3, -1e+30, %v777_v45  ;;  %v3657_v45 = vld [vmem:[%s4357_s2 + $0x8] sm:$0x3f] }
 0x925   :  { %v780_v24 = vsel %vm262_vm4, %v779_v47, -inf }
 0x926   :  { %781 = vmax.xlane.f32.xlu1 %v780_v24 }
 0x991   :  { %v718_v48 = vpop.xlane.xlu1 %717 }
 0x992   :  { %vm719_vm13 = vcmp.eq.f32.partialorder %v716_v21, %v718_v48  ;;  %v724_v35 = vcvt.f32.s32 %v718_v48 }
 0x993   :  { %v720_v10 = vsel %vm719_vm13, %v715_v28, inf }
 0x994   :  { %721 = vmin.xlane.f32.xlu0 %v720_v10  ;;  %v725_v37 = vshll.u32 %v724_v35, 16 }
 0x999   :  { %v782_v49 = vpop.xlane.xlu1 %781 }
 0x99a   :  { %v783_v51 = vsub.f32 %v779_v47, %v782_v49 }
 0x99c   :  { %v784_v54 = vmul.f32 1.442695, %v783_v51 }
 0x99e   :  { %2755 = vpow2.f32 %v784_v54 }
 0x9a4   :  { %v2756_v18 = vpop.eup %2755 }
 0x9a5   :  { %v786_v57 = vsel %vm262_vm4, %v2756_v18, 0.0 }
 0x9a6   :  { %787 = vadd.xlane.f32.xlu2 %v786_v57 }
 0xa07   :  { %v722_v36 = vpop.xlane.xlu0 %721 }
 0xa08   :  { %v723_v38 = vcvt.f32.s32 %v722_v36 }
 0xa0a   :  { %v726_v39 = vadd.s32 %v725_v37, %v723_v38 }
 0xa0c   :  { %vm727_vm14 = vcmp.eq.s32.totalorder %v3188_v31, %v726_v39 }
 0xa0d   :  { %2662 = vmatmul.msk.f32.vlgmr.msra.gmra.mxu3 %vm727_vm14, %v4369_v40 }
 0xa0e   :  { %1376 = vmatpush.msra.mxu3 %v3299_v0 }
 0xa10   :  { %1377 = vmatpush.msra.mxu3 %v3304_v1 }
 0xa12   :  { %1378 = vmatpush.msra.mxu3 %v3310_v5 }
 0xa14   :  { %1379 = vmatpush.msra.mxu3 %v3316_v6 }
 0xa15   :  { %2665 = vmatmul.msk.f32.vlgmr.msrb.gmra.mxu3 %vm320_vm5, %v3597_v29 }
 0xa16   :  { %1570 = vmatpush.msrb.mxu3 %v3427_v4 }
 0xa18   :  { %1571 = vmatpush.msrb.mxu3 %v3439_v9 }
 0xa19   :  { %v788_v52 = vpop.xlane.xlu2 %787 }
 0xa1a   :  { %2757 = vrcp.f32 %v788_v52  ;;  %1572 = vmatpush.msrb.mxu3 %v3452_v14  ;;  %v800_v55 = vand.u32 2147483648, %v788_v52  ;;  %v798_v6 = vand.u32 2147483647, %v788_v52  ;;  %vm794_vm1 = vweird.f32 %v788_v52 }
 0xa1c   :  { %1573 = vmatpush.msrb.mxu3 %v3462_v17  ;;  %v801_v29 = vor.u32 1.1754944e-38, %v800_v55  ;;  %vm799_vm7 = vcmp.eq.f32.partialorder %v798_v6, 8.507059e+37 }
 0xa20   :  { %v2758_v0 = vpop.eup %2757 }
 0xa21   :  { %v790_v53 = vmul.f32 %v2758_v0, %v788_v52  ;;  %vm795_vm15 = vweird.f32 %v2758_v0 }
 0xa22   :  { %vm796_vm6 = vmor %vm794_vm1, %vm795_vm15 }
 0xa23   :  { %v791_v1 = vsub.f32 1.0, %v790_v53 }
 0xa25   :  { %v792_v5 = vmul.f32 %v2758_v0, %v791_v1 }
 0xa27   :  { %v793_v58 = vadd.f32 %v2758_v0, %v792_v5 }
 0xa29   :  { %v797_v4 = vsel %vm796_vm6, %v2758_v0, %v793_v58 }
 0xa2a   :  { %v802_v9 = vsel %vm799_vm7, %v801_v29, %v797_v4 }
 0xa2b   :  { %v803_v21 = vmul.f32 %v2756_v18, %v802_v9 }
 0xa2d   :  { %v811_v59 = vperm.slane %v803_v21, 1  ;;  %v804_v2 = vperm.slane %v803_v21, 0 }
 0xa2f   :  { %816 = vperm.xlu1 %2725, %v811_v59   ;;  %809 = vperm.xlu0 %2726, %v804_v2  }
 0xa90   :  { %v747_v14 = vpop.f32.mrf.mxu3 }
 0xa91   :  { %2664 = vmatmul.msk.f32.vlgmr.msrb.gmra.mxu2 %vm320_vm5, %v747_v14 }
 0xa92   :  { %1173 = vmatpush.msrb.mxu2 %v3515_v61 }
 0xa94   :  { %1174 = vmatpush.msrb.mxu2 %v3524_v20  ;;  %v3663_v20 = vld [vmem:[%s4357_s2] sm:$0x3f] }
 0xa96   :  { %1175 = vmatpush.msrb.mxu2 %v3533_v30 }
 0xa98   :  { %v900_v17 = vpop.f32.mrf.mxu3  ;;  %1176 = vmatpush.msrb.mxu2 %v3542_v33 }
 0xa99   :  { %v901_v43 = vadd.f32 %v3378_v8, %v900_v17 }
 0xa9b   :  { %924 = vrot.lane.b32.xlu2 %v901_v43, %s3073_s14 }
 0xaa1   :  { %v817_v25 = vpop.permute.xlu1 %816  ;;  %v810_v44 = vpop.permute.xlu0 %809 }
 0xaa2   :  { %v819_v61 = vmul.f32 %v3657_v45, %v817_v25  ;;  %v818_v47 = vmul.f32 %v3663_v20, %v810_v44 }
 0xaa4   :  { %v827_v8 = vsel %vm198_vm0, %v819_v61, 0.0  ;;  %v820_v24 = vsel %vm198_vm0, %v818_v47, 0.0 }
 0xaa5   :  { %v828_v27 = vrot.slane %v827_v8, 4  ;;  %v821_v48 = vrot.slane %v820_v24, 4 }
 0xaa7   :  { %v829_v28 = vadd.f32 %v828_v27, %v827_v8  ;;  %v822_v10 = vadd.f32 %v821_v48, %v820_v24 }
 0xaa9   :  { %v830_v49 = vrot.slane %v829_v28, 2  ;;  %v823_v51 = vrot.slane %v822_v10, 2 }
 0xaab   :  { %v831_v54 = vadd.f32 %v830_v49, %v829_v28  ;;  %v824_v18 = vadd.f32 %v823_v51, %v822_v10 }
 0xaad   :  { %v832_v57 = vrot.slane %v831_v54, 1  ;;  %v825_v35 = vrot.slane %v824_v18, 1 }
 0xaaf   :  { %v833_v36 = vadd.f32 %v832_v57, %v831_v54  ;;  %v826_v37 = vadd.f32 %v825_v35, %v824_v18 }
 0xab1   :  { %v836_v38 = vsel %vm258_vm2, %v833_v36, %v826_v37 }
 0xab2   :  { %2663 = vmatmul.msk.f32.vlgmr.msrb.gmra.mxu1 %vm320_vm5, %v836_v38 }
 0xab3   :  { %1153 = vmatpush.msrb.mxu1 %v3570_v62 }
 0xab5   :  { %1154 = vmatpush.msrb.mxu1 %v3572_v22 }
 0xab7   :  { %1155 = vmatpush.msrb.mxu1 %v3575_v41 }
 0xab9   :  { %1156 = vmatpush.msrb.mxu1 %v3578_v42 }
 0xb14   :  { %v879_v39 = vpop.f32.mrf.mxu2 }
 0xb2f   :  { %v856_v52 = vpop.f32.mrf.mxu1 }
 0xb30   :  { %v880_v0 = vadd.f32 %v879_v39, %v856_v52 }
 0xb32   :  { %v882_v53 = vadd.f32 %v3386_v13, %v880_v0  ;;  %v925_v13 = vpop.permute.xlu2 %924 }
 0xb34   :  { %v903_v1 = vadd.f32 %v901_v43, %v882_v53 }
 0xb36   :  { %v2666_v55 = vmul.f32 -1.442695, %v903_v1 }
 0xb38   :  { %2759 = vpow2.f32 %v2666_v55 }
 0xb3e   :  { %v2760_v5 = vpop.eup %2759 }
 0xb3f   :  { %v907_v6 = vadd.f32 1.0, %v2760_v5 }
 0xb41   :  { %2761 = vrcp.f32 %v907_v6  ;;  %v919_v9 = vand.u32 2147483648, %v907_v6  ;;  %v917_v59 = vand.u32 2147483647, %v907_v6  ;;  %vm913_vm9 = vweird.f32 %v907_v6 }
 0xb43   :  { %v920_v14 = vor.u32 1.1754944e-38, %v919_v9  ;;  %vm918_vm12 = vcmp.eq.f32.partialorder %v917_v59, 8.507059e+37 }
 0xb47   :  { %v2762_v58 = vpop.eup %2761 }
 0xb48   :  { %v909_v29 = vmul.f32 %v2762_v58, %v907_v6  ;;  %vm914_vm8 = vweird.f32 %v2762_v58 }
 0xb49   :  { %vm915_vm10 = vmor %vm913_vm9, %vm914_vm8 }
 0xb4a   :  { %v910_v4 = vsub.f32 1.0, %v909_v29 }
 0xb4c   :  { %v911_v21 = vmul.f32 %v2762_v58, %v910_v4 }
 0xb4e   :  { %v912_v2 = vadd.f32 %v2762_v58, %v911_v21 }
 0xb50   :  { %v916_v17 = vsel %vm915_vm10, %v2762_v58, %v912_v2 }
 0xb51   :  { %v921_v43 = vsel %vm918_vm12, %v920_v14, %v916_v17 }
 0xb52   :  { %v927_v25 = vmul.f32 %v925_v13, %v921_v43  ;;  %v934_v8 = vsub.f32 1.0, %v921_v43  ;;  %v940_v27 = vmul.f32 %v921_v43, %v3587_v46 }
 0xb54   :  { %929 = vrot.lane.b32.xlu1 %v927_v25, %s3073_s14 }
 0xbc6   :  { %v930_v44 = vpop.permute.xlu1 %929 }
 0xbc7   :  { %v932_v61 = vadd.f32 %v930_v44, %v882_v53 }
 0xbc9   :  { %2763 = vtanh.f32 %v932_v61 }
 0xbcf   :  { %v2764_v47 = vpop.eup %2763 }
 0xbd0   :  { %936 = vrot.lane.b32.xlu2 %v2764_v47, %s3074_s15 }
 0xc2a   :  { %v937_v24 = vpop.permute.xlu2 %936 }
 0xc2b   :  { %v939_v48 = vmul.f32 %v937_v24, %v934_v8 }
 0xc2d   :  { %v3678_v28 = vadd.f32 %v940_v27, %v939_v48 }
 0xc2f   :  { %v944_v10 = vperm.slane %v3678_v28, 0  ;;  %v943_v49 = vrot.slane %v3678_v28, 1 }
 0xc31   :  { %v948_v51 = vmul.f32 %v944_v10, %v3399_v16  ;;  %v945_v54 = vperm.slane %v943_v49, 0  ;;  %v3702_v10 = vld [vmem:[%s4359_s4 + $0x18] sm:$0xff] }
 0xc32   :  { %v3708_v49 = vld [vmem:[%s4361_s6 + $0x18] sm:$0xff] }
 0xc33   :  { %952 = vrot.lane.b32.xlu1 %v948_v51, %s3074_s15  ;;  %v949_v18 = vmul.f32 %v945_v54, %v3396_v12  ;;  %v3714_v51 = vld [vmem:[%s4359_s4 + $0x10] sm:$0xff] }
 0xc34   :  { %v3720_v54 = vld [vmem:[%s4361_s6 + $0x10] sm:$0xff] }
 0xc35   :  { %954 = vrot.lane.b32.xlu2 %v949_v18, %s3074_s15  ;;  %v3726_v18 = vld [vmem:[%s4359_s4 + $0x8] sm:$0xff] }
 0xc8f   :  { %v955_v57 = vpop.permute.xlu2 %954 }
 0xc90   :  { %v961_v35 = vsel %vm198_vm0, %v955_v57, 0.0  ;;  %v3732_v57 = vld [vmem:[%s4361_s6 + $0x8] sm:$0xff] }
 0xc91   :  { %962 = vadd.xlane.f32.xlu1 %v961_v35  ;;  %v3738_v35 = vld [vmem:[%s4359_s4] sm:$0xff] }
 0xca5   :  { %v953_v46 = vpop.permute.xlu1 %952 }
 0xca6   :  { %v958_v36 = vsel %vm198_vm0, %v953_v46, 0.0  ;;  %v3744_v46 = vld [vmem:[%s4361_s6] sm:$0xff] }
 0xca7   :  { %959 = vadd.xlane.f32.xlu0 %v958_v36 }
 0xd04   :  { %v963_v37 = vpop.xlane.xlu1 %962 }
 0xd05   :  { %v965_v38 = vmul.f32 0.17677669, %v963_v37 }
 0xd07   :  { %v969_v0 = vperm.slane %v965_v38, %v3188_v31 }
 0xd1a   :  { %v960_v39 = vpop.xlane.xlu0 %959 }
 0xd1b   :  { %v964_v52 = vmul.f32 0.17677669, %v960_v39 }
 0xd1d   :  { %v968_v53 = vperm.slane %v964_v52, %v3188_v31 }
 0xd1f   :  { %v970_v1 = vsel %vm258_vm2, %v969_v0, %v968_v53 }
 0xd20   :  { %v972_v55 = vsel %vm253_vm3, -1e+30, %v970_v1 }
 0xd21   :  { %v973_v5 = vsel %vm262_vm4, %v972_v55, -inf }
 0xd22   :  { %974 = vmax.xlane.f32.xlu2 %v973_v5 }
 0xd95   :  { %v975_v6 = vpop.xlane.xlu2 %974 }
 0xd96   :  { %v976_v58 = vsub.f32 %v972_v55, %v975_v6 }
 0xd98   :  { %v977_v29 = vmul.f32 1.442695, %v976_v58 }
 0xd9a   :  { %2765 = vpow2.f32 %v977_v29 }
 0xda0   :  { %v2766_v4 = vpop.eup %2765 }
 0xda1   :  { %v979_v9 = vsel %vm262_vm4, %v2766_v4, 0.0 }
 0xda2   :  { %980 = vadd.xlane.f32.xlu0 %v979_v9 }
 0xdb6   :  { %1052 = vrot.lane.b32.xlu0 %v3678_v28, %s3074_s15 }
 0xe15   :  { %v981_v21 = vpop.xlane.xlu0 %980 }
 0xe16   :  { %2767 = vrcp.f32 %v981_v21  ;;  %v993_v17 = vand.u32 2147483648, %v981_v21  ;;  %v991_v43 = vand.u32 2147483647, %v981_v21  ;;  %vm987_vm14 = vweird.f32 %v981_v21 }
 0xe18   :  { %v994_v44 = vor.u32 1.1754944e-38, %v993_v17  ;;  %vm992_vm1 = vcmp.eq.f32.partialorder %v991_v43, 8.507059e+37  ;;  %v3759_v43 = vld [vmem:[%s4360_s5 + $0x18] sm:$0xff] }
 0xe1c   :  { %v2768_v59 = vpop.eup %2767 }
 0xe1d   :  { %v983_v2 = vmul.f32 %v2768_v59, %v981_v21  ;;  %vm988_vm13 = vweird.f32 %v2768_v59 }
 0xe1e   :  { %vm989_vm15 = vmor %vm987_vm14, %vm988_vm13 }
 0xe1f   :  { %v984_v14 = vsub.f32 1.0, %v983_v2 }
 0xe21   :  { %v985_v13 = vmul.f32 %v2768_v59, %v984_v14 }
 0xe23   :  { %v986_v25 = vadd.f32 %v2768_v59, %v985_v13 }
 0xe25   :  { %v990_v61 = vsel %vm989_vm15, %v2768_v59, %v986_v25  ;;  %v3773_v25 = vld [vmem:[%s4360_s5 + $0x8] sm:$0xff] }
 0xe26   :  { %v995_v47 = vsel %vm992_vm1, %v994_v44, %v990_v61 }
 0xe27   :  { %v996_v8 = vmul.f32 %v2766_v4, %v995_v47 }
 0xe28   :  { %v1053_v24 = vpop.permute.xlu0 %1052 }
 0xe29   :  { %2668 = vmatmul.msk.f32.vlgmr.msra.gmra.mxu2 %vm320_vm5, %v1053_v24  ;;  %2669 = vmatmul.msk.f32.vlgmr.msrb.gmra.mxu0 %vm320_vm5, %v1053_v24  ;;  %v1004_v27 = vperm.slane %v996_v8, 1  ;;  %v997_v48 = vperm.slane %v996_v8, 0 }
 0xe2a   :  { %1355 = vmatpush.msra.mxu2 %v3702_v10  ;;  %1857 = vmatpush.msrb.mxu0 %v3708_v49 }
 0xe2b   :  { %1009 = vperm.xlu2 %2724, %v1004_v27   ;;  %1002 = vperm.xlu1 %2725, %v997_v48  }
 0xe2c   :  { %1356 = vmatpush.msra.mxu2 %v3714_v51  ;;  %1858 = vmatpush.msrb.mxu0 %v3720_v54 }
 0xe2e   :  { %1357 = vmatpush.msra.mxu2 %v3726_v18  ;;  %1859 = vmatpush.msrb.mxu0 %v3732_v57 }
 0xe30   :  { %1358 = vmatpush.msra.mxu2 %v3738_v35  ;;  %1860 = vmatpush.msrb.mxu0 %v3744_v46 }
 0xe85   :  { %v1010_v36 = vpop.permute.xlu2 %1009 }
 0xe86   :  { %v1012_v37 = vmul.f32 %v3657_v45, %v1010_v36 }
 0xe88   :  { %v1020_v38 = vsel %vm198_vm0, %v1012_v37, 0.0 }
 0xe89   :  { %v1021_v39 = vrot.slane %v1020_v38, 4 }
 0xe8b   :  { %v1022_v52 = vadd.f32 %v1021_v39, %v1020_v38 }
 0xe8d   :  { %v1023_v1 = vrot.slane %v1022_v52, 2 }
 0xe8f   :  { %v1024_v6 = vadd.f32 %v1023_v1, %v1022_v52 }
 0xe91   :  { %v1025_v9 = vrot.slane %v1024_v6, 1 }
 0xe93   :  { %v1026_v14 = vadd.f32 %v1025_v9, %v1024_v6 }
 0xe9d   :  { %v1003_v0 = vpop.permute.xlu1 %1002 }
 0xe9e   :  { %v1011_v53 = vmul.f32 %v3663_v20, %v1003_v0 }
 0xea0   :  { %v1013_v55 = vsel %vm198_vm0, %v1011_v53, 0.0 }
 0xea1   :  { %v1014_v5 = vrot.slane %v1013_v55, 4 }
 0xea3   :  { %v1015_v58 = vadd.f32 %v1014_v5, %v1013_v55 }
 0xea5   :  { %v1016_v29 = vrot.slane %v1015_v58, 2 }
 0xea6   :  { %v1094_v4 = vpop.f32.mrf.mxu0 }
 0xea7   :  { %v1017_v21 = vadd.f32 %v1016_v29, %v1015_v58  ;;  %v1095_v59 = vadd.f32 %v3554_v23, %v1094_v4  ;;  %v3766_v23 = vld [vmem:[%s4360_s5 + $0x10] sm:$0xff] }
 0xea9   :  { %v1018_v2 = vrot.slane %v1017_v21, 1  ;;  %1118 = vrot.lane.b32.xlu0 %v1095_v59, %s3073_s14 }
 0xeab   :  { %v1019_v17 = vadd.f32 %v1018_v2, %v1017_v21 }
 0xeac   :  { %v1073_v44 = vpop.f32.mrf.mxu2 }
 0xead   :  { %v1029_v13 = vsel %vm258_vm2, %v1026_v14, %v1019_v17 }
 0xeae   :  { %2667 = vmatmul.msk.f32.vlgmr.msra.gmra.mxu1 %vm320_vm5, %v1029_v13  ;;  %2672 = vmatmul.msk.f32.vlgmr.msrb.gmra.mxu2 %vm320_vm5, %v1029_v13 }
 0xeaf   :  { %1332 = vmatpush.msra.mxu1 %v3759_v43  ;;  %1549 = vmatpush.msrb.mxu2 %v3422_v63  ;;  %v3780_v63 = vld [vmem:[%s4360_s5] sm:$0xff] }
 0xeb1   :  { %1333 = vmatpush.msra.mxu1 %v3766_v23  ;;  %1550 = vmatpush.msrb.mxu2 %v3434_v7 }
 0xeb3   :  { %1334 = vmatpush.msra.mxu1 %v3773_v25  ;;  %1551 = vmatpush.msrb.mxu2 %v3444_v11 }
 0xeb5   :  { %1335 = vmatpush.msra.mxu1 %v3780_v63  ;;  %1552 = vmatpush.msrb.mxu2 %v3457_v15 }
 0xf2b   :  { %v1049_v7 = vpop.f32.mrf.mxu1 }
 0xf2c   :  { %v1074_v61 = vadd.f32 %v1073_v44, %v1049_v7 }
 0xf2e   :  { %v1076_v47 = vadd.f32 %v3565_v3, %v1074_v61  ;;  %v1119_v3 = vpop.permute.xlu0 %1118 }
 0xf30   :  { %v1097_v8 = vadd.f32 %v1095_v59, %v1076_v47 }
 0xf32   :  { %v2670_v24 = vmul.f32 -1.442695, %v1097_v8  ;;  %v3812_v8 = vld [vmem:[%s4358_s3 + $0x70] sm:$0xff] }
 0xf34   :  { %2769 = vpow2.f32 %v2670_v24  ;;  %v3838_v24 = vld [vmem:[%s4358_s3 + $0x50] sm:$0xff] }
 0xf3a   :  { %v2770_v27 = vpop.eup %2769 }
 0xf3b   :  { %v1101_v48 = vadd.f32 1.0, %v2770_v27  ;;  %v3850_v27 = vld [vmem:[%s4358_s3 + $0x40] sm:$0xff] }
 0xf3d   :  { %2771 = vrcp.f32 %v1101_v48  ;;  %v1113_v38 = vand.u32 2147483648, %v1101_v48  ;;  %v1111_v52 = vand.u32 2147483647, %v1101_v48  ;;  %vm1107_vm7 = vweird.f32 %v1101_v48 }
 0xf3f   :  { %v1114_v15 = vor.u32 1.1754944e-38, %v1113_v38  ;;  %vm1112_vm9 = vcmp.eq.f32.partialorder %v1111_v52, 8.507059e+37  ;;  %v3880_v38 = vld [vmem:[%s4358_s3 + $0x18] sm:$0xff]  ;;  %v3892_v52 = vld [vmem:[%s4358_s3 + $0x8] sm:$0xff] }
 0xf43   :  { %v2772_v11 = vpop.eup %2771 }
 0xf44   :  { %v1103_v36 = vmul.f32 %v2772_v11, %v1101_v48  ;;  %vm1108_vm6 = vweird.f32 %v2772_v11  ;;  %v3856_v48 = vld [vmem:[%s4358_s3 + $0x38] sm:$0xff] }
 0xf45   :  { %vm1109_vm8 = vmor %vm1107_vm7, %vm1108_vm6 }
 0xf46   :  { %v1104_v37 = vsub.f32 1.0, %v1103_v36  ;;  %v3868_v36 = vld [vmem:[%s4358_s3 + $0x28] sm:$0xff] }
 0xf48   :  { %v1105_v39 = vmul.f32 %v2772_v11, %v1104_v37  ;;  %v3874_v37 = vld [vmem:[%s4358_s3 + $0x20] sm:$0xff] }
 0xf4a   :  { %v1106_v0 = vadd.f32 %v2772_v11, %v1105_v39  ;;  %v3886_v39 = vld [vmem:[%s4358_s3 + $0x10] sm:$0xff] }
 0xf4c   :  { %v1110_v53 = vsel %vm1109_vm8, %v2772_v11, %v1106_v0  ;;  %v3862_v11 = vld [vmem:[%s4358_s3 + $0x30] sm:$0xff]  ;;  %v3898_v0 = vld [vmem:[%s4358_s3] sm:$0xff] }
 0xf4d   :  { %v1115_v1 = vsel %vm1112_vm9, %v1114_v15, %v1110_v53 }
 0xf4e   :  { %v1121_v55 = vmul.f32 %v1119_v3, %v1115_v1  ;;  %v1128_v29 = vsub.f32 1.0, %v1115_v1  ;;  %v1134_v9 = vmul.f32 %v1115_v1, %v3678_v28  ;;  %v1178_v3 = vpop.f32.mrf.mxu2 }
 0xf50   :  { %1123 = vrot.lane.b32.xlu1 %v1121_v55, %s3073_s14 }
 0xfc2   :  { %v1124_v5 = vpop.permute.xlu1 %1123 }
 0xfc3   :  { %v1126_v6 = vadd.f32 %v1124_v5, %v1076_v47  ;;  %v3805_v47 = vld [vmem:[%s4358_s3 + $0x78] sm:$0xff] }
 0xfc5   :  { %2773 = vtanh.f32 %v1126_v6 }
 0xfcb   :  { %v2774_v58 = vpop.eup %2773 }
 0xfcc   :  { %1130 = vrot.lane.b32.xlu2 %v2774_v58, %s3074_s15 }
0x1026   :  { %v1131_v4 = vpop.permute.xlu2 %1130 }
0x1027   :  { %v1133_v21 = vmul.f32 %v1131_v4, %v1128_v29 }
0x1029   :  { %v3788_v59 = vadd.f32 %v1134_v9, %v1133_v21 }
0x102b   :  { %1137 = vrot.lane.b32.xlu0 %v3788_v59, %s3074_s15  ;;  %v1232_v2 = vperm.slane %v3788_v59, 0  ;;  %v1231_v14 = vrot.slane %v3788_v59, 1 }
0x102d   :  { %v1236_v17 = vmul.f32 %v1232_v2, %v3399_v16  ;;  %v1233_v13 = vperm.slane %v1231_v14, 0 }
0x102f   :  { %1240 = vrot.lane.b32.xlu2 %v1236_v17, %s3074_s15  ;;  %v1237_v44 = vmul.f32 %v1233_v13, %v3396_v12 }
0x1033   :  { %1242 = vrot.lane.b32.xlu0 %v1237_v44, %s3074_s15 }
0x1089   :  { %v1241_v28 = vpop.permute.xlu2 %1240 }
0x108a   :  { %v1246_v7 = vsel %vm198_vm0, %v1241_v28, 0.0 }
0x108b   :  { %1247 = vadd.xlane.f32.xlu0 %v1246_v7 }
0x109d   :  { %v1138_v61 = vpop.permute.xlu0 %1137 }
0x109e   :  { %2671 = vmatmul.msk.f32.vlgmr.msrb.gmra.mxu1 %vm320_vm5, %v1138_v61  ;;  %2677 = vmatmul.msk.f32.vlgmr.msra.gmra.mxu3 %vm320_vm5, %v1138_v61 }
0x109f   :  { %1525 = vmatpush.msrb.mxu1 %v3513_v60  ;;  %1692 = vmatpush.msra.mxu3 %v3805_v47  ;;  %v3819_v60 = vld [vmem:[%s4358_s3 + $0x68] sm:$0xff] }
0x10a1   :  { %1526 = vmatpush.msrb.mxu1 %v3522_v19  ;;  %1693 = vmatpush.msra.mxu3 %v3812_v8  ;;  %v3826_v19 = vld [vmem:[%s4358_s3 + $0x60] sm:$0xff] }
0x10a3   :  { %1527 = vmatpush.msrb.mxu1 %v3531_v26  ;;  %1694 = vmatpush.msra.mxu3 %v3819_v60  ;;  %v3832_v26 = vld [vmem:[%s4358_s3 + $0x58] sm:$0xff] }
0x10a5   :  { %1528 = vmatpush.msrb.mxu1 %v3540_v32  ;;  %1695 = vmatpush.msra.mxu3 %v3826_v19  ;;  %v3844_v32 = vld [vmem:[%s4358_s3 + $0x48] sm:$0xff]  ;;  %v1243_v58 = vpop.permute.xlu0 %1242 }
0x10a6   :  { %v1249_v29 = vsel %vm198_vm0, %v1243_v58, 0.0 }
0x10a7   :  { %1696 = vmatpush.msra.mxu3 %v3832_v26 }
0x10a9   :  { %1697 = vmatpush.msra.mxu3 %v3838_v24 }
0x10ab   :  { %1698 = vmatpush.msra.mxu3 %v3844_v32 }
0x10ad   :  { %1699 = vmatpush.msra.mxu3 %v3850_v27 }
0x10af   :  { %1700 = vmatpush.msra.mxu3 %v3856_v48 }
0x10b1   :  { %1701 = vmatpush.msra.mxu3 %v3862_v11 }
0x10b3   :  { %1702 = vmatpush.msra.mxu3 %v3868_v36 }
0x10b5   :  { %1703 = vmatpush.msra.mxu3 %v3874_v37 }
0x10b7   :  { %1704 = vmatpush.msra.mxu3 %v3880_v38 }
0x10b9   :  { %1705 = vmatpush.msra.mxu3 %v3886_v39 }
0x10bb   :  { %1706 = vmatpush.msra.mxu3 %v3892_v52 }
0x10bd   :  { %1707 = vmatpush.msra.mxu3 %v3898_v0 }
0x10fe   :  { %v1248_v9 = vpop.xlane.xlu0 %1247 }
0x10ff   :  { %v1252_v14 = vmul.f32 0.17677669, %v1248_v9  ;;  %v3920_v9 = vld [vmem:[#allocation7] ss:$0 sm:$0xff] }
0x1101   :  { %v1256_v44 = vperm.slane %v1252_v14, %v3188_v31 }
0x111b   :  { %v1158_v15 = vpop.f32.mrf.mxu1 }
0x111c   :  { %v1159_v53 = vadd.f32 %v3609_v50, %v1158_v15 }
0x111e   :  { %v1181_v1 = vadd.f32 %v1178_v3, %v1159_v53 }
0x1120   :  { %v1182_v55 = vadd.f32 %v3615_v56, %v1181_v1 }
0x1122   :  { %v1184_v5 = vrot.slane %v1182_v55, 1  ;;  %1186 = vst [vmem:[%s4368_s13 + $0x1] sm:$0x1] %v1182_v55  ;;  %v1188_v6 = vsel %vm706_vm11, %v1182_v55, -inf }
0x1123   :  { %1189 = vmax.xlane.f32.xlu1 %v1188_v6 }
0x1124   :  { %1187 = vst [vmem:[%s4368_s13 + $0x9] sm:$0x1] %v1184_v5 }
0x112b   :  { %1250 = vadd.xlane.f32.xlu1 %v1249_v29 }
0x1196   :  { %v1190_v50 = vpop.xlane.xlu1 %1189 }
0x1197   :  { %vm1191_vm10 = vcmp.eq.f32.partialorder %v1182_v55, %v1190_v50 }
0x1198   :  { %v1192_v56 = vsel %vm1191_vm10, %v3188_v31, 128 }
0x1199   :  { %v1193_v4 = vsel %vm706_vm11, %v1192_v56, 2147483647  ;;  %v1381_v56 = vpop.f32.mrf.mxu3 }
0x119a   :  { %v1195_v21 = vshra.s32 %v1193_v4, 16  ;;  %v1194_v53 = vand.u32 65535, %v1193_v4 }
0x119c   :  { %v1197_v2 = vcvt.s32.f32 %v1195_v21  ;;  %v1196_v1 = vcvt.s32.f32 %v1194_v53  ;;  %v3923_v21 = vadd.f32 %v3920_v9, %v1381_v56 }
0x119e   :  { %1198 = vmin.xlane.f32.xlu2 %v1197_v2  ;;  %v1251_v17 = vpop.xlane.xlu1 %1250 }
0x119f   :  { %v1253_v13 = vmul.f32 0.17677669, %v1251_v17 }
0x11a1   :  { %v1257_v28 = vperm.slane %v1253_v13, %v3188_v31 }
0x11a3   :  { %v1258_v7 = vsel %vm258_vm2, %v1257_v28, %v1256_v44  ;;  %v3932_v44 = vld [vmem:[%s4361_s6 + $0x38] sm:$0xff]  ;;  %v3938_v28 = vld [vmem:[%s4361_s6 + $0x30] sm:$0xff] }
0x11a4   :  { %v1260_v61 = vsel %vm253_vm3, -1e+30, %v1258_v7  ;;  %v3944_v7 = vld [vmem:[%s4361_s6 + $0x28] sm:$0xff] }
0x11a5   :  { %v1261_v15 = vsel %vm262_vm4, %v1260_v61, -inf }
0x11a6   :  { %1262 = vmax.xlane.f32.xlu2 %v1261_v15 }
0x1211   :  { %v1199_v3 = vpop.xlane.xlu2 %1198 }
0x1212   :  { %vm1200_vm12 = vcmp.eq.f32.partialorder %v1197_v2, %v1199_v3  ;;  %v1205_v4 = vcvt.f32.s32 %v1199_v3 }
0x1213   :  { %v1201_v55 = vsel %vm1200_vm12, %v1196_v1, inf }
0x1214   :  { %1202 = vmin.xlane.f32.xlu1 %v1201_v55  ;;  %v1206_v14 = vshll.u32 %v1205_v4, 16 }
0x1219   :  { %v1263_v5 = vpop.xlane.xlu2 %1262 }
0x121a   :  { %v1264_v6 = vsub.f32 %v1260_v61, %v1263_v5  ;;  %v3950_v61 = vld [vmem:[%s4361_s6 + $0x20] sm:$0xff] }
0x121c   :  { %v1265_v58 = vmul.f32 1.442695, %v1264_v6 }
0x121e   :  { %2775 = vpow2.f32 %v1265_v58 }
0x1224   :  { %v2776_v29 = vpop.eup %2775 }
0x1225   :  { %v1267_v50 = vsel %vm262_vm4, %v2776_v29, 0.0 }
0x1226   :  { %1268 = vadd.xlane.f32.xlu0 %v1267_v50 }
0x123a   :  { %1405 = vrot.lane.b32.xlu0 %v3923_v21, %s3073_s14 }
0x1287   :  { %v1203_v2 = vpop.xlane.xlu1 %1202 }
0x1288   :  { %v1204_v17 = vcvt.f32.s32 %v1203_v2 }
0x128a   :  { %v1207_v13 = vadd.s32 %v1206_v14, %v1204_v17 }
0x128c   :  { %vm1208_vm13 = vcmp.eq.s32.totalorder %v3188_v31, %v1207_v13 }
0x128d   :  { %2674 = vmatmul.msk.f32.vlgmr.msra.gmra.mxu0 %vm1208_vm13, %v4369_v40 }
0x128e   :  { %2051 = vmatpush.msra.mxu0 %v3932_v44 }
0x1290   :  { %2052 = vmatpush.msra.mxu0 %v3938_v28 }
0x1292   :  { %2053 = vmatpush.msra.mxu0 %v3944_v7 }
0x1294   :  { %2054 = vmatpush.msra.mxu0 %v3950_v61 }
0x1299   :  { %v1269_v15 = vpop.xlane.xlu0 %1268 }
0x129a   :  { %2777 = vrcp.f32 %v1269_v15  ;;  %v1281_v55 = vand.u32 2147483648, %v1269_v15  ;;  %v1279_v6 = vand.u32 2147483647, %v1269_v15  ;;  %vm1275_vm15 = vweird.f32 %v1269_v15 }
0x129c   :  { %v1282_v50 = vor.u32 1.1754944e-38, %v1281_v55  ;;  %vm1280_vm6 = vcmp.eq.f32.partialorder %v1279_v6, 8.507059e+37 }
0x12a0   :  { %v2778_v53 = vpop.eup %2777 }
0x12a1   :  { %v1271_v3 = vmul.f32 %v2778_v53, %v1269_v15  ;;  %vm1276_vm14 = vweird.f32 %v2778_v53 }
0x12a2   :  { %vm1277_vm1 = vmor %vm1275_vm15, %vm1276_vm14 }
0x12a3   :  { %v1272_v1 = vsub.f32 1.0, %v1271_v3  ;;  %v3954_v3 = vld [vmem:[#allocation10 + $0x18] sm:$0xff] }
0x12a5   :  { %v1273_v5 = vmul.f32 %v2778_v53, %v1272_v1  ;;  %v3957_v1 = vld [vmem:[#allocation10 + $0x10] sm:$0xff] }
0x12a6   :  { %4372 = vst [vmem:[#allocation16_spill] sm:$0xff] %v3957_v1 }
0x12a7   :  { %v1274_v58 = vadd.f32 %v2778_v53, %v1273_v5 }
0x12a9   :  { %v1278_v56 = vsel %vm1277_vm1, %v2778_v53, %v1274_v58 }
0x12aa   :  { %v1283_v4 = vsel %vm1280_vm6, %v1282_v50, %v1278_v56 }
0x12ab   :  { %v1284_v2 = vmul.f32 %v2776_v29, %v1283_v4 }
0x12ad   :  { %v1292_v14 = vperm.slane %v1284_v2, 1  ;;  %v1285_v17 = vperm.slane %v1284_v2, 0 }
0x12af   :  { %1297 = vperm.xlu2 %2724, %v1292_v14   ;;  %1290 = vperm.xlu1 %2725, %v1285_v17  }
0x1309   :  { %v1298_v15 = vpop.permute.xlu2 %1297 }
0x130a   :  { %v1228_v13 = vpop.f32.mrf.mxu0  ;;  %v1300_v29 = vmul.f32 %v3657_v45, %v1298_v15 }
0x130b   :  { %2676 = vmatmul.msk.f32.vlgmr.msra.gmra.mxu2 %vm320_vm5, %v1228_v13 }
0x130c   :  { %1654 = vmatpush.msra.mxu2 %v3954_v3  ;;  %v1308_v53 = vsel %vm198_vm0, %v1300_v29, 0.0 }
0x130d   :  { %v1309_v55 = vrot.slane %v1308_v53, 4 }
0x130e   :  { %1655 = vmatpush.msra.mxu2 %v3957_v1 }
0x130f   :  { %v1310_v5 = vadd.f32 %v1309_v55, %v1308_v53 }
0x1310   :  { %1656 = vmatpush.msra.mxu2 %v3533_v30 }
0x1311   :  { %v1311_v50 = vrot.slane %v1310_v5, 2 }
0x1312   :  { %1657 = vmatpush.msra.mxu2 %v3542_v33 }
0x1313   :  { %v1312_v2 = vadd.f32 %v1311_v50, %v1310_v5  ;;  %v3972_v5 = vld [vmem:[#allocation6] ss:$0 sm:$0xff] }
0x1315   :  { %v1313_v30 = vrot.slane %v1312_v2, 1 }
0x1317   :  { %v1314_v33 = vadd.f32 %v1313_v30, %v1312_v2  ;;  %v1406_v30 = vpop.permute.xlu0 %1405 }
0x1321   :  { %v1291_v6 = vpop.permute.xlu1 %1290 }
0x1322   :  { %v1299_v58 = vmul.f32 %v3663_v20, %v1291_v6 }
0x1324   :  { %v1301_v56 = vsel %vm198_vm0, %v1299_v58, 0.0 }
0x1325   :  { %v1302_v4 = vrot.slane %v1301_v56, 4 }
0x1327   :  { %v1303_v14 = vadd.f32 %v1302_v4, %v1301_v56 }
0x1329   :  { %v1304_v17 = vrot.slane %v1303_v14, 2 }
0x132b   :  { %v1305_v13 = vadd.f32 %v1304_v17, %v1303_v14 }
0x132d   :  { %v1306_v40 = vrot.slane %v1305_v13, 1 }
0x132f   :  { %v1307_v1 = vadd.f32 %v1306_v40, %v1305_v13 }
0x1331   :  { %v1317_v15 = vsel %vm258_vm2, %v1314_v33, %v1307_v1 }
0x1332   :  { %2675 = vmatmul.msk.f32.vlgmr.msra.gmra.mxu1 %vm320_vm5, %v1317_v15 }
0x1333   :  { %1634 = vmatpush.msra.mxu1 %v3570_v62 }
0x1335   :  { %1635 = vmatpush.msra.mxu1 %v3572_v22 }
0x1337   :  { %1636 = vmatpush.msra.mxu1 %v3575_v41 }
0x1339   :  { %1637 = vmatpush.msra.mxu1 %v3578_v42 }
0x138e   :  { %v1360_v29 = vpop.f32.mrf.mxu2 }
0x13af   :  { %v1337_v53 = vpop.f32.mrf.mxu1 }
0x13b0   :  { %v1361_v55 = vadd.f32 %v1360_v29, %v1337_v53 }
0x13b2   :  { %v1363_v6 = vadd.f32 %v3972_v5, %v1361_v55 }
0x13b4   :  { %v1384_v40 = vadd.f32 %v3923_v21, %v1363_v6 }
0x13b6   :  { %v2678_v1 = vmul.f32 -1.442695, %v1384_v40 }
0x13b8   :  { %2779 = vpow2.f32 %v2678_v1 }
0x13be   :  { %v2780_v58 = vpop.eup %2779 }
0x13bf   :  { %v1388_v50 = vadd.f32 1.0, %v2780_v58 }
0x13c1   :  { %2781 = vrcp.f32 %v1388_v50  ;;  %v1400_v41 = vand.u32 2147483648, %v1388_v50  ;;  %v1398_v42 = vand.u32 2147483647, %v1388_v50  ;;  %vm1394_vm8 = vweird.f32 %v1388_v50 }
0x13c3   :  { %v1401_v14 = vor.u32 1.1754944e-38, %v1400_v41  ;;  %vm1399_vm10 = vcmp.eq.f32.partialorder %v1398_v42, 8.507059e+37 }
0x13c7   :  { %v2782_v62 = vpop.eup %2781 }
0x13c8   :  { %v1390_v22 = vmul.f32 %v2782_v62, %v1388_v50  ;;  %vm1395_vm7 = vweird.f32 %v2782_v62 }
0x13c9   :  { %vm1396_vm9 = vmor %vm1394_vm8, %vm1395_vm7 }
0x13ca   :  { %v1391_v56 = vsub.f32 1.0, %v1390_v22 }
0x13cc   :  { %v1392_v4 = vmul.f32 %v2782_v62, %v1391_v56 }
0x13ce   :  { %v1393_v2 = vadd.f32 %v2782_v62, %v1392_v4 }
0x13d0   :  { %v1397_v17 = vsel %vm1396_vm9, %v2782_v62, %v1393_v2 }
0x13d1   :  { %v1402_v21 = vsel %vm1399_vm10, %v1401_v14, %v1397_v17 }
0x13d2   :  { %v1408_v13 = vmul.f32 %v1406_v30, %v1402_v21  ;;  %v1415_v53 = vsub.f32 1.0, %v1402_v21  ;;  %v1421_v40 = vmul.f32 %v1402_v21, %v3788_v59 }
0x13d4   :  { %1410 = vrot.lane.b32.xlu2 %v1408_v13, %s3073_s14 }
0x142e   :  { %v1411_v33 = vpop.permute.xlu2 %1410 }
0x142f   :  { %v1413_v15 = vadd.f32 %v1411_v33, %v1363_v6 }
0x1431   :  { %2783 = vtanh.f32 %v1413_v15 }
0x1437   :  { %v2784_v29 = vpop.eup %2783 }
0x1438   :  { %1417 = vrot.lane.b32.xlu1 %v2784_v29, %s3074_s15 }
0x14aa   :  { %v1418_v55 = vpop.permute.xlu1 %1417 }
0x14ab   :  { %v1420_v1 = vmul.f32 %v1418_v55, %v1415_v53 }
0x14ad   :  { %v3979_v58 = vadd.f32 %v1421_v40, %v1420_v1 }
0x14af   :  { %v1425_v50 = vperm.slane %v3979_v58, 0  ;;  %v1424_v62 = vrot.slane %v3979_v58, 1 }
0x14b1   :  { %v1429_v22 = vmul.f32 %v1425_v50, %v3399_v16  ;;  %v1426_v56 = vperm.slane %v1424_v62, 0 }
0x14b3   :  { %1433 = vrot.lane.b32.xlu0 %v1429_v22, %s3074_s15  ;;  %v1430_v6 = vmul.f32 %v1426_v56, %v3396_v12 }
0x14b5   :  { %1435 = vrot.lane.b32.xlu2 %v1430_v6, %s3074_s15 }
0x150f   :  { %v1436_v41 = vpop.permute.xlu2 %1435 }
0x1510   :  { %v1442_v4 = vsel %vm198_vm0, %v1436_v41, 0.0 }
0x1511   :  { %1443 = vadd.xlane.f32.xlu0 %v1442_v4 }
0x1525   :  { %v1434_v59 = vpop.permute.xlu0 %1433 }
0x1526   :  { %v1439_v42 = vsel %vm198_vm0, %v1434_v59, 0.0 }
0x1527   :  { %1440 = vadd.xlane.f32.xlu1 %v1439_v42 }
0x1584   :  { %v1444_v2 = vpop.xlane.xlu0 %1443 }
0x1585   :  { %v1446_v14 = vmul.f32 0.17677669, %v1444_v2 }
0x1587   :  { %v1450_v21 = vperm.slane %v1446_v14, %v3188_v31 }
0x159a   :  { %v1441_v17 = vpop.xlane.xlu1 %1440 }
0x159b   :  { %v1445_v30 = vmul.f32 0.17677669, %v1441_v17 }
0x159d   :  { %v1449_v13 = vperm.slane %v1445_v30, %v3188_v31 }
0x159f   :  { %v1451_v33 = vsel %vm258_vm2, %v1450_v21, %v1449_v13 }
0x15a0   :  { %v1453_v15 = vsel %vm253_vm3, -1e+30, %v1451_v33 }
0x15a1   :  { %v1454_v29 = vsel %vm262_vm4, %v1453_v15, -inf }
0x15a2   :  { %1455 = vmax.xlane.f32.xlu2 %v1454_v29 }
0x1615   :  { %v1456_v53 = vpop.xlane.xlu2 %1455 }
0x1616   :  { %v1457_v55 = vsub.f32 %v1453_v15, %v1456_v53 }
0x1618   :  { %v1458_v40 = vmul.f32 1.442695, %v1457_v55 }
0x161a   :  { %2785 = vpow2.f32 %v1458_v40 }
0x1620   :  { %v2786_v1 = vpop.eup %2785 }
0x1621   :  { %v1460_v50 = vsel %vm262_vm4, %v2786_v1, 0.0 }
0x1622   :  { %1461 = vadd.xlane.f32.xlu1 %v1460_v50 }
0x163b   :  { %1533 = vrot.lane.b32.xlu1 %v3979_v58, %s3074_s15 }
0x1695   :  { %v1462_v62 = vpop.xlane.xlu1 %1461 }
0x1696   :  { %2787 = vrcp.f32 %v1462_v62  ;;  %v1474_v41 = vand.u32 2147483648, %v1462_v62  ;;  %v1472_v59 = vand.u32 2147483647, %v1462_v62  ;;  %vm1468_vm13 = vweird.f32 %v1462_v62 }
0x1698   :  { %v1475_v2 = vor.u32 1.1754944e-38, %v1474_v41  ;;  %vm1473_vm15 = vcmp.eq.f32.partialorder %v1472_v59, 8.507059e+37  ;;  %v4026_v41 = vld [vmem:[%s4359_s4 + $0x30] sm:$0xff]  ;;  %v4036_v59 = vld [vmem:[%s4359_s4 + $0x28] sm:$0xff] }
0x169c   :  { %v2788_v22 = vpop.eup %2787 }
0x169d   :  { %v1464_v56 = vmul.f32 %v2788_v22, %v1462_v62  ;;  %vm1469_vm12 = vweird.f32 %v2788_v22 }
0x169e   :  { %vm1470_vm14 = vmor %vm1468_vm13, %vm1469_vm12 }
0x169f   :  { %v1465_v6 = vsub.f32 1.0, %v1464_v56 }
0x16a1   :  { %v1466_v4 = vmul.f32 %v2788_v22, %v1465_v6 }
0x16a3   :  { %v1467_v42 = vadd.f32 %v2788_v22, %v1466_v4  ;;  %v4029_v4 = vld [vmem:[#allocation7 + $0x1] ss:$0 sm:$0xff] }
0x16a5   :  { %v1471_v14 = vsel %vm1470_vm14, %v2788_v22, %v1467_v42 }
0x16a6   :  { %v1476_v17 = vsel %vm1473_vm15, %v1475_v2, %v1471_v14  ;;  %v4047_v14 = vld [vmem:[#allocation6 + $0x1] ss:$0 sm:$0xff] }
0x16a7   :  { %v1477_v30 = vmul.f32 %v2786_v1, %v1476_v17 }
0x16a9   :  { %v1485_v21 = vperm.slane %v1477_v30, 1  ;;  %v1478_v13 = vperm.slane %v1477_v30, 0 }
0x16ab   :  { %1490 = vperm.xlu2 %2724, %v1485_v21   ;;  %1483 = vperm.xlu0 %2726, %v1478_v13  }
0x16ad   :  { %v1534_v33 = vpop.permute.xlu1 %1533 }
0x16ae   :  { %2680 = vmatmul.msk.f32.vlgmr.msrb.gmra.mxu2 %vm320_vm5, %v1534_v33  ;;  %2681 = vmatmul.msk.f32.vlgmr.msrb.gmra.mxu3 %vm320_vm5, %v1534_v33 }
0x16af   :  { %1836 = vmatpush.msrb.mxu2 %v3702_v10  ;;  %2338 = vmatpush.msrb.mxu3 %v3708_v49 }
0x16b1   :  { %1837 = vmatpush.msrb.mxu2 %v3714_v51  ;;  %2339 = vmatpush.msrb.mxu3 %v3720_v54 }
0x16b3   :  { %1838 = vmatpush.msrb.mxu2 %v3726_v18  ;;  %2340 = vmatpush.msrb.mxu3 %v3732_v57 }
0x16b5   :  { %1839 = vmatpush.msrb.mxu2 %v3738_v35  ;;  %2341 = vmatpush.msrb.mxu3 %v3744_v46 }
0x1705   :  { %v1491_v15 = vpop.permute.xlu2 %1490 }
0x1706   :  { %v1493_v29 = vmul.f32 %v3657_v45, %v1491_v15 }
0x1708   :  { %v1501_v53 = vsel %vm198_vm0, %v1493_v29, 0.0 }
0x1709   :  { %v1502_v10 = vrot.slane %v1501_v53, 4 }
0x170b   :  { %v1503_v55 = vadd.f32 %v1502_v10, %v1501_v53 }
0x170d   :  { %v1504_v40 = vrot.slane %v1503_v55, 2 }
0x170f   :  { %v1505_v1 = vadd.f32 %v1504_v40, %v1503_v55 }
0x1711   :  { %v1506_v35 = vrot.slane %v1505_v1, 1 }
0x1713   :  { %v1507_v22 = vadd.f32 %v1506_v35, %v1505_v1 }
0x171d   :  { %v1484_v49 = vpop.permute.xlu0 %1483 }
0x171e   :  { %v1492_v51 = vmul.f32 %v3663_v20, %v1484_v49  ;;  %v4019_v20 = vld [vmem:[%s4359_s4 + $0x38] sm:$0xff] }
0x1720   :  { %v1494_v54 = vsel %vm198_vm0, %v1492_v51, 0.0 }
0x1721   :  { %v1495_v18 = vrot.slane %v1494_v54, 4 }
0x1723   :  { %v1496_v57 = vadd.f32 %v1495_v18, %v1494_v54 }
0x1725   :  { %v1497_v50 = vrot.slane %v1496_v57, 2 }
0x1727   :  { %v1498_v62 = vadd.f32 %v1497_v50, %v1496_v57 }
0x1729   :  { %v1499_v46 = vrot.slane %v1498_v62, 1 }
0x172b   :  { %v1500_v56 = vadd.f32 %v1499_v46, %v1498_v62 }
0x172d   :  { %v1510_v45 = vsel %vm258_vm2, %v1507_v22, %v1500_v56 }
0x172e   :  { %2679 = vmatmul.msk.f32.vlgmr.msrb.gmra.mxu1 %vm320_vm5, %v1510_v45  ;;  %2684 = vmatmul.msk.f32.vlgmr.msra.gmra.mxu2 %vm320_vm5, %v1510_v45 }
0x172f   :  { %1813 = vmatpush.msrb.mxu1 %v3759_v43  ;;  %2030 = vmatpush.msra.mxu2 %v4019_v20 }
0x1731   :  { %v1575_v6 = vpop.f32.mrf.mxu3  ;;  %1814 = vmatpush.msrb.mxu1 %v3766_v23  ;;  %2031 = vmatpush.msra.mxu2 %v4026_v41  ;;  %v4044_v23 = vld [vmem:[%s4359_s4 + $0x20] sm:$0xff]  ;;  %v1554_v42 = vpop.f32.mrf.mxu2 }
0x1732   :  { %v1576_v43 = vadd.f32 %v4029_v4, %v1575_v6 }
0x1733   :  { %1815 = vmatpush.msrb.mxu1 %v3773_v25  ;;  %2032 = vmatpush.msra.mxu2 %v4036_v59 }
0x1734   :  { %1599 = vrot.lane.b32.xlu0 %v1576_v43, %s3073_s14 }
0x1735   :  { %1816 = vmatpush.msrb.mxu1 %v3780_v63  ;;  %2033 = vmatpush.msra.mxu2 %v4044_v23 }
0x17a6   :  { %v1600_v54 = vpop.permute.xlu0 %1599 }
0x17ab   :  { %v1530_v25 = vpop.f32.mrf.mxu1 }
0x17ac   :  { %v1555_v2 = vadd.f32 %v1554_v42, %v1530_v25 }
0x17ae   :  { %v1557_v17 = vadd.f32 %v4047_v14, %v1555_v2 }
0x17b0   :  { %v1578_v30 = vadd.f32 %v1576_v43, %v1557_v17 }
0x17b2   :  { %v2682_v21 = vmul.f32 -1.442695, %v1578_v30 }
0x17b4   :  { %2789 = vpow2.f32 %v2682_v21  ;;  %v4075_v21 = vld [vmem:[%s4360_s5 + $0x30] sm:$0xff] }
0x17ba   :  { %v2790_v13 = vpop.eup %2789 }
0x17bb   :  { %v1582_v33 = vadd.f32 1.0, %v2790_v13 }
0x17bd   :  { %2791 = vrcp.f32 %v1582_v33  ;;  %v1594_v53 = vand.u32 2147483648, %v1582_v33  ;;  %v1592_v55 = vand.u32 2147483647, %v1582_v33  ;;  %vm1588_vm6 = vweird.f32 %v1582_v33 }
0x17bf   :  { %v1595_v51 = vor.u32 1.1754944e-38, %v1594_v53  ;;  %vm1593_vm8 = vcmp.eq.f32.partialorder %v1592_v55, 8.507059e+37 }
0x17c3   :  { %v2792_v63 = vpop.eup %2791 }
0x17c4   :  { %v1584_v15 = vmul.f32 %v2792_v63, %v1582_v33  ;;  %vm1589_vm1 = vweird.f32 %v2792_v63  ;;  %v4083_v33 = vld [vmem:[%s4360_s5 + $0x28] sm:$0xff] }
0x17c5   :  { %vm1590_vm7 = vmor %vm1588_vm6, %vm1589_vm1 }
0x17c6   :  { %v1585_v29 = vsub.f32 1.0, %v1584_v15 }
0x17c8   :  { %v1586_v10 = vmul.f32 %v2792_v63, %v1585_v29 }
0x17ca   :  { %v1587_v49 = vadd.f32 %v2792_v63, %v1586_v10 }
0x17cc   :  { %v1591_v40 = vsel %vm1590_vm7, %v2792_v63, %v1587_v49 }
0x17cd   :  { %v1596_v18 = vsel %vm1593_vm8, %v1595_v51, %v1591_v40 }
0x17ce   :  { %v1602_v1 = vmul.f32 %v1600_v54, %v1596_v18  ;;  %v1609_v62 = vsub.f32 1.0, %v1596_v18  ;;  %v1615_v22 = vmul.f32 %v1596_v18, %v3979_v58 }
0x17d0   :  { %1604 = vrot.lane.b32.xlu2 %v1602_v1, %s3073_s14 }
0x182a   :  { %v1605_v57 = vpop.permute.xlu2 %1604 }
0x182b   :  { %v1607_v50 = vadd.f32 %v1605_v57, %v1557_v17  ;;  %v4068_v17 = vld [vmem:[%s4360_s5 + $0x38] sm:$0xff] }
0x182d   :  { %2793 = vtanh.f32 %v1607_v50 }
0x1833   :  { %v2794_v35 = vpop.eup %2793 }
0x1834   :  { %1611 = vrot.lane.b32.xlu0 %v2794_v35, %s3074_s15 }
0x18a6   :  { %v1612_v46 = vpop.permute.xlu0 %1611 }
0x18a7   :  { %v1614_v56 = vmul.f32 %v1612_v46, %v1609_v62 }
0x18a9   :  { %v4053_v45 = vadd.f32 %v1615_v22, %v1614_v56 }
0x18ab   :  { %1618 = vrot.lane.b32.xlu1 %v4053_v45, %s3074_s15  ;;  %v1713_v6 = vperm.slane %v4053_v45, 0  ;;  %v1712_v43 = vrot.slane %v4053_v45, 1 }
0x18ad   :  { %v1717_v42 = vmul.f32 %v1713_v6, %v3399_v16  ;;  %v1714_v25 = vperm.slane %v1712_v43, 0 }
0x18af   :  { %1721 = vrot.lane.b32.xlu0 %v1717_v42, %s3074_s15  ;;  %v1718_v2 = vmul.f32 %v1714_v25, %v3396_v12 }
0x18b3   :  { %1723 = vrot.lane.b32.xlu1 %v1718_v2, %s3074_s15 }
0x191d   :  { %v1619_v58 = vpop.permute.xlu1 %1618 }
0x191e   :  { %2683 = vmatmul.msk.f32.vlgmr.msra.gmra.mxu1 %vm320_vm5, %v1619_v58  ;;  %2689 = vmatmul.msk.f32.vlgmr.msrb.gmra.mxu0 %vm320_vm5, %v1619_v58 }
0x191f   :  { %2006 = vmatpush.msra.mxu1 %v4068_v17  ;;  %2173 = vmatpush.msrb.mxu0 %v3805_v47  ;;  %v4090_v47 = vld [vmem:[%s4360_s5 + $0x20] sm:$0xff] }
0x1921   :  { %v1722_v30 = vpop.permute.xlu0 %1721  ;;  %2007 = vmatpush.msra.mxu1 %v4075_v21  ;;  %2174 = vmatpush.msrb.mxu0 %v3812_v8 }
0x1922   :  { %v1727_v13 = vsel %vm198_vm0, %v1722_v30, 0.0 }
0x1923   :  { %1728 = vadd.xlane.f32.xlu1 %v1727_v13  ;;  %2008 = vmatpush.msra.mxu1 %v4083_v33  ;;  %v4373_v13 = vmov 1.0  }
0x1924   :  { %2175 = vmatpush.msrb.mxu0 %v3819_v60  ;;  %v4109_v60 = vld [vmem:[%s4365_s10] ss:$0 sm:$0xff] }
0x1925   :  { %2009 = vmatpush.msra.mxu1 %v4090_v47 }
0x1926   :  { %2176 = vmatpush.msrb.mxu0 %v3826_v19 }
0x1928   :  { %2177 = vmatpush.msrb.mxu0 %v3832_v26  ;;  %v1659_v26 = vpop.f32.mrf.mxu2 }
0x192a   :  { %2178 = vmatpush.msrb.mxu0 %v3838_v24 }
0x192c   :  { %2179 = vmatpush.msrb.mxu0 %v3844_v32  ;;  %v4115_v32 = vld [vmem:[%s4367_s12] ss:$0 sm:$0xff] }
0x192e   :  { %2180 = vmatpush.msrb.mxu0 %v3850_v27 }
0x1930   :  { %2181 = vmatpush.msrb.mxu0 %v3856_v48 }
0x1932   :  { %2182 = vmatpush.msrb.mxu0 %v3862_v11 }
0x1934   :  { %2183 = vmatpush.msrb.mxu0 %v3868_v36  ;;  %v1724_v36 = vpop.permute.xlu1 %1723 }
0x1936   :  { %2184 = vmatpush.msrb.mxu0 %v3874_v37  ;;  %v1730_v37 = vsel %vm198_vm0, %v1724_v36, 0.0 }
0x1938   :  { %2185 = vmatpush.msrb.mxu0 %v3880_v38 }
0x193a   :  { %2186 = vmatpush.msrb.mxu0 %v3886_v39 }
0x193c   :  { %2187 = vmatpush.msrb.mxu0 %v3892_v52 }
0x193e   :  { %2188 = vmatpush.msrb.mxu0 %v3898_v0 }
0x1996   :  { %v1729_v0 = vpop.xlane.xlu1 %1728 }
0x1997   :  { %v1733_v29 = vmul.f32 0.17677669, %v1729_v0 }
0x1999   :  { %v1737_v55 = vperm.slane %v1733_v29, %v3188_v31 }
0x199b   :  { %v1639_v8 = vpop.f32.mrf.mxu1  ;;  %v1862_v6 = vpop.f32.mrf.mxu0 }
0x199c   :  { %v1640_v19 = vadd.f32 %v4109_v60, %v1639_v8  ;;  %v4136_v43 = vadd.f32 %v3920_v9, %v1862_v6 }
0x199e   :  { %v1662_v24 = vadd.f32 %v1659_v26, %v1640_v19 }
0x19a0   :  { %v1663_v27 = vadd.f32 %v4115_v32, %v1662_v24 }
0x19a2   :  { %v1665_v48 = vrot.slane %v1663_v27, 1  ;;  %1667 = vst [vmem:[%s4368_s13 + $0x2] sm:$0x1] %v1663_v27  ;;  %v1669_v11 = vsel %vm706_vm11, %v1663_v27, -inf }
0x19a3   :  { %1670 = vmax.xlane.f32.xlu2 %v1669_v11 }
0x19a4   :  { %1668 = vst [vmem:[%s4368_s13 + $0xa] sm:$0x1] %v1665_v48 }
0x19ab   :  { %1731 = vadd.xlane.f32.xlu2 %v1730_v37 }
0x1a16   :  { %v1671_v38 = vpop.xlane.xlu2 %1670 }
0x1a17   :  { %vm1672_vm9 = vcmp.eq.f32.partialorder %v1663_v27, %v1671_v38 }
0x1a18   :  { %v1673_v39 = vsel %vm1672_vm9, %v3188_v31, 128 }
0x1a19   :  { %v1674_v52 = vsel %vm706_vm11, %v1673_v39, 2147483647 }
0x1a1a   :  { %v1676_v63 = vshra.s32 %v1674_v52, 16  ;;  %v1675_v18 = vand.u32 65535, %v1674_v52  ;;  %v4151_v52 = vld [vmem:[%s4357_s2] sm:$0x3f] }
0x1a1c   :  { %v1678_v15 = vcvt.s32.f32 %v1676_v63  ;;  %v1677_v57 = vcvt.s32.f32 %v1675_v18  ;;  %v4374_v63 = vld [vmem:[#allocation16_spill] sm:$0xff] }
0x1a1e   :  { %1679 = vmin.xlane.f32.xlu0 %v1678_v15  ;;  %v1732_v53 = vpop.xlane.xlu2 %1731 }
0x1a1f   :  { %v1734_v10 = vmul.f32 0.17677669, %v1732_v53  ;;  %v4159_v53 = vld [vmem:[#allocation10] sm:$0xff] }
0x1a21   :  { %v1738_v49 = vperm.slane %v1734_v10, %v3188_v31 }
0x1a23   :  { %v1739_v51 = vsel %vm258_vm2, %v1738_v49, %v1737_v55  ;;  %v4165_v49 = vld [vmem:[%s4357_s2 + $0x8] sm:$0x3f] }
0x1a24   :  { %v1741_v40 = vsel %vm253_vm3, -1e+30, %v1739_v51 }
0x1a25   :  { %v1742_v54 = vsel %vm262_vm4, %v1741_v40, -inf }
0x1a26   :  { %1743 = vmax.xlane.f32.xlu0 %v1742_v54 }
0x1a91   :  { %v1680_v1 = vpop.xlane.xlu0 %1679 }
0x1a92   :  { %vm1681_vm10 = vcmp.eq.f32.partialorder %v1678_v15, %v1680_v1  ;;  %v1686_v42 = vcvt.f32.s32 %v1680_v1  ;;  %v4155_v15 = vld [vmem:[#allocation10 + $0x8] sm:$0xff] }
0x1a93   :  { %v1682_v50 = vsel %vm1681_vm10, %v1677_v57, inf }
0x1a94   :  { %1683 = vmin.xlane.f32.xlu2 %v1682_v50  ;;  %v1687_v2 = vshll.u32 %v1686_v42, 16  ;;  %v4171_v42 = vld [vmem:[#allocation9 + $0x18] sm:$0xff] }
0x1a99   :  { %v1744_v35 = vpop.xlane.xlu0 %1743 }
0x1a9a   :  { %v1745_v62 = vsub.f32 %v1741_v40, %v1744_v35 }
0x1a9c   :  { %v1746_v46 = vmul.f32 1.442695, %v1745_v62 }
0x1a9e   :  { %2795 = vpow2.f32 %v1746_v46 }
0x1aa4   :  { %v2796_v22 = vpop.eup %2795 }
0x1aa5   :  { %v1748_v56 = vsel %vm262_vm4, %v2796_v22, 0.0 }
0x1aa6   :  { %1749 = vadd.xlane.f32.xlu1 %v1748_v56 }
0x1abf   :  { %1886 = vrot.lane.b32.xlu1 %v4136_v43, %s3073_s14 }
0x1b07   :  { %v1684_v25 = vpop.xlane.xlu2 %1683 }
0x1b08   :  { %v1685_v58 = vcvt.f32.s32 %v1684_v25  ;;  %v4174_v25 = vld [vmem:[#allocation9 + $0x10] sm:$0xff] }
0x1b0a   :  { %v1688_v30 = vadd.s32 %v1687_v2, %v1685_v58  ;;  %v4177_v2 = vld [vmem:[#allocation9 + $0x8] sm:$0xff]  ;;  %v4180_v58 = vld [vmem:[#allocation9] sm:$0xff] }
0x1b0c   :  { %vm1689_vm12 = vcmp.eq.s32.totalorder %v3188_v31, %v1688_v30 }
0x1b0d   :  { %2686 = vmatmul.msk.f32.vlgmr.msra.gmra.mxu3 %vm1689_vm12, %v4373_v13 }
0x1b0e   :  { %2532 = vmatpush.msra.mxu3 %v3932_v44 }
0x1b10   :  { %2533 = vmatpush.msra.mxu3 %v3938_v28 }
0x1b12   :  { %2534 = vmatpush.msra.mxu3 %v3944_v7 }
0x1b14   :  { %2535 = vmatpush.msra.mxu3 %v3950_v61 }
0x1b19   :  { %v1750_v9 = vpop.xlane.xlu1 %1749 }
0x1b1a   :  { %2797 = vrcp.f32 %v1750_v9  ;;  %v1762_v24 = vand.u32 2147483648, %v1750_v9  ;;  %v1760_v48 = vand.u32 2147483647, %v1750_v9  ;;  %vm1756_vm14 = vweird.f32 %v1750_v9 }
0x1b1c   :  { %v1763_v36 = vor.u32 1.1754944e-38, %v1762_v24  ;;  %vm1761_vm1 = vcmp.eq.f32.partialorder %v1760_v48, 8.507059e+37 }
0x1b20   :  { %v2798_v8 = vpop.eup %2797 }
0x1b21   :  { %v1752_v19 = vmul.f32 %v2798_v8, %v1750_v9  ;;  %vm1757_vm13 = vweird.f32 %v2798_v8 }
0x1b22   :  { %vm1758_vm15 = vmor %vm1756_vm14, %vm1757_vm13 }
0x1b23   :  { %v1753_v26 = vsub.f32 1.0, %v1752_v19 }
0x1b25   :  { %v1754_v27 = vmul.f32 %v2798_v8, %v1753_v26 }
0x1b27   :  { %v1755_v11 = vadd.f32 %v2798_v8, %v1754_v27 }
0x1b29   :  { %v1759_v44 = vsel %vm1758_vm15, %v2798_v8, %v1755_v11 }
0x1b2a   :  { %v1764_v28 = vsel %vm1761_vm1, %v1763_v36, %v1759_v44 }
0x1b2b   :  { %v1765_v37 = vmul.f32 %v2796_v22, %v1764_v28 }
0x1b2d   :  { %v1773_v7 = vperm.slane %v1765_v37, 1  ;;  %v1766_v38 = vperm.slane %v1765_v37, 0 }
0x1b2f   :  { %1778 = vperm.xlu0 %2726, %v1773_v7   ;;  %1771 = vperm.xlu2 %2724, %v1766_v38  }
0x1b89   :  { %v1772_v39 = vpop.permute.xlu2 %1771 }
0x1b8a   :  { %v1780_v0 = vmul.f32 %v4151_v52, %v1772_v39 }
0x1b8c   :  { %v1782_v29 = vsel %vm198_vm0, %v1780_v0, 0.0 }
0x1b90   :  { %v1709_v61 = vpop.f32.mrf.mxu3 }
0x1b91   :  { %2688 = vmatmul.msk.f32.vlgmr.msrb.gmra.mxu2 %vm320_vm5, %v1709_v61 }
0x1b92   :  { %2135 = vmatpush.msrb.mxu2 %v3954_v3  ;;  %v1783_v3 = vrot.slane %v1782_v29, 4 }
0x1b94   :  { %2136 = vmatpush.msrb.mxu2 %v4374_v63  ;;  %v1784_v10 = vadd.f32 %v1783_v3, %v1782_v29 }
0x1b96   :  { %2137 = vmatpush.msrb.mxu2 %v4155_v15  ;;  %v1785_v40 = vrot.slane %v1784_v10, 2 }
0x1b98   :  { %2138 = vmatpush.msrb.mxu2 %v4159_v53  ;;  %v1786_v1 = vadd.f32 %v1785_v40, %v1784_v10 }
0x1b9a   :  { %v1787_v35 = vrot.slane %v1786_v1, 1 }
0x1b9c   :  { %v1788_v22 = vadd.f32 %v1787_v35, %v1786_v1 }
0x1ba1   :  { %v1779_v55 = vpop.permute.xlu0 %1778 }
0x1ba2   :  { %v1781_v51 = vmul.f32 %v4165_v49, %v1779_v55 }
0x1ba4   :  { %v1789_v54 = vsel %vm198_vm0, %v1781_v51, 0.0 }
0x1ba5   :  { %v1790_v18 = vrot.slane %v1789_v54, 4 }
0x1ba7   :  { %v1791_v57 = vadd.f32 %v1790_v18, %v1789_v54 }
0x1ba9   :  { %v1792_v50 = vrot.slane %v1791_v57, 2 }
0x1bab   :  { %v1793_v62 = vadd.f32 %v1792_v50, %v1791_v57 }
0x1bad   :  { %v1794_v46 = vrot.slane %v1793_v62, 1 }
0x1baf   :  { %v1795_v56 = vadd.f32 %v1794_v46, %v1793_v62 }
0x1bb1   :  { %v1798_v6 = vsel %vm258_vm2, %v1795_v56, %v1788_v22 }
0x1bb2   :  { %2687 = vmatmul.msk.f32.vlgmr.msrb.gmra.mxu1 %vm320_vm5, %v1798_v6 }
0x1bb3   :  { %2115 = vmatpush.msrb.mxu1 %v4171_v42 }
0x1bb5   :  { %2116 = vmatpush.msrb.mxu1 %v4174_v25 }
0x1bb7   :  { %2117 = vmatpush.msrb.mxu1 %v4177_v2 }
0x1bb9   :  { %2118 = vmatpush.msrb.mxu1 %v4180_v58 }
0x1c14   :  { %v1841_v30 = vpop.f32.mrf.mxu2 }
0x1c2f   :  { %v1818_v9 = vpop.f32.mrf.mxu1 }
0x1c30   :  { %v1842_v8 = vadd.f32 %v1841_v30, %v1818_v9 }
0x1c32   :  { %v1844_v19 = vadd.f32 %v3972_v5, %v1842_v8  ;;  %v1887_v5 = vpop.permute.xlu1 %1886 }
0x1c34   :  { %v1865_v26 = vadd.f32 %v4136_v43, %v1844_v19 }
0x1c36   :  { %v2690_v24 = vmul.f32 -1.442695, %v1865_v26 }
0x1c38   :  { %2799 = vpow2.f32 %v2690_v24 }
0x1c3e   :  { %v2800_v27 = vpop.eup %2799 }
0x1c3f   :  { %v1869_v48 = vadd.f32 1.0, %v2800_v27 }
0x1c41   :  { %2801 = vrcp.f32 %v1869_v48  ;;  %v1881_v28 = vand.u32 2147483648, %v1869_v48  ;;  %v1879_v7 = vand.u32 2147483647, %v1869_v48  ;;  %vm1875_vm7 = vweird.f32 %v1869_v48 }
0x1c43   :  { %v1882_v61 = vor.u32 1.1754944e-38, %v1881_v28  ;;  %vm1880_vm9 = vcmp.eq.f32.partialorder %v1879_v7, 8.507059e+37 }
0x1c47   :  { %v2802_v11 = vpop.eup %2801 }
0x1c48   :  { %v1871_v36 = vmul.f32 %v2802_v11, %v1869_v48  ;;  %vm1876_vm6 = vweird.f32 %v2802_v11 }
0x1c49   :  { %vm1877_vm8 = vmor %vm1875_vm7, %vm1876_vm6 }
0x1c4a   :  { %v1872_v44 = vsub.f32 1.0, %v1871_v36 }
0x1c4c   :  { %v1873_v37 = vmul.f32 %v2802_v11, %v1872_v44 }
0x1c4e   :  { %v1874_v38 = vadd.f32 %v2802_v11, %v1873_v37 }
0x1c50   :  { %v1878_v39 = vsel %vm1877_vm8, %v2802_v11, %v1874_v38 }
0x1c51   :  { %v1883_v43 = vsel %vm1880_vm9, %v1882_v61, %v1878_v39 }
0x1c52   :  { %v1889_v0 = vmul.f32 %v1887_v5, %v1883_v43  ;;  %v1896_v10 = vsub.f32 1.0, %v1883_v43  ;;  %v1902_v51 = vmul.f32 %v1883_v43, %v4053_v45  ;;  %v2893_v5 = vld [vmem:[%s4359_s4 + $0x18] sm:$0xff] }
0x1c54   :  { %1891 = vrot.lane.b32.xlu0 %v1889_v0, %s3073_s14 }
0x1cc6   :  { %v1892_v63 = vpop.permute.xlu0 %1891 }
0x1cc7   :  { %v1894_v29 = vadd.f32 %v1892_v63, %v1844_v19 }
0x1cc9   :  { %2803 = vtanh.f32 %v1894_v29  ;;  %v2894_v29 = vld [vmem:[%s4359_s4 + $0x10] sm:$0xff] }
0x1ccf   :  { %v2804_v3 = vpop.eup %2803 }
0x1cd0   :  { %1898 = vrot.lane.b32.xlu2 %v2804_v3, %s3074_s15 }
0x1d2a   :  { %v1899_v55 = vpop.permute.xlu2 %1898 }
0x1d2b   :  { %v1901_v40 = vmul.f32 %v1899_v55, %v1896_v10  ;;  %v2895_v10 = vld [vmem:[%s4359_s4 + $0x8] sm:$0xff] }
0x1d2d   :  { %v4188_v54 = vadd.f32 %v1902_v51, %v1901_v40  ;;  %v2896_v40 = vld [vmem:[%s4359_s4] sm:$0xff] }
0x1d2f   :  { %v1906_v18 = vperm.slane %v4188_v54, 0  ;;  %v1905_v1 = vrot.slane %v4188_v54, 1 }
0x1d31   :  { %v1910_v57 = vmul.f32 %v1906_v18, %v3399_v16  ;;  %v1907_v50 = vperm.slane %v1905_v1, 0 }
0x1d33   :  { %1914 = vrot.lane.b32.xlu1 %v1910_v57, %s3074_s15  ;;  %v1911_v35 = vmul.f32 %v1907_v50, %v3396_v12 }
0x1d35   :  { %1916 = vrot.lane.b32.xlu0 %v1911_v35, %s3074_s15 }
0x1da5   :  { %v1915_v62 = vpop.permute.xlu1 %1914 }
0x1da6   :  { %v1920_v46 = vsel %vm198_vm0, %v1915_v62, 0.0 }
0x1da7   :  { %1921 = vadd.xlane.f32.xlu2 %v1920_v46  ;;  %v1917_v45 = vpop.permute.xlu0 %1916 }
0x1da8   :  { %v1923_v22 = vsel %vm198_vm0, %v1917_v45, 0.0 }
0x1da9   :  { %1924 = vadd.xlane.f32.xlu1 %v1923_v22 }
0x1e1a   :  { %v1922_v56 = vpop.xlane.xlu2 %1921 }
0x1e1b   :  { %v1926_v6 = vmul.f32 0.17677669, %v1922_v56 }
0x1e1c   :  { %v1925_v30 = vpop.xlane.xlu1 %1924 }
0x1e1d   :  { %v1927_v9 = vmul.f32 0.17677669, %v1925_v30  ;;  %v1930_v8 = vperm.slane %v1926_v6, %v3188_v31 }
0x1e1f   :  { %v1931_v19 = vperm.slane %v1927_v9, %v3188_v31 }
0x1e21   :  { %v1932_v26 = vsel %vm258_vm2, %v1931_v19, %v1930_v8 }
0x1e22   :  { %v1934_v24 = vsel %vm253_vm3, -1e+30, %v1932_v26 }
0x1e23   :  { %v1935_v27 = vsel %vm262_vm4, %v1934_v24, -inf }
0x1e24   :  { %1936 = vmax.xlane.f32.xlu0 %v1935_v27 }
0x1e97   :  { %v1937_v48 = vpop.xlane.xlu0 %1936 }
0x1e98   :  { %v1938_v11 = vsub.f32 %v1934_v24, %v1937_v48 }
0x1e9a   :  { %v1939_v36 = vmul.f32 1.442695, %v1938_v11 }
0x1e9c   :  { %2805 = vpow2.f32 %v1939_v36 }
0x1ea2   :  { %v2806_v44 = vpop.eup %2805 }
0x1ea3   :  { %v1941_v28 = vsel %vm262_vm4, %v2806_v44, 0.0 }
0x1ea4   :  { %1942 = vadd.xlane.f32.xlu2 %v1941_v28 }
0x1ebc   :  { %2014 = vrot.lane.b32.xlu2 %v4188_v54, %s3074_s15 }
0x1f17   :  { %v1943_v37 = vpop.xlane.xlu2 %1942 }
0x1f18   :  { %2807 = vrcp.f32 %v1943_v37  ;;  %v1955_v43 = vand.u32 2147483648, %v1943_v37  ;;  %v1953_v63 = vand.u32 2147483647, %v1943_v37  ;;  %vm1949_vm12 = vweird.f32 %v1943_v37 }
0x1f1a   :  { %v1956_v55 = vor.u32 1.1754944e-38, %v1955_v43  ;;  %vm1954_vm14 = vcmp.eq.f32.partialorder %v1953_v63, 8.507059e+37 }
0x1f1e   :  { %v2808_v7 = vpop.eup %2807 }
0x1f1f   :  { %v1945_v38 = vmul.f32 %v2808_v7, %v1943_v37  ;;  %v2015_v61 = vpop.permute.xlu2 %2014  ;;  %vm1950_vm10 = vweird.f32 %v2808_v7 }
0x1f20   :  { %2692 = vmatmul.msk.f32.vlgmr.msra.gmra.mxu2 %vm320_vm5, %v2015_v61  ;;  %2693 = vmatmul.msk.f32.vlgmr.msra.gmra.mxu0 %vm320_vm5, %v2015_v61  ;;  %vm1951_vm13 = vmor %vm1949_vm12, %vm1950_vm10  ;;  %v2899_v61 = vld [vmem:[%s4360_s5 + $0x8] sm:$0xff] }
0x1f21   :  { %v1946_v39 = vsub.f32 1.0, %v1945_v38  ;;  %2317 = vmatpush.msra.mxu2 %v2893_v5  ;;  %v2898_v38 = vld [vmem:[%s4360_s5 + $0x10] sm:$0xff] }
0x1f23   :  { %v1947_v0 = vmul.f32 %v2808_v7, %v1946_v39  ;;  %2318 = vmatpush.msra.mxu2 %v2894_v29  ;;  %v2900_v39 = vld [vmem:[%s4360_s5] sm:$0xff] }
0x1f25   :  { %v1948_v3 = vadd.f32 %v2808_v7, %v1947_v0  ;;  %2319 = vmatpush.msra.mxu2 %v2895_v10 }
0x1f27   :  { %v1952_v51 = vsel %vm1951_vm13, %v2808_v7, %v1948_v3  ;;  %2320 = vmatpush.msra.mxu2 %v2896_v40  ;;  %v2897_v7 = vld [vmem:[%s4360_s5 + $0x18] sm:$0xff] }
0x1f28   :  { %v1957_v18 = vsel %vm1954_vm14, %v1956_v55, %v1952_v51 }
0x1f29   :  { %v1958_v1 = vmul.f32 %v2806_v44, %v1957_v18 }
0x1f2b   :  { %v1966_v57 = vperm.slane %v1958_v1, 1  ;;  %v1959_v50 = vperm.slane %v1958_v1, 0 }
0x1f2d   :  { %1971 = vperm.xlu0 %2726, %v1966_v57   ;;  %1964 = vperm.xlu1 %2725, %v1959_v50  }
0x1f9d   :  { %v2056_v35 = vpop.f32.mrf.mxu0 }
0x1f9e   :  { %v2057_v62 = vadd.f32 %v4029_v4, %v2056_v35 }
0x1f9f   :  { %v1972_v46 = vpop.permute.xlu0 %1971  ;;  %v1965_v45 = vpop.permute.xlu1 %1964 }
0x1fa0   :  { %v1974_v22 = vmul.f32 %v4165_v49, %v1972_v46  ;;  %v1973_v56 = vmul.f32 %v4151_v52, %v1965_v45  ;;  %2080 = vrot.lane.b32.xlu0 %v2057_v62, %s3073_s14 }
0x1fa2   :  { %v1982_v6 = vsel %vm198_vm0, %v1974_v22, 0.0  ;;  %v1975_v30 = vsel %vm198_vm0, %v1973_v56, 0.0 }
0x1fa3   :  { %v1983_v9 = vrot.slane %v1982_v6, 4  ;;  %v1976_v8 = vrot.slane %v1975_v30, 4 }
0x1fa5   :  { %v1984_v19 = vadd.f32 %v1983_v9, %v1982_v6  ;;  %v1977_v26 = vadd.f32 %v1976_v8, %v1975_v30 }
0x1fa7   :  { %v1985_v24 = vrot.slane %v1984_v19, 2  ;;  %v1978_v27 = vrot.slane %v1977_v26, 2 }
0x1fa9   :  { %v1986_v48 = vadd.f32 %v1985_v24, %v1984_v19  ;;  %v1979_v4 = vadd.f32 %v1978_v27, %v1977_v26 }
0x1fab   :  { %v1987_v11 = vrot.slane %v1986_v48, 1  ;;  %v1980_v36 = vrot.slane %v1979_v4, 1 }
0x1fad   :  { %v1988_v44 = vadd.f32 %v1987_v11, %v1986_v48  ;;  %v1981_v28 = vadd.f32 %v1980_v36, %v1979_v4 }
0x1faf   :  { %v1991_v37 = vsel %vm258_vm2, %v1988_v44, %v1981_v28 }
0x1fb0   :  { %2691 = vmatmul.msk.f32.vlgmr.msra.gmra.mxu1 %vm320_vm5, %v1991_v37  ;;  %2696 = vmatmul.msk.f32.vlgmr.msrb.gmra.mxu2 %vm320_vm5, %v1991_v37 }
0x1fb1   :  { %2294 = vmatpush.msra.mxu1 %v2897_v7  ;;  %2511 = vmatpush.msrb.mxu2 %v4019_v20  ;;  %v2035_v20 = vpop.f32.mrf.mxu2 }
0x1fb3   :  { %2295 = vmatpush.msra.mxu1 %v2898_v38  ;;  %2512 = vmatpush.msrb.mxu2 %v4026_v41 }
0x1fb5   :  { %2296 = vmatpush.msra.mxu1 %v2899_v61  ;;  %2513 = vmatpush.msrb.mxu2 %v4036_v59 }
0x1fb7   :  { %2297 = vmatpush.msra.mxu1 %v2900_v39  ;;  %2514 = vmatpush.msrb.mxu2 %v4044_v23 }
0x202d   :  { %v2011_v5 = vpop.f32.mrf.mxu1 }
0x202e   :  { %v2036_v43 = vadd.f32 %v2035_v20, %v2011_v5 }
0x2030   :  { %v2038_v0 = vadd.f32 %v4047_v14, %v2036_v43  ;;  %v2081_v14 = vpop.permute.xlu0 %2080 }
0x2032   :  { %v2059_v41 = vadd.f32 %v2057_v62, %v2038_v0 }
0x2033   :  { %v2140_v44 = vpop.f32.mrf.mxu2 }
0x2034   :  { %v2694_v63 = vmul.f32 -1.442695, %v2059_v41 }
0x2036   :  { %2809 = vpow2.f32 %v2694_v63 }
0x203c   :  { %v2810_v29 = vpop.eup %2809 }
0x203d   :  { %v2063_v3 = vadd.f32 1.0, %v2810_v29 }
0x203f   :  { %2811 = vrcp.f32 %v2063_v3  ;;  %v2075_v51 = vand.u32 2147483648, %v2063_v3  ;;  %v2073_v18 = vand.u32 2147483647, %v2063_v3  ;;  %vm2069_vm1 = vweird.f32 %v2063_v3 }
0x2041   :  { %v2076_v23 = vor.u32 1.1754944e-38, %v2075_v51  ;;  %vm2074_vm7 = vcmp.eq.f32.partialorder %v2073_v18, 8.507059e+37 }
0x2045   :  { %v2812_v10 = vpop.eup %2811 }
0x2046   :  { %v2065_v59 = vmul.f32 %v2812_v10, %v2063_v3  ;;  %vm2070_vm15 = vweird.f32 %v2812_v10 }
0x2047   :  { %vm2071_vm6 = vmor %vm2069_vm1, %vm2070_vm15 }
0x2048   :  { %v2066_v55 = vsub.f32 1.0, %v2065_v59 }
0x204a   :  { %v2067_v40 = vmul.f32 %v2812_v10, %v2066_v55 }
0x204c   :  { %v2068_v1 = vadd.f32 %v2812_v10, %v2067_v40 }
0x204e   :  { %v2072_v57 = vsel %vm2071_vm6, %v2812_v10, %v2068_v1 }
0x204f   :  { %v2077_v50 = vsel %vm2074_vm7, %v2076_v23, %v2072_v57 }
0x2050   :  { %v2083_v35 = vmul.f32 %v2081_v14, %v2077_v50  ;;  %v2090_v22 = vsub.f32 1.0, %v2077_v50  ;;  %v2096_v6 = vmul.f32 %v2077_v50, %v4188_v54  ;;  %v2901_v50 = vld [vmem:[#allocation7] ss:$0 sm:$0xff] }
0x2052   :  { %2085 = vrot.lane.b32.xlu1 %v2083_v35, %s3073_s14 }
0x20c4   :  { %v2086_v62 = vpop.permute.xlu1 %2085 }
0x20c5   :  { %v2088_v46 = vadd.f32 %v2086_v62, %v2038_v0 }
0x20c7   :  { %2813 = vtanh.f32 %v2088_v46 }
0x20cd   :  { %v2814_v45 = vpop.eup %2813 }
0x20ce   :  { %2092 = vrot.lane.b32.xlu2 %v2814_v45, %s3074_s15 }
0x2128   :  { %v2093_v56 = vpop.permute.xlu2 %2092 }
0x2129   :  { %v2095_v30 = vmul.f32 %v2093_v56, %v2090_v22 }
0x212b   :  { %v4250_v9 = vadd.f32 %v2096_v6, %v2095_v30 }
0x212d   :  { %2099 = vrot.lane.b32.xlu0 %v4250_v9, %s3074_s15  ;;  %v2194_v8 = vperm.slane %v4250_v9, 0  ;;  %v2193_v19 = vrot.slane %v4250_v9, 1 }
0x212f   :  { %v2198_v26 = vmul.f32 %v2194_v8, %v3399_v16  ;;  %v2195_v24 = vperm.slane %v2193_v19, 0 }
0x2131   :  { %2202 = vrot.lane.b32.xlu2 %v2198_v26, %s3074_s15  ;;  %v2199_v27 = vmul.f32 %v2195_v24, %v3396_v12 }
0x2135   :  { %2204 = vrot.lane.b32.xlu0 %v2199_v27, %s3074_s15 }
0x218b   :  { %v2203_v54 = vpop.permute.xlu2 %2202 }
0x218c   :  { %v2208_v48 = vsel %vm198_vm0, %v2203_v54, 0.0 }
0x218d   :  { %2209 = vadd.xlane.f32.xlu0 %v2208_v48 }
0x219f   :  { %v2100_v4 = vpop.permute.xlu0 %2099 }
0x21a0   :  { %2695 = vmatmul.msk.f32.vlgmr.msrb.gmra.mxu1 %vm320_vm5, %v2100_v4  ;;  %2701 = vmatmul.msk.f32.vlgmr.msrb.gmra.mxu3 %vm320_vm5, %v2100_v4 }
0x21a1   :  { %2487 = vmatpush.msrb.mxu1 %v4068_v17 }
0x21a3   :  { %2488 = vmatpush.msrb.mxu1 %v4075_v21 }
0x21a5   :  { %2489 = vmatpush.msrb.mxu1 %v4083_v33 }
0x21a7   :  { %2490 = vmatpush.msrb.mxu1 %v4090_v47  ;;  %v2205_v21 = vpop.permute.xlu0 %2204 }
0x21a8   :  { %v2211_v33 = vsel %vm198_vm0, %v2205_v21, 0.0 }
0x2200   :  { %v2210_v38 = vpop.xlane.xlu0 %2209 }
0x2201   :  { %v2214_v20 = vmul.f32 0.17677669, %v2210_v38 }
0x2203   :  { %v2218_v0 = vperm.slane %v2214_v20, %v3188_v31 }
0x221d   :  { %v2120_v11 = vpop.f32.mrf.mxu1 }
0x221e   :  { %v2121_v36 = vadd.f32 %v4109_v60, %v2120_v11 }
0x2220   :  { %v2143_v28 = vadd.f32 %v2140_v44, %v2121_v36 }
0x2222   :  { %v2144_v37 = vadd.f32 %v4115_v32, %v2143_v28 }
0x2223   :  { %v2343_v14 = vpop.f32.mrf.mxu3 }
0x2224   :  { %v2146_v7 = vrot.slane %v2144_v37, 1  ;;  %2148 = vst [vmem:[%s4368_s13 + $0x3] sm:$0x1] %v2144_v37  ;;  %v2150_v17 = vsel %vm706_vm11, %v2144_v37, -inf  ;;  %v4286_v35 = vadd.f32 %v2901_v50, %v2343_v14 }
0x2225   :  { %2151 = vmax.xlane.f32.xlu1 %v2150_v17 }
0x2226   :  { %2149 = vst [vmem:[%s4368_s13 + $0xb] sm:$0x1] %v2146_v7  ;;  %v2903_v7 = vld [vmem:[#allocation10 + $0x10] sm:$0xff] }
0x222d   :  { %2212 = vadd.xlane.f32.xlu1 %v2211_v33 }
0x2298   :  { %v2152_v47 = vpop.xlane.xlu1 %2151 }
0x2299   :  { %vm2153_vm8 = vcmp.eq.f32.partialorder %v2144_v37, %v2152_v47  ;;  %v2902_v37 = vld [vmem:[#allocation10 + $0x18] sm:$0xff] }
0x229a   :  { %v2154_v60 = vsel %vm2153_vm8, %v3188_v31, 128 }
0x229b   :  { %v2155_v32 = vsel %vm706_vm11, %v2154_v60, 2147483647 }
0x229c   :  { %v2157_v61 = vshra.s32 %v2155_v32, 16  ;;  %v2156_v10 = vand.u32 65535, %v2155_v32 }
0x229e   :  { %v2159_v39 = vcvt.s32.f32 %v2157_v61  ;;  %v2158_v55 = vcvt.s32.f32 %v2156_v10 }
0x22a0   :  { %2160 = vmin.xlane.f32.xlu2 %v2159_v39  ;;  %v2213_v5 = vpop.xlane.xlu1 %2212 }
0x22a1   :  { %v2215_v43 = vmul.f32 0.17677669, %v2213_v5 }
0x22a3   :  { %v2219_v41 = vperm.slane %v2215_v43, %v3188_v31 }
0x22a5   :  { %v2220_v63 = vsel %vm258_vm2, %v2219_v41, %v2218_v0 }
0x22a6   :  { %v2222_v29 = vsel %vm253_vm3, -1e+30, %v2220_v63 }
0x22a7   :  { %v2223_v3 = vsel %vm262_vm4, %v2222_v29, -inf }
0x22a8   :  { %2224 = vmax.xlane.f32.xlu2 %v2223_v3 }
0x2313   :  { %v2161_v59 = vpop.xlane.xlu2 %2160 }
0x2314   :  { %vm2162_vm11 = vcmp.eq.f32.partialorder %v2159_v39, %v2161_v59  ;;  %v2167_v62 = vcvt.f32.s32 %v2161_v59 }
0x2315   :  { %v2163_v51 = vsel %vm2162_vm11, %v2158_v55, inf }
0x2316   :  { %2164 = vmin.xlane.f32.xlu1 %v2163_v51  ;;  %v2168_v45 = vshll.u32 %v2167_v62, 16  ;;  %v2904_v51 = vld [vmem:[#allocation6] ss:$0 sm:$0xff] }
0x231b   :  { %v2225_v40 = vpop.xlane.xlu2 %2224 }
0x231c   :  { %v2226_v18 = vsub.f32 %v2222_v29, %v2225_v40 }
0x231e   :  { %v2227_v1 = vmul.f32 1.442695, %v2226_v18 }
0x2320   :  { %2815 = vpow2.f32 %v2227_v1 }
0x2326   :  { %v2816_v23 = vpop.eup %2815 }
0x2327   :  { %v2229_v57 = vsel %vm262_vm4, %v2816_v23, 0.0 }
0x2328   :  { %2230 = vadd.xlane.f32.xlu0 %v2229_v57 }
0x233c   :  { %2367 = vrot.lane.b32.xlu0 %v4286_v35, %s3073_s14 }
0x2389   :  { %v2165_v46 = vpop.xlane.xlu1 %2164 }
0x238a   :  { %v2166_v22 = vcvt.f32.s32 %v2165_v46 }
0x238c   :  { %v2169_v56 = vadd.s32 %v2168_v45, %v2166_v22 }
0x238e   :  { %vm2170_vm9 = vcmp.eq.s32.totalorder %v3188_v31, %v2169_v56 }
0x238f   :  { %2698 = vmatmul.msk.f32.vlgmr.msrb.gmra.mxu0 %vm2170_vm9, %v4373_v13 }
0x239b   :  { %v2231_v6 = vpop.xlane.xlu0 %2230 }
0x239c   :  { %2817 = vrcp.f32 %v2231_v6  ;;  %v2243_v26 = vand.u32 2147483648, %v2231_v6  ;;  %v2241_v27 = vand.u32 2147483647, %v2231_v6  ;;  %vm2237_vm12 = vweird.f32 %v2231_v6 }
0x239e   :  { %v2244_v48 = vor.u32 1.1754944e-38, %v2243_v26  ;;  %vm2242_vm14 = vcmp.eq.f32.partialorder %v2241_v27, 8.507059e+37 }
0x23a2   :  { %v2818_v30 = vpop.eup %2817 }
0x23a3   :  { %v2233_v8 = vmul.f32 %v2818_v30, %v2231_v6  ;;  %vm2238_vm10 = vweird.f32 %v2818_v30 }
0x23a4   :  { %vm2239_vm13 = vmor %vm2237_vm12, %vm2238_vm10 }
0x23a5   :  { %v2234_v19 = vsub.f32 1.0, %v2233_v8 }
0x23a7   :  { %v2235_v24 = vmul.f32 %v2818_v30, %v2234_v19 }
0x23a9   :  { %v2236_v54 = vadd.f32 %v2818_v30, %v2235_v24 }
0x23ab   :  { %v2240_v4 = vsel %vm2239_vm13, %v2818_v30, %v2236_v54 }
0x23ac   :  { %v2245_v11 = vsel %vm2242_vm14, %v2244_v48, %v2240_v4 }
0x23ad   :  { %v2246_v36 = vmul.f32 %v2816_v23, %v2245_v11 }
0x23ae   :  { %v2368_v22 = vpop.permute.xlu0 %2367 }
0x23af   :  { %v2254_v44 = vperm.slane %v2246_v36, 1  ;;  %v2247_v28 = vperm.slane %v2246_v36, 0 }
0x23b1   :  { %2259 = vperm.xlu2 %2724, %v2254_v44   ;;  %2252 = vperm.xlu1 %2725, %v2247_v28  }
0x240b   :  { %v2260_v17 = vpop.permute.xlu2 %2259 }
0x240c   :  { %v2190_v13 = vpop.f32.mrf.mxu0  ;;  %v2262_v21 = vmul.f32 %v4165_v49, %v2260_v17 }
0x240d   :  { %2700 = vmatmul.msk.f32.vlgmr.msra.gmra.mxu2 %vm320_vm5, %v2190_v13 }
0x240e   :  { %2616 = vmatpush.msra.mxu2 %v2902_v37  ;;  %v2270_v33 = vsel %vm198_vm0, %v2262_v21, 0.0 }
0x240f   :  { %v2271_v47 = vrot.slane %v2270_v33, 4 }
0x2410   :  { %2617 = vmatpush.msra.mxu2 %v2903_v7 }
0x2411   :  { %v2272_v60 = vadd.f32 %v2271_v47, %v2270_v33 }
0x2412   :  { %2618 = vmatpush.msra.mxu2 %v4155_v15 }
0x2413   :  { %v2273_v61 = vrot.slane %v2272_v60, 2 }
0x2414   :  { %2619 = vmatpush.msra.mxu2 %v4159_v53 }
0x2415   :  { %v2274_v5 = vadd.f32 %v2273_v61, %v2272_v60 }
0x2417   :  { %v2275_v15 = vrot.slane %v2274_v5, 1 }
0x2419   :  { %v2276_v53 = vadd.f32 %v2275_v15, %v2274_v5 }
0x2423   :  { %v2253_v32 = vpop.permute.xlu1 %2252 }
0x2424   :  { %v2261_v38 = vmul.f32 %v4151_v52, %v2253_v32 }
0x2426   :  { %v2263_v39 = vsel %vm198_vm0, %v2261_v38, 0.0 }
0x2427   :  { %v2264_v20 = vrot.slane %v2263_v39, 4 }
0x2429   :  { %v2265_v43 = vadd.f32 %v2264_v20, %v2263_v39 }
0x242b   :  { %v2266_v0 = vrot.slane %v2265_v43, 2 }
0x242d   :  { %v2267_v41 = vadd.f32 %v2266_v0, %v2265_v43 }
0x242f   :  { %v2268_v63 = vrot.slane %v2267_v41, 1 }
0x2431   :  { %v2269_v29 = vadd.f32 %v2268_v63, %v2267_v41 }
0x2433   :  { %v2279_v3 = vsel %vm258_vm2, %v2276_v53, %v2269_v29 }
0x2434   :  { %2699 = vmatmul.msk.f32.vlgmr.msra.gmra.mxu1 %vm320_vm5, %v2279_v3 }
0x2435   :  { %2596 = vmatpush.msra.mxu1 %v4171_v42 }
0x2437   :  { %2597 = vmatpush.msra.mxu1 %v4174_v25 }
0x2439   :  { %2598 = vmatpush.msra.mxu1 %v4177_v2 }
0x243b   :  { %2599 = vmatpush.msra.mxu1 %v4180_v58 }
0x2490   :  { %v2322_v10 = vpop.f32.mrf.mxu2 }
0x24b1   :  { %v2299_v59 = vpop.f32.mrf.mxu1 }
0x24b2   :  { %v2323_v55 = vadd.f32 %v2322_v10, %v2299_v59 }
0x24b4   :  { %v2325_v40 = vadd.f32 %v2904_v51, %v2323_v55 }
0x24b6   :  { %v2346_v18 = vadd.f32 %v4286_v35, %v2325_v40 }
0x24b8   :  { %v2702_v1 = vmul.f32 -1.442695, %v2346_v18 }
0x24ba   :  { %2819 = vpow2.f32 %v2702_v1  ;;  %v2905_v1 = vld [vmem:[#allocation7 + $0x1] ss:$0 sm:$0xff] }
0x24c0   :  { %v2820_v23 = vpop.eup %2819 }
0x24c1   :  { %v2350_v57 = vadd.f32 1.0, %v2820_v23 }
0x24c3   :  { %2821 = vrcp.f32 %v2350_v57  ;;  %v2362_v25 = vand.u32 2147483648, %v2350_v57  ;;  %v2360_v2 = vand.u32 2147483647, %v2350_v57  ;;  %vm2356_vm1 = vweird.f32 %v2350_v57 }
0x24c5   :  { %v2363_v46 = vor.u32 1.1754944e-38, %v2362_v25  ;;  %vm2361_vm7 = vcmp.eq.f32.partialorder %v2360_v2, 8.507059e+37 }
0x24c9   :  { %v2822_v14 = vpop.eup %2821 }
0x24ca   :  { %v2352_v42 = vmul.f32 %v2822_v14, %v2350_v57  ;;  %vm2357_vm15 = vweird.f32 %v2822_v14 }
0x24cb   :  { %vm2358_vm6 = vmor %vm2356_vm1, %vm2357_vm15 }
0x24cc   :  { %v2353_v50 = vsub.f32 1.0, %v2352_v42 }
0x24ce   :  { %v2354_v62 = vmul.f32 %v2822_v14, %v2353_v50 }
0x24d0   :  { %v2355_v58 = vadd.f32 %v2822_v14, %v2354_v62 }
0x24d2   :  { %v2359_v45 = vsel %vm2358_vm6, %v2822_v14, %v2355_v58 }
0x24d3   :  { %v2364_v35 = vsel %vm2361_vm7, %v2363_v46, %v2359_v45 }
0x24d4   :  { %v2370_v56 = vmul.f32 %v2368_v22, %v2364_v35  ;;  %v2377_v19 = vsub.f32 1.0, %v2364_v35  ;;  %v2383_v24 = vmul.f32 %v2364_v35, %v4250_v9 }
0x24d6   :  { %2372 = vrot.lane.b32.xlu0 %v2370_v56, %s3073_s14 }
0x2548   :  { %v2373_v6 = vpop.permute.xlu0 %2372 }
0x2549   :  { %v2375_v30 = vadd.f32 %v2373_v6, %v2325_v40 }
0x254b   :  { %2823 = vtanh.f32 %v2375_v30 }
0x2551   :  { %v2824_v8 = vpop.eup %2823 }
0x2552   :  { %2379 = vrot.lane.b32.xlu2 %v2824_v8, %s3074_s15 }
0x25ac   :  { %v2380_v26 = vpop.permute.xlu2 %2379 }
0x25ad   :  { %v2382_v27 = vmul.f32 %v2380_v26, %v2377_v19 }
0x25af   :  { %v4309_v54 = vadd.f32 %v2383_v24, %v2382_v27 }
0x25b1   :  { %v2387_v48 = vperm.slane %v4309_v54, 0  ;;  %v2386_v4 = vrot.slane %v4309_v54, 1 }
0x25b3   :  { %v2391_v11 = vmul.f32 %v2387_v48, %v3399_v16  ;;  %v2388_v36 = vperm.slane %v2386_v4, 0  ;;  %v2906_v48 = vld [vmem:[#allocation6 + $0x1] ss:$0 sm:$0xff] }
0x25b5   :  { %2395 = vrot.lane.b32.xlu1 %v2391_v11, %s3074_s15  ;;  %v2392_v44 = vmul.f32 %v2388_v36, %v3396_v12 }
0x25b7   :  { %2397 = vrot.lane.b32.xlu0 %v2392_v44, %s3074_s15 }
0x2627   :  { %v2396_v28 = vpop.permute.xlu1 %2395 }
0x2628   :  { %v2401_v13 = vsel %vm198_vm0, %v2396_v28, 0.0 }
0x2629   :  { %2402 = vadd.xlane.f32.xlu2 %v2401_v13  ;;  %v2398_v9 = vpop.permute.xlu0 %2397 }
0x262a   :  { %v2404_v37 = vsel %vm198_vm0, %v2398_v9, 0.0 }
0x262b   :  { %2405 = vadd.xlane.f32.xlu1 %v2404_v37 }
0x269c   :  { %v2403_v7 = vpop.xlane.xlu2 %2402 }
0x269d   :  { %v2407_v17 = vmul.f32 0.17677669, %v2403_v7 }
0x269e   :  { %v2406_v21 = vpop.xlane.xlu1 %2405 }
0x269f   :  { %v2408_v33 = vmul.f32 0.17677669, %v2406_v21  ;;  %v2411_v16 = vperm.slane %v2407_v17, %v3188_v31 }
0x26a1   :  { %v2412_v47 = vperm.slane %v2408_v33, %v3188_v31 }
0x26a3   :  { %v2413_v12 = vsel %vm258_vm2, %v2412_v47, %v2411_v16 }
0x26a4   :  { %v2415_v60 = vsel %vm253_vm3, -1e+30, %v2413_v12 }
0x26a5   :  { %v2416_v32 = vsel %vm262_vm4, %v2415_v60, -inf }
0x26a6   :  { %2417 = vmax.xlane.f32.xlu0 %v2416_v32 }
0x26ba   :  { %2495 = vrot.lane.b32.xlu0 %v4309_v54, %s3074_s15 }
0x2719   :  { %v2418_v38 = vpop.xlane.xlu0 %2417 }
0x271a   :  { %v2419_v61 = vsub.f32 %v2415_v60, %v2418_v38 }
0x271c   :  { %v2420_v39 = vmul.f32 1.442695, %v2419_v61 }
0x271e   :  { %2825 = vpow2.f32 %v2420_v39 }
0x2724   :  { %v2826_v20 = vpop.eup %2825 }
0x2725   :  { %v2422_v5 = vsel %vm262_vm4, %v2826_v20, 0.0 }
0x2726   :  { %2423 = vadd.xlane.f32.xlu2 %v2422_v5 }
0x272c   :  { %v2496_v31 = vpop.permute.xlu0 %2495 }
0x272d   :  { %2704 = vmatmul.msk.f32.vlgmr.msrb.gmra.mxu2 %vm320_vm5, %v2496_v31  ;;  %2705 = vmatmul.msk.f32.vlgmr.msra.gmra.mxu3 %vm320_vm5, %v2496_v31 }
0x2799   :  { %v2424_v34 = vpop.xlane.xlu2 %2423 }
0x279a   :  { %2827 = vrcp.f32 %v2424_v34  ;;  %v2436_v41 = vand.u32 2147483648, %v2424_v34  ;;  %v2434_v53 = vand.u32 2147483647, %v2424_v34  ;;  %vm2430_vm8 = vweird.f32 %v2424_v34 }
0x279c   :  { %v2437_v3 = vor.u32 1.1754944e-38, %v2436_v41  ;;  %vm2435_vm4 = vcmp.eq.f32.partialorder %v2434_v53, 8.507059e+37  ;;  %v2907_v41 = vld [vmem:[%s4365_s10] ss:$0 sm:$0xff] }
0x27a0   :  { %v2828_v43 = vpop.eup %2827 }
0x27a1   :  { %v2426_v0 = vmul.f32 %v2828_v43, %v2424_v34  ;;  %vm2431_vm3 = vweird.f32 %v2828_v43 }
0x27a2   :  { %vm2432_vm11 = vmor %vm2430_vm8, %vm2431_vm3 }
0x27a3   :  { %v2427_v15 = vsub.f32 1.0, %v2426_v0 }
0x27a5   :  { %v2428_v63 = vmul.f32 %v2828_v43, %v2427_v15 }
0x27a7   :  { %v2429_v29 = vadd.f32 %v2828_v43, %v2428_v63 }
0x27a9   :  { %v2433_v10 = vsel %vm2432_vm11, %v2828_v43, %v2429_v29 }
0x27aa   :  { %v2438_v59 = vsel %vm2435_vm4, %v2437_v3, %v2433_v10  ;;  %v2908_v3 = vld [vmem:[%s4367_s12] ss:$0 sm:$0xff] }
0x27ab   :  { %v2439_v55 = vmul.f32 %v2826_v20, %v2438_v59 }
0x27ad   :  { %v2447_v51 = vperm.slane %v2439_v55, 1  ;;  %v2440_v40 = vperm.slane %v2439_v55, 0 }
0x27af   :  { %2452 = vperm.xlu2 %2724, %v2447_v51   ;;  %2445 = vperm.xlu1 %2725, %v2440_v40  }
0x27b0   :  { %v2537_v18 = vpop.f32.mrf.mxu3  ;;  %v2516_v24 = vpop.f32.mrf.mxu2 }
0x27b1   :  { %v2538_v23 = vadd.f32 %v2905_v1, %v2537_v18 }
0x27b7   :  { %2561 = vrot.lane.b32.xlu1 %v2538_v23, %s3073_s14 }
0x2809   :  { %v2453_v57 = vpop.permute.xlu2 %2452 }
0x280a   :  { %v2455_v14 = vmul.f32 %v4165_v49, %v2453_v57 }
0x280c   :  { %v2463_v42 = vsel %vm198_vm0, %v2455_v14, 0.0 }
0x280d   :  { %v2464_v50 = vrot.slane %v2463_v42, 4 }
0x280f   :  { %v2465_v25 = vadd.f32 %v2464_v50, %v2463_v42 }
0x2811   :  { %v2466_v58 = vrot.slane %v2465_v25, 2 }
0x2813   :  { %v2467_v22 = vadd.f32 %v2466_v58, %v2465_v25 }
0x2815   :  { %v2468_v6 = vrot.slane %v2467_v22, 1 }
0x2817   :  { %v2469_v19 = vadd.f32 %v2468_v6, %v2467_v22 }
0x2821   :  { %v2446_v62 = vpop.permute.xlu1 %2445 }
0x2822   :  { %v2454_v2 = vmul.f32 %v4151_v52, %v2446_v62 }
0x2824   :  { %v2456_v46 = vsel %vm198_vm0, %v2454_v2, 0.0 }
0x2825   :  { %v2457_v45 = vrot.slane %v2456_v46, 4 }
0x2827   :  { %v2458_v35 = vadd.f32 %v2457_v45, %v2456_v46 }
0x2829   :  { %v2459_v56 = vrot.slane %v2458_v35, 2  ;;  %v2562_v12 = vpop.permute.xlu1 %2561 }
0x282b   :  { %v2460_v30 = vadd.f32 %v2459_v56, %v2458_v35 }
0x282d   :  { %v2461_v8 = vrot.slane %v2460_v30, 1 }
0x282f   :  { %v2462_v26 = vadd.f32 %v2461_v8, %v2460_v30 }
0x2831   :  { %v2472_v49 = vsel %vm258_vm2, %v2469_v19, %v2462_v26 }
0x2832   :  { %2703 = vmatmul.msk.f32.vlgmr.msrb.gmra.mxu1 %vm320_vm5, %v2472_v49  ;;  %2708 = vmatmul.msk.f32.vlgmr.msra.gmra.mxu2 %vm320_vm5, %v2472_v49 }
0x28af   :  { %v2492_v52 = vpop.f32.mrf.mxu1 }
0x28b0   :  { %v2517_v27 = vadd.f32 %v2516_v24, %v2492_v52 }
0x28b2   :  { %v2519_v4 = vadd.f32 %v2906_v48, %v2517_v27 }
0x28b4   :  { %v2540_v11 = vadd.f32 %v2538_v23, %v2519_v4 }
0x28b5   :  { %v2621_v53 = vpop.f32.mrf.mxu2 }
0x28b6   :  { %v2706_v36 = vmul.f32 -1.442695, %v2540_v11 }
0x28b8   :  { %2829 = vpow2.f32 %v2706_v36 }
0x28be   :  { %v2830_v44 = vpop.eup %2829 }
0x28bf   :  { %v2544_v28 = vadd.f32 1.0, %v2830_v44 }
0x28c1   :  { %2831 = vrcp.f32 %v2544_v28  ;;  %v2556_v7 = vand.u32 2147483648, %v2544_v28  ;;  %v2554_v21 = vand.u32 2147483647, %v2544_v28  ;;  %vm2550_vm2 = vweird.f32 %v2544_v28 }
0x28c3   :  { %v2557_v16 = vor.u32 1.1754944e-38, %v2556_v7  ;;  %vm2555_vm10 = vcmp.eq.f32.partialorder %v2554_v21, 8.507059e+37 }
0x28c7   :  { %v2832_v13 = vpop.eup %2831 }
0x28c8   :  { %v2546_v9 = vmul.f32 %v2832_v13, %v2544_v28  ;;  %vm2551_vm0 = vweird.f32 %v2832_v13 }
0x28c9   :  { %vm2552_vm9 = vmor %vm2550_vm2, %vm2551_vm0 }
0x28ca   :  { %v2547_v37 = vsub.f32 1.0, %v2546_v9 }
0x28cc   :  { %v2548_v17 = vmul.f32 %v2832_v13, %v2547_v37 }
0x28ce   :  { %v2549_v33 = vadd.f32 %v2832_v13, %v2548_v17 }
0x28d0   :  { %v2553_v47 = vsel %vm2552_vm9, %v2832_v13, %v2549_v33 }
0x28d1   :  { %v2558_v60 = vsel %vm2555_vm10, %v2557_v16, %v2553_v47 }
0x28d2   :  { %v2564_v32 = vmul.f32 %v2562_v12, %v2558_v60  ;;  %v2571_v20 = vsub.f32 1.0, %v2558_v60  ;;  %v2577_v31 = vmul.f32 %v2558_v60, %v4309_v54 }
0x28d4   :  { %2566 = vrot.lane.b32.xlu0 %v2564_v32, %s3073_s14 }
0x2946   :  { %v2567_v38 = vpop.permute.xlu0 %2566 }
0x2947   :  { %v2569_v61 = vadd.f32 %v2567_v38, %v2519_v4 }
0x2949   :  { %2833 = vtanh.f32 %v2569_v61 }
0x294f   :  { %v2834_v39 = vpop.eup %2833 }
0x2950   :  { %2573 = vrot.lane.b32.xlu2 %v2834_v39, %s3074_s15 }
0x29aa   :  { %v2574_v5 = vpop.permute.xlu2 %2573 }
0x29ab   :  { %v2576_v34 = vmul.f32 %v2574_v5, %v2571_v20 }
0x29ad   :  { %v2578_v43 = vadd.f32 %v2577_v31, %v2576_v34 }
0x29af   :  { %2580 = vrot.lane.b32.xlu1 %v2578_v43, %s3074_s15 }
0x2a21   :  { %v2581_v0 = vpop.permute.xlu1 %2580 }
0x2a22   :  { %2707 = vmatmul.msk.f32.vlgmr.msra.gmra.mxu1 %vm320_vm5, %v2581_v0 }
0x2a9f   :  { %v2601_v15 = vpop.f32.mrf.mxu1 }
0x2aa0   :  { %v2602_v63 = vadd.f32 %v2907_v41, %v2601_v15 }
0x2aa2   :  { %v2624_v29 = vadd.f32 %v2621_v53, %v2602_v63 }
0x2aa4   :  { %v2625_v54 = vadd.f32 %v2908_v3, %v2624_v29 }
0x2aa6   :  { %v2627_v10 = vrot.slane %v2625_v54, 1  ;;  %2629 = vst [vmem:[%s4368_s13 + $0x4] sm:$0x1] %v2625_v54 }
0x2aa8   :  { %2630 = vst [vmem:[%s4368_s13 + $0xc] sm:$0x1] %v2627_v10 }
0x2aa9   :  { %2635 = vsyncpa [#allocation3], 1 }
0x2aaa   :  { %2636 = vsyncpa [#allocation5], 1 }
0x2aab   :  { %2637 = vsyncpa [#allocation8], 1 }
0x2aac   :  { %2638 = vsyncpa [#allocation11], 1 }

</bundles_post_ra>
